<compile_context>
chip_gen: v7x
topology: tpu7x:2x2x1
jax: 0.10.0
libtpu: 0.0.40
codegen_flags: <defaults>
</compile_context>

<pallas_src>
import jax
import jax.numpy as jnp
from jax.experimental import pallas as pl
from jax.experimental.pallas import tpu as pltpu

BN_EPS = 1e-5
LEAKY_SLOPE = 0.01
PIX_PER_TILE = 7                 # 7 pixels/tile * 128 ch = 896-column fc2 tiles
TN = 128 * PIX_PER_TILE          # 896
N_TILES = 49 // PIX_PER_TILE     # 7


# ----------------------------------------------------------------------------
# The single fused kernel
# ----------------------------------------------------------------------------
def _generator_kernel(x_ref, w1_ref, bn1_ref, w2_ref, bn2_ref,
                      wd3_ref, bd3_ref, wd4_ref, bd4_ref,
                      out_ref, h1_ref, h2_ref):
    jj = pl.program_id(0)
    B = x_ref.shape[0]

    def bn_lrelu(z, bn_ref):
        z = z + bn_ref[0:1, :]                       # linear bias
        m = jnp.mean(z, axis=0, keepdims=True)       # full-batch stats (train)
        v = jnp.mean((z - m) ** 2, axis=0, keepdims=True)
        y = (z - m) * jax.lax.rsqrt(v + BN_EPS)
        y = y * bn_ref[1:2, :] + bn_ref[2:3, :]      # gamma / beta
        return jnp.where(y > 0, y, LEAKY_SLOPE * y)

    # ---- step 0: fc1 + BN + LeakyReLU, kept resident in VMEM scratch -------
    @pl.when(jj == 0)
    def _():
        xb = x_ref[...].astype(jnp.bfloat16)
        z1 = jnp.dot(xb, w1_ref[...], preferred_element_type=jnp.float32)
        h1_ref[...] = bn_lrelu(z1, bn1_ref).astype(jnp.bfloat16)

    # ---- every step: one 896-column tile of fc2 + BN + LeakyReLU -----------
    z2 = jnp.dot(h1_ref[...], w2_ref[...], preferred_element_type=jnp.float32)
    y2 = bn_lrelu(z2, bn2_ref)                       # (B, 896) f32

    # Scatter this tile's 7 pixels into the pixel-major (49*B, 128) slab.
    for q in range(PIX_PER_TILE):
        row0 = (jj * PIX_PER_TILE + q) * B
        h2_ref[pl.ds(row0, B), :] = y2[:, q * 128:(q + 1) * 128]

    # ---- last step: dc3 + LeakyReLU, dc4 + Sigmoid on the full slab --------
    @pl.when(jj == pl.num_programs(0) - 1)
    def _():
        x3 = h2_ref[...].astype(jnp.bfloat16)        # (49*B, 128)
        y3 = jnp.dot(x3, wd3_ref[...], preferred_element_type=jnp.float32)
        y3 = y3 + bd3_ref[...]                       # cols: (ki, kj, c_out)
        y3 = jnp.where(y3 > 0, y3, LEAKY_SLOPE * y3).astype(jnp.bfloat16)
        y4 = jnp.dot(y3, wd4_ref[...], preferred_element_type=jnp.float32)
        y4 = y4 + bd4_ref[...]                       # cols: (ki, kj, koi, koj)
        out_ref[...] = jax.nn.sigmoid(y4)            # (49*B, 16)


def generator_pallas(noise, p):
    B, nd = noise.shape
    return pl.pallas_call(
        _generator_kernel,
        out_shape=jax.ShapeDtypeStruct((49 * B, 16), jnp.float32),
        grid_spec=pltpu.PrefetchScalarGridSpec(
            num_scalar_prefetch=0,
            grid=(N_TILES,),
            in_specs=[
                pl.BlockSpec((B, nd), lambda j: (0, 0)),        # noise
                pl.BlockSpec((nd, 1024), lambda j: (0, 0)),     # w1   (bf16)
                pl.BlockSpec((3, 1024), lambda j: (0, 0)),      # bn1  (b,g,beta)
                pl.BlockSpec((1024, TN), lambda j: (0, j)),     # w2   (bf16, streamed)
                pl.BlockSpec((3, TN), lambda j: (0, j)),        # bn2  (b,g,beta)
                pl.BlockSpec((128, 256), lambda j: (0, 0)),     # wd3  (bf16)
                pl.BlockSpec((1, 256), lambda j: (0, 0)),       # bd3
                pl.BlockSpec((256, 16), lambda j: (0, 0)),      # wd4 block-diag (bf16)
                pl.BlockSpec((1, 16), lambda j: (0, 0)),        # bd4
            ],
            out_specs=pl.BlockSpec((49 * B, 16), lambda j: (0, 0)),
            scratch_shapes=[
                pltpu.VMEM((B, 1024), jnp.bfloat16),            # h1 (fc1 output)
                pltpu.VMEM((49 * B, 128), jnp.float32),         # h2 pixel-major slab
            ],
        ),
        compiler_params=pltpu.CompilerParams(
            dimension_semantics=("arbitrary",)),    # cross-step scratch dependency
    )(noise, p["w1"], p["bn1"], p["w2"], p["bn2"],
      p["wd3"], p["bd3"], p["wd4"], p["bd4"])


@jax.jit
def generator_forward(params, noise):
    """Full Generator forward.  Returns NCHW (B, 1, 28, 28) float32."""
    B = noise.shape[0]
    flat = generator_pallas(noise, params)            # (49*B, 16)
    # rows = (h7, w7, b), cols = (ki, kj, koi, koj); H28 = 4h+2ki+koi, W28 = 4w+2kj+koj
    o = flat.reshape(7, 7, B, 2, 2, 2, 2)
    o = o.transpose(2, 0, 3, 5, 1, 4, 6)              # (b, h7, ki, koi, w7, kj, koj)
    return o.reshape(B, 1, 28, 28)


# ----------------------------------------------------------------------------
# Parameters: raw fp32 (PyTorch-layout) + one-time repack into kernel layout
# ----------------------------------------------------------------------------
def make_params(key, noise_dim=50):
    """Raw fp32 params with the same shapes as the nn.Module (Linear stored (in,out))."""
    ks = jax.random.split(key, 8)

    def lin(kw, kb, fan_in, fan_out):
        bound = 1.0 / (fan_in ** 0.5)
        w = jax.random.uniform(kw, (fan_in, fan_out), jnp.float32, -bound, bound)
        b = jax.random.uniform(kb, (fan_out,), jnp.float32, -bound, bound)
        return w, b

    p = {}
    p["w1"], p["b1"] = lin(ks[0], ks[1], noise_dim, 1024)
    p["g1"], p["be1"] = jnp.ones((1024,), jnp.float32), jnp.zeros((1024,), jnp.float32)
    p["w2"], p["b2"] = lin(ks[2], ks[3], 1024, 128 * 7 * 7)
    p["g2"], p["be2"] = jnp.ones((6272,), jnp.float32), jnp.zeros((6272,), jnp.float32)
    # ConvTranspose2d weights stored (C_in, C_out, kH, kW) as in PyTorch.
    b3 = 1.0 / ((64 * 2 * 2) ** 0.5)
    p["wd3"] = jax.random.uniform(ks[4], (128, 64, 2, 2), jnp.float32, -b3, b3)
    p["bd3"] = jax.random.uniform(ks[5], (64,), jnp.float32, -b3, b3)
    b4 = 1.0 / ((1 * 2 * 2) ** 0.5)
    p["wd4"] = jax.random.uniform(ks[6], (64, 1, 2, 2), jnp.float32, -b4, b4)
    p["bd4"] = jax.random.uniform(ks[7], (1,), jnp.float32, -b4, b4)
    return p


def pack_params(raw):
    """One-time repack: bf16 weights, pixel-major fc2 columns, fused conv layouts."""
    bf16, f32 = jnp.bfloat16, jnp.float32

    # fc2: PyTorch column f = c*49 + p  ->  kernel column p*128 + c (pixel-major).
    def perm_m(w):
        return w.reshape(w.shape[0], 128, 49).transpose(0, 2, 1).reshape(w.shape[0], 6272)

    def perm_v(v):
        return v.reshape(128, 49).T.reshape(-1)

    bn1 = jnp.stack([raw["b1"], raw["g1"], raw["be1"]], axis=0).astype(f32)
    bn2 = jnp.stack([perm_v(raw["b2"]), perm_v(raw["g2"]), perm_v(raw["be2"])],
                    axis=0).astype(f32)

    # dc3: (C_in, C_out, 2, 2) -> (128, 256) with columns ordered (ki, kj, c_out).
    wd3 = raw["wd3"].transpose(0, 2, 3, 1).reshape(128, 256)
    bd3 = jnp.tile(raw["bd3"], 4).reshape(1, 256).astype(f32)

    # dc4: (64, 1, 2, 2) -> (64, 4), folded into a (256, 16) block-diagonal so the
    # four (ki, kj) sub-positions of dc3's output are handled by ONE matmul.
    wd4 = raw["wd4"].reshape(64, 4)
    wd4_bd = jnp.kron(jnp.eye(4, dtype=jnp.float32), wd4)
    bd4 = jnp.tile(raw["bd4"], 16).reshape(1, 16).astype(f32)

    return {
        "w1": raw["w1"].astype(bf16), "bn1": bn1,
        "w2": perm_m(raw["w2"]).astype(bf16), "bn2": bn2,
        "wd3": wd3.astype(bf16), "bd3": bd3,
        "wd4": wd4_bd.astype(bf16), "bd4": bd4,
    }


# ----------------------------------------------------------------------------
# Pure-JAX reference (PyTorch layout / semantics, same bf16 cast points)
# ----------------------------------------------------------------------------
def reference_forward(raw, noise):
    bf16, f32 = jnp.bfloat16, jnp.float32
    B = noise.shape[0]

    def bn(z, g, b):
        m = jnp.mean(z, axis=0, keepdims=True)
        v = jnp.mean((z - m) ** 2, axis=0, keepdims=True)
        return (z - m) * jax.lax.rsqrt(v + BN_EPS) * g + b

    def lrelu(z):
        return jnp.where(z > 0, z, LEAKY_SLOPE * z)

    z1 = jnp.dot(noise.astype(bf16), raw["w1"].astype(bf16),
                 preferred_element_type=f32) + raw["b1"]
    h1 = lrelu(bn(z1, raw["g1"], raw["be1"])).astype(bf16)

    z2 = jnp.dot(h1, raw["w2"].astype(bf16), preferred_element_type=f32) + raw["b2"]
    h2 = lrelu(bn(z2, raw["g2"], raw["be2"])).astype(bf16)

    x3 = h2.reshape(B, 128, 7, 7)                                      # NCHW view
    t3 = jnp.einsum("bchw,coij->bhiwjo", x3, raw["wd3"].astype(bf16),
                    preferred_element_type=f32)
    h3 = lrelu(t3.reshape(B, 14, 14, 64) + raw["bd3"]).astype(bf16)    # NHWC
    t4 = jnp.einsum("bhwc,coij->bhiwjo", h3, raw["wd4"].astype(bf16),
                    preferred_element_type=f32)
    y4 = t4.reshape(B, 28, 28, 1) + raw["bd4"]
    return jax.nn.sigmoid(y4).transpose(0, 3, 1, 2)                    # NCHW


# ----------------------------------------------------------------------------
if __name__ == "__main__":
    key = jax.random.PRNGKey(0)
    pkey, xkey = jax.random.split(key)

    NOISE_DIM = 50
    BATCH = 4

    raw = make_params(pkey, NOISE_DIM)
    params = pack_params(raw)
    noise = jax.random.normal(xkey, (BATCH, NOISE_DIM), jnp.float32)

    out = generator_forward(params, noise)
    jax.block_until_ready(out)

    assert out.shape == (BATCH, 1, 28, 28), out.shape
    assert out.dtype == jnp.float32
    assert bool(jnp.all(jnp.isfinite(out)))
    assert bool(jnp.all((out >= 0.0) & (out <= 1.0)))        # sigmoid range

    ref = reference_forward(raw, noise)
    max_err = float(jnp.max(jnp.abs(out - ref)))
    assert max_err < 2e-2, f"mismatch vs reference: max abs err = {max_err}"

    # TODO(synk): BatchNorm running-mean/var buffer updates (a training-mode side
    # effect) are not modeled; the returned tensor does not depend on them.
    print("KERNEL_OK")
</pallas_src>

<mosaic_0001>
module attributes {stable_mosaic.version = 11 : i64} {
  func.func @_generator_kernel(%arg0: i32, %arg1: memref<4x50xf32, #tpu.memory_space<vmem>>, %arg2: memref<50x1024xbf16, #tpu.memory_space<vmem>>, %arg3: memref<3x1024xf32, #tpu.memory_space<vmem>>, %arg4: memref<1024x896xbf16, #tpu.memory_space<vmem>>, %arg5: memref<3x896xf32, #tpu.memory_space<vmem>>, %arg6: memref<128x256xbf16, #tpu.memory_space<vmem>>, %arg7: memref<1x256xf32, #tpu.memory_space<vmem>>, %arg8: memref<256x16xbf16, #tpu.memory_space<vmem>>, %arg9: memref<1x16xf32, #tpu.memory_space<vmem>>, %arg10: memref<196x16xf32, #tpu.memory_space<vmem>>, %arg11: memref<4x1024xbf16, #tpu.memory_space<vmem>>, %arg12: memref<196x128xf32, #tpu.memory_space<vmem>>) attributes {dimension_semantics = [#tpu.dimension_semantics<arbitrary>], iteration_bounds = array<i64: 7>, scalar_prefetch = 0 : i64, scratch_operands = 2 : i64, tpu.core_type = #tpu.core_type<tc>, window_params = [{pipeline_mode = #tpu.pipeline_mode<synchronous>, transform_indices = @transform_0, window_bounds = array<i64: 4, 50>}, {pipeline_mode = #tpu.pipeline_mode<synchronous>, transform_indices = @transform_1, window_bounds = array<i64: 50, 1024>}, {pipeline_mode = #tpu.pipeline_mode<synchronous>, transform_indices = @transform_2, window_bounds = array<i64: 3, 1024>}, {transform_indices = @transform_3, window_bounds = array<i64: 1024, 896>}, {transform_indices = @transform_4, window_bounds = array<i64: 3, 896>}, {pipeline_mode = #tpu.pipeline_mode<synchronous>, transform_indices = @transform_5, window_bounds = array<i64: 128, 256>}, {pipeline_mode = #tpu.pipeline_mode<synchronous>, transform_indices = @transform_6, window_bounds = array<i64: 1, 256>}, {pipeline_mode = #tpu.pipeline_mode<synchronous>, transform_indices = @transform_7, window_bounds = array<i64: 256, 16>}, {pipeline_mode = #tpu.pipeline_mode<synchronous>, transform_indices = @transform_8, window_bounds = array<i64: 1, 16>}, {pipeline_mode = #tpu.pipeline_mode<synchronous>, transform_indices = @transform_9, window_bounds = array<i64: 196, 16>}]} {
    %c0_i32 = arith.constant 0 : i32
    %0 = arith.cmpi eq, %arg0, %c0_i32 : i32
    %1 = arith.extui %0 : i1 to i32
    %c0_i32_0 = arith.constant 0 : i32
    %2 = arith.cmpi ne, %1, %c0_i32_0 : i32
    scf.if %2 {
      %c0_38 = arith.constant 0 : index
      %c0_39 = arith.constant 0 : index
      %83 = vector.load %arg1[%c0_38, %c0_39] : memref<4x50xf32, #tpu.memory_space<vmem>>, vector<4x50xf32>
      %84 = arith.truncf %83 : vector<4x50xf32> to vector<4x50xbf16>
      %c0_40 = arith.constant 0 : index
      %c0_41 = arith.constant 0 : index
      %85 = vector.load %arg2[%c0_40, %c0_41] : memref<50x1024xbf16, #tpu.memory_space<vmem>>, vector<50x1024xbf16>
      %cst_42 = arith.constant dense<0.000000e+00> : vector<4x1024xf32>
      %86 = tpu.matmul %84, %85, %cst_42 {dimension_numbers = #tpu.dot_dimension_numbers<[1], [0], [0], [1], [0, 0, 1, 1], [], []>} : vector<4x50xbf16>, vector<50x1024xbf16>, vector<4x1024xf32> -> vector<4x1024xf32>
      %c0_43 = arith.constant 0 : index
      %c0_44 = arith.constant 0 : index
      %87 = vector.load %arg3[%c0_43, %c0_44] : memref<3x1024xf32, #tpu.memory_space<vmem>>, vector<1x1024xf32>
      %88 = vector.broadcast %87 : vector<1x1024xf32> to vector<4x1024xf32>
      %89 = arith.addf %86, %88 : vector<4x1024xf32>
      %cst_45 = arith.constant dense<0.000000e+00> : vector<1024xf32>
      %90 = vector.multi_reduction <add>, %89, %cst_45 [0] : vector<4x1024xf32> to vector<1024xf32>
      %91 = vector.shape_cast %90 : vector<1024xf32> to vector<1x1024xf32>
      %cst_46 = arith.constant 4.000000e+00 : f32
      %92 = vector.broadcast %cst_46 : f32 to vector<1x1024xf32>
      %93 = arith.divf %91, %92 : vector<1x1024xf32>
      %94 = vector.broadcast %93 : vector<1x1024xf32> to vector<4x1024xf32>
      %95 = arith.subf %89, %94 : vector<4x1024xf32>
      %96 = arith.mulf %95, %95 : vector<4x1024xf32>
      %cst_47 = arith.constant dense<0.000000e+00> : vector<1024xf32>
      %97 = vector.multi_reduction <add>, %96, %cst_47 [0] : vector<4x1024xf32> to vector<1024xf32>
      %98 = vector.shape_cast %97 : vector<1024xf32> to vector<1x1024xf32>
      %cst_48 = arith.constant 4.000000e+00 : f32
      %99 = vector.broadcast %cst_48 : f32 to vector<1x1024xf32>
      %100 = arith.divf %98, %99 : vector<1x1024xf32>
      %101 = vector.broadcast %93 : vector<1x1024xf32> to vector<4x1024xf32>
      %102 = arith.subf %89, %101 : vector<4x1024xf32>
      %cst_49 = arith.constant 9.99999974E-6 : f32
      %103 = vector.broadcast %cst_49 : f32 to vector<1x1024xf32>
      %104 = arith.addf %100, %103 : vector<1x1024xf32>
      %105 = math.rsqrt %104 : vector<1x1024xf32>
      %106 = vector.broadcast %105 : vector<1x1024xf32> to vector<4x1024xf32>
      %107 = arith.mulf %102, %106 : vector<4x1024xf32>
      %c1_50 = arith.constant 1 : index
      %c0_51 = arith.constant 0 : index
      %108 = vector.load %arg3[%c1_50, %c0_51] : memref<3x1024xf32, #tpu.memory_space<vmem>>, vector<1x1024xf32>
      %109 = vector.broadcast %108 : vector<1x1024xf32> to vector<4x1024xf32>
      %110 = arith.mulf %107, %109 : vector<4x1024xf32>
      %c2_52 = arith.constant 2 : index
      %c0_53 = arith.constant 0 : index
      %111 = vector.load %arg3[%c2_52, %c0_53] : memref<3x1024xf32, #tpu.memory_space<vmem>>, vector<1x1024xf32>
      %112 = vector.broadcast %111 : vector<1x1024xf32> to vector<4x1024xf32>
      %113 = arith.addf %110, %112 : vector<4x1024xf32>
      %cst_54 = arith.constant 0.000000e+00 : f32
      %114 = vector.broadcast %cst_54 : f32 to vector<4x1024xf32>
      %115 = arith.cmpf ogt, %113, %114 : vector<4x1024xf32>
      %cst_55 = arith.constant 0.00999999977 : f32
      %116 = vector.broadcast %cst_55 : f32 to vector<4x1024xf32>
      %117 = arith.mulf %116, %113 : vector<4x1024xf32>
      %118 = arith.select %115, %113, %117 : vector<4x1024xi1>, vector<4x1024xf32>
      %119 = arith.truncf %118 : vector<4x1024xf32> to vector<4x1024xbf16>
      %c0_56 = arith.constant 0 : index
      %c0_57 = arith.constant 0 : index
      %120 = vector.load %arg11[%c0_56, %c0_57] : memref<4x1024xbf16, #tpu.memory_space<vmem>>, vector<4x1024xbf16>
      tpu.vector_store %arg11[%c0_56, %c0_57], %119 {strides = array<i32>} : memref<4x1024xbf16, #tpu.memory_space<vmem>>, vector<4x1024xbf16>,
    } else {
    }
    %c0 = arith.constant 0 : index
    %c0_1 = arith.constant 0 : index
    %3 = vector.load %arg11[%c0, %c0_1] : memref<4x1024xbf16, #tpu.memory_space<vmem>>, vector<4x1024xbf16>
    %c0_2 = arith.constant 0 : index
    %c0_3 = arith.constant 0 : index
    %4 = vector.load %arg4[%c0_2, %c0_3] : memref<1024x896xbf16, #tpu.memory_space<vmem>>, vector<1024x896xbf16>
    %cst = arith.constant dense<0.000000e+00> : vector<4x896xf32>
    %5 = tpu.matmul %3, %4, %cst {dimension_numbers = #tpu.dot_dimension_numbers<[1], [0], [0], [1], [0, 0, 1, 1], [], []>} : vector<4x1024xbf16>, vector<1024x896xbf16>, vector<4x896xf32> -> vector<4x896xf32>
    %c0_4 = arith.constant 0 : index
    %c0_5 = arith.constant 0 : index
    %6 = vector.load %arg5[%c0_4, %c0_5] : memref<3x896xf32, #tpu.memory_space<vmem>>, vector<1x896xf32>
    %7 = vector.broadcast %6 : vector<1x896xf32> to vector<4x896xf32>
    %8 = arith.addf %5, %7 : vector<4x896xf32>
    %cst_6 = arith.constant dense<0.000000e+00> : vector<896xf32>
    %9 = vector.multi_reduction <add>, %8, %cst_6 [0] : vector<4x896xf32> to vector<896xf32>
    %10 = vector.shape_cast %9 : vector<896xf32> to vector<1x896xf32>
    %cst_7 = arith.constant 4.000000e+00 : f32
    %11 = vector.broadcast %cst_7 : f32 to vector<1x896xf32>
    %12 = arith.divf %10, %11 : vector<1x896xf32>
    %13 = vector.broadcast %12 : vector<1x896xf32> to vector<4x896xf32>
    %14 = arith.subf %8, %13 : vector<4x896xf32>
    %15 = arith.mulf %14, %14 : vector<4x896xf32>
    %cst_8 = arith.constant dense<0.000000e+00> : vector<896xf32>
    %16 = vector.multi_reduction <add>, %15, %cst_8 [0] : vector<4x896xf32> to vector<896xf32>
    %17 = vector.shape_cast %16 : vector<896xf32> to vector<1x896xf32>
    %cst_9 = arith.constant 4.000000e+00 : f32
    %18 = vector.broadcast %cst_9 : f32 to vector<1x896xf32>
    %19 = arith.divf %17, %18 : vector<1x896xf32>
    %20 = vector.broadcast %12 : vector<1x896xf32> to vector<4x896xf32>
    %21 = arith.subf %8, %20 : vector<4x896xf32>
    %cst_10 = arith.constant 9.99999974E-6 : f32
    %22 = vector.broadcast %cst_10 : f32 to vector<1x896xf32>
    %23 = arith.addf %19, %22 : vector<1x896xf32>
    %24 = math.rsqrt %23 : vector<1x896xf32>
    %25 = vector.broadcast %24 : vector<1x896xf32> to vector<4x896xf32>
    %26 = arith.mulf %21, %25 : vector<4x896xf32>
    %c1 = arith.constant 1 : index
    %c0_11 = arith.constant 0 : index
    %27 = vector.load %arg5[%c1, %c0_11] : memref<3x896xf32, #tpu.memory_space<vmem>>, vector<1x896xf32>
    %28 = vector.broadcast %27 : vector<1x896xf32> to vector<4x896xf32>
    %29 = arith.mulf %26, %28 : vector<4x896xf32>
    %c2 = arith.constant 2 : index
    %c0_12 = arith.constant 0 : index
    %30 = vector.load %arg5[%c2, %c0_12] : memref<3x896xf32, #tpu.memory_space<vmem>>, vector<1x896xf32>
    %31 = vector.broadcast %30 : vector<1x896xf32> to vector<4x896xf32>
    %32 = arith.addf %29, %31 : vector<4x896xf32>
    %cst_13 = arith.constant 0.000000e+00 : f32
    %33 = vector.broadcast %cst_13 : f32 to vector<4x896xf32>
    %34 = arith.cmpf ogt, %32, %33 : vector<4x896xf32>
    %cst_14 = arith.constant 0.00999999977 : f32
    %35 = vector.broadcast %cst_14 : f32 to vector<4x896xf32>
    %36 = arith.mulf %35, %32 : vector<4x896xf32>
    %37 = arith.select %34, %32, %36 : vector<4x896xi1>, vector<4x896xf32>
    %c7_i32 = arith.constant 7 : i32
    %38 = arith.muli %arg0, %c7_i32 : i32
    %c0_i32_15 = arith.constant 0 : i32
    %39 = arith.addi %38, %c0_i32_15 : i32
    %c4_i32 = arith.constant 4 : i32
    %40 = arith.muli %39, %c4_i32 : i32
    %41 = vector.extract_strided_slice %37 {offsets = [0, 0], sizes = [4, 128], strides = [1, 1]} : vector<4x896xf32> to vector<4x128xf32>
    %42 = arith.index_cast %40 : i32 to index
    %c0_16 = arith.constant 0 : index
    %43 = vector.load %arg12[%42, %c0_16] : memref<196x128xf32, #tpu.memory_space<vmem>>, vector<4x128xf32>
    tpu.vector_store %arg12[%42, %c0_16], %41 {strides = array<i32>} : memref<196x128xf32, #tpu.memory_space<vmem>>, vector<4x128xf32>,
    %c7_i32_17 = arith.constant 7 : i32
    %44 = arith.muli %arg0, %c7_i32_17 : i32
    %c1_i32 = arith.constant 1 : i32
    %45 = arith.addi %44, %c1_i32 : i32
    %c4_i32_18 = arith.constant 4 : i32
    %46 = arith.muli %45, %c4_i32_18 : i32
    %47 = vector.extract_strided_slice %37 {offsets = [0, 128], sizes = [4, 128], strides = [1, 1]} : vector<4x896xf32> to vector<4x128xf32>
    %48 = arith.index_cast %46 : i32 to index
    %c0_19 = arith.constant 0 : index
    %49 = vector.load %arg12[%48, %c0_19] : memref<196x128xf32, #tpu.memory_space<vmem>>, vector<4x128xf32>
    tpu.vector_store %arg12[%48, %c0_19], %47 {strides = array<i32>} : memref<196x128xf32, #tpu.memory_space<vmem>>, vector<4x128xf32>,
    %c7_i32_20 = arith.constant 7 : i32
    %50 = arith.muli %arg0, %c7_i32_20 : i32
    %c2_i32 = arith.constant 2 : i32
    %51 = arith.addi %50, %c2_i32 : i32
    %c4_i32_21 = arith.constant 4 : i32
    %52 = arith.muli %51, %c4_i32_21 : i32
    %53 = vector.extract_strided_slice %37 {offsets = [0, 256], sizes = [4, 128], strides = [1, 1]} : vector<4x896xf32> to vector<4x128xf32>
    %54 = arith.index_cast %52 : i32 to index
    %c0_22 = arith.constant 0 : index
    %55 = vector.load %arg12[%54, %c0_22] : memref<196x128xf32, #tpu.memory_space<vmem>>, vector<4x128xf32>
    tpu.vector_store %arg12[%54, %c0_22], %53 {strides = array<i32>} : memref<196x128xf32, #tpu.memory_space<vmem>>, vector<4x128xf32>,
    %c7_i32_23 = arith.constant 7 : i32
    %56 = arith.muli %arg0, %c7_i32_23 : i32
    %c3_i32 = arith.constant 3 : i32
    %57 = arith.addi %56, %c3_i32 : i32
    %c4_i32_24 = arith.constant 4 : i32
    %58 = arith.muli %57, %c4_i32_24 : i32
    %59 = vector.extract_strided_slice %37 {offsets = [0, 384], sizes = [4, 128], strides = [1, 1]} : vector<4x896xf32> to vector<4x128xf32>
    %60 = arith.index_cast %58 : i32 to index
    %c0_25 = arith.constant 0 : index
    %61 = vector.load %arg12[%60, %c0_25] : memref<196x128xf32, #tpu.memory_space<vmem>>, vector<4x128xf32>
    tpu.vector_store %arg12[%60, %c0_25], %59 {strides = array<i32>} : memref<196x128xf32, #tpu.memory_space<vmem>>, vector<4x128xf32>,
    %c7_i32_26 = arith.constant 7 : i32
    %62 = arith.muli %arg0, %c7_i32_26 : i32
    %c4_i32_27 = arith.constant 4 : i32
    %63 = arith.addi %62, %c4_i32_27 : i32
    %c4_i32_28 = arith.constant 4 : i32
    %64 = arith.muli %63, %c4_i32_28 : i32
    %65 = vector.extract_strided_slice %37 {offsets = [0, 512], sizes = [4, 128], strides = [1, 1]} : vector<4x896xf32> to vector<4x128xf32>
    %66 = arith.index_cast %64 : i32 to index
    %c0_29 = arith.constant 0 : index
    %67 = vector.load %arg12[%66, %c0_29] : memref<196x128xf32, #tpu.memory_space<vmem>>, vector<4x128xf32>
    tpu.vector_store %arg12[%66, %c0_29], %65 {strides = array<i32>} : memref<196x128xf32, #tpu.memory_space<vmem>>, vector<4x128xf32>,
    %c7_i32_30 = arith.constant 7 : i32
    %68 = arith.muli %arg0, %c7_i32_30 : i32
    %c5_i32 = arith.constant 5 : i32
    %69 = arith.addi %68, %c5_i32 : i32
    %c4_i32_31 = arith.constant 4 : i32
    %70 = arith.muli %69, %c4_i32_31 : i32
    %71 = vector.extract_strided_slice %37 {offsets = [0, 640], sizes = [4, 128], strides = [1, 1]} : vector<4x896xf32> to vector<4x128xf32>
    %72 = arith.index_cast %70 : i32 to index
    %c0_32 = arith.constant 0 : index
    %73 = vector.load %arg12[%72, %c0_32] : memref<196x128xf32, #tpu.memory_space<vmem>>, vector<4x128xf32>
    tpu.vector_store %arg12[%72, %c0_32], %71 {strides = array<i32>} : memref<196x128xf32, #tpu.memory_space<vmem>>, vector<4x128xf32>,
    %c7_i32_33 = arith.constant 7 : i32
    %74 = arith.muli %arg0, %c7_i32_33 : i32
    %c6_i32 = arith.constant 6 : i32
    %75 = arith.addi %74, %c6_i32 : i32
    %c4_i32_34 = arith.constant 4 : i32
    %76 = arith.muli %75, %c4_i32_34 : i32
    %77 = vector.extract_strided_slice %37 {offsets = [0, 768], sizes = [4, 128], strides = [1, 1]} : vector<4x896xf32> to vector<4x128xf32>
    %78 = arith.index_cast %76 : i32 to index
    %c0_35 = arith.constant 0 : index
    %79 = vector.load %arg12[%78, %c0_35] : memref<196x128xf32, #tpu.memory_space<vmem>>, vector<4x128xf32>
    tpu.vector_store %arg12[%78, %c0_35], %77 {strides = array<i32>} : memref<196x128xf32, #tpu.memory_space<vmem>>, vector<4x128xf32>,
    %c6_i32_36 = arith.constant 6 : i32
    %80 = arith.cmpi eq, %arg0, %c6_i32_36 : i32
    %81 = arith.extui %80 : i1 to i32
    %c0_i32_37 = arith.constant 0 : i32
    %82 = arith.cmpi ne, %81, %c0_i32_37 : i32
    scf.if %82 {
      %c0_38 = arith.constant 0 : index
      %c0_39 = arith.constant 0 : index
      %83 = vector.load %arg12[%c0_38, %c0_39] : memref<196x128xf32, #tpu.memory_space<vmem>>, vector<196x128xf32>
      %84 = arith.truncf %83 : vector<196x128xf32> to vector<196x128xbf16>
      %c0_40 = arith.constant 0 : index
      %c0_41 = arith.constant 0 : index
      %85 = vector.load %arg6[%c0_40, %c0_41] : memref<128x256xbf16, #tpu.memory_space<vmem>>, vector<128x256xbf16>
      %cst_42 = arith.constant dense<0.000000e+00> : vector<196x256xf32>
      %86 = tpu.matmul %84, %85, %cst_42 {dimension_numbers = #tpu.dot_dimension_numbers<[1], [0], [0], [1], [0, 0, 1, 1], [], []>} : vector<196x128xbf16>, vector<128x256xbf16>, vector<196x256xf32> -> vector<196x256xf32>
      %c0_43 = arith.constant 0 : index
      %c0_44 = arith.constant 0 : index
      %87 = vector.load %arg7[%c0_43, %c0_44] : memref<1x256xf32, #tpu.memory_space<vmem>>, vector<1x256xf32>
      %88 = vector.broadcast %87 : vector<1x256xf32> to vector<196x256xf32>
      %89 = arith.addf %86, %88 : vector<196x256xf32>
      %cst_45 = arith.constant 0.000000e+00 : f32
      %90 = vector.broadcast %cst_45 : f32 to vector<196x256xf32>
      %91 = arith.cmpf ogt, %89, %90 : vector<196x256xf32>
      %cst_46 = arith.constant 0.00999999977 : f32
      %92 = vector.broadcast %cst_46 : f32 to vector<196x256xf32>
      %93 = arith.mulf %92, %89 : vector<196x256xf32>
      %94 = arith.select %91, %89, %93 : vector<196x256xi1>, vector<196x256xf32>
      %95 = arith.truncf %94 : vector<196x256xf32> to vector<196x256xbf16>
      %c0_47 = arith.constant 0 : index
      %c0_48 = arith.constant 0 : index
      %96 = vector.load %arg8[%c0_47, %c0_48] : memref<256x16xbf16, #tpu.memory_space<vmem>>, vector<256x16xbf16>
      %cst_49 = arith.constant dense<0.000000e+00> : vector<196x16xf32>
      %97 = tpu.matmul %95, %96, %cst_49 {dimension_numbers = #tpu.dot_dimension_numbers<[1], [0], [0], [1], [0, 0, 1, 1], [], []>} : vector<196x256xbf16>, vector<256x16xbf16>, vector<196x16xf32> -> vector<196x16xf32>
      %c0_50 = arith.constant 0 : index
      %c0_51 = arith.constant 0 : index
      %98 = vector.load %arg9[%c0_50, %c0_51] : memref<1x16xf32, #tpu.memory_space<vmem>>, vector<1x16xf32>
      %99 = vector.broadcast %98 : vector<1x16xf32> to vector<196x16xf32>
      %100 = arith.addf %97, %99 : vector<196x16xf32>
      %101 = arith.negf %100 : vector<196x16xf32>
      %102 = math.exp %101 : vector<196x16xf32>
      %cst_52 = arith.constant 1.000000e+00 : f32
      %103 = vector.broadcast %cst_52 : f32 to vector<196x16xf32>
      %104 = arith.addf %103, %102 : vector<196x16xf32>
      %105 = arith.divf %103, %104 : vector<196x16xf32>
      %c0_53 = arith.constant 0 : index
      %c0_54 = arith.constant 0 : index
      %106 = vector.load %arg10[%c0_53, %c0_54] : memref<196x16xf32, #tpu.memory_space<vmem>>, vector<196x16xf32>
      tpu.vector_store %arg10[%c0_53, %c0_54], %105 {strides = array<i32>} : memref<196x16xf32, #tpu.memory_space<vmem>>, vector<196x16xf32>,
    } else {
    }
    return
  }
  func.func @transform_0(%arg0: i32) -> (i32, i32) {
    %c0_i32 = arith.constant 0 : i32
    %c0_i32_0 = arith.constant 0 : i32
    %c0_i32_1 = arith.constant 0 : i32
    return %c0_i32, %c0_i32_0 : i32, i32
  }
  func.func @transform_1(%arg0: i32) -> (i32, i32) {
    %c0_i32 = arith.constant 0 : i32
    %c0_i32_0 = arith.constant 0 : i32
    %c0_i32_1 = arith.constant 0 : i32
    return %c0_i32, %c0_i32_0 : i32, i32
  }
  func.func @transform_2(%arg0: i32) -> (i32, i32) {
    %c0_i32 = arith.constant 0 : i32
    %c0_i32_0 = arith.constant 0 : i32
    %c0_i32_1 = arith.constant 0 : i32
    return %c0_i32, %c0_i32_0 : i32, i32
  }
  func.func @transform_3(%arg0: i32) -> (i32, i32) {
    %c0_i32 = arith.constant 0 : i32
    %c0_i32_0 = arith.constant 0 : i32
    return %c0_i32, %arg0 : i32, i32
  }
  func.func @transform_4(%arg0: i32) -> (i32, i32) {
    %c0_i32 = arith.constant 0 : i32
    %c0_i32_0 = arith.constant 0 : i32
    return %c0_i32, %arg0 : i32, i32
  }
  func.func @transform_5(%arg0: i32) -> (i32, i32) {
    %c0_i32 = arith.constant 0 : i32
    %c0_i32_0 = arith.constant 0 : i32
    %c0_i32_1 = arith.constant 0 : i32
    return %c0_i32, %c0_i32_0 : i32, i32
  }
  func.func @transform_6(%arg0: i32) -> (i32, i32) {
    %c0_i32 = arith.constant 0 : i32
    %c0_i32_0 = arith.constant 0 : i32
    %c0_i32_1 = arith.constant 0 : i32
    return %c0_i32, %c0_i32_0 : i32, i32
  }
  func.func @transform_7(%arg0: i32) -> (i32, i32) {
    %c0_i32 = arith.constant 0 : i32
    %c0_i32_0 = arith.constant 0 : i32
    %c0_i32_1 = arith.constant 0 : i32
    return %c0_i32, %c0_i32_0 : i32, i32
  }
  func.func @transform_8(%arg0: i32) -> (i32, i32) {
    %c0_i32 = arith.constant 0 : i32
    %c0_i32_0 = arith.constant 0 : i32
    %c0_i32_1 = arith.constant 0 : i32
    return %c0_i32, %c0_i32_0 : i32, i32
  }
  func.func @transform_9(%arg0: i32) -> (i32, i32) {
    %c0_i32 = arith.constant 0 : i32
    %c0_i32_0 = arith.constant 0 : i32
    %c0_i32_1 = arith.constant 0 : i32
    return %c0_i32, %c0_i32_0 : i32, i32
  }
}

</mosaic_0001>

<bundles_post_ra>
// kernel: generator_forward.1
= control target key start
LH: loop header
LB: loop body
LE: loop exit
PB: predicated region body
PF: predicated region fallthrough
CT: control target
= control target key end

     0   :  { %s9603_s0 = inlined_call_operand.hbm [shape: f32[4,50], index: 0, kind: input, shape index: {}]   ;;  %s9604_s1 = inlined_call_operand.hbm [shape: bf16[50,1024], index: 1, kind: input, shape index: {}]   ;;  %s9605_s2 = inlined_call_operand.hbm [shape: f32[3,1024], index: 2, kind: input, shape index: {}]   ;;  %s9606_s3 = inlined_call_operand.hbm [shape: bf16[1024,6272], index: 3, kind: input, shape index: {}]   ;;  %s9607_s4 = inlined_call_operand.hbm [shape: f32[3,6272], index: 4, kind: input, shape index: {}]   ;;  %s9608_s5 = inlined_call_operand.hbm [shape: bf16[128,256], index: 5, kind: input, shape index: {}]   ;;  %s9609_s6 = inlined_call_operand.hbm [shape: f32[1,256], index: 6, kind: input, shape index: {}]   ;;  %s9610_s7 = inlined_call_operand.vmem [shape: bf16[256,16], index: 7, kind: input, shape index: {}]   ;;  %s9611_s8 = inlined_call_operand.hbm [shape: f32[1,16], index: 8, kind: input, shape index: {}]   ;;  %s9612_s9 = inlined_call_operand.vmem [shape: f32[196,16], index: 9, kind: output, shape index: {}]  }
   0x1   :  { %9626 = sst [smem:[#allocation24_spill]] %s9604_s1 }
   0x2   :  { %9627 = sst [smem:[#allocation25_spill]] %s9606_s3 }
   0x3   :  { %9628 = sst [smem:[#allocation26_spill]] %s9608_s5 }
   0x4   :  { %9629 = sst [smem:[#allocation27_spill]] %s9612_s9 }
   0x5   :  { %14 = vsyncpa [#allocation5], 0 }
   0x6   :  { %15 = vsyncpa [#allocation7], 0 }
   0x7   :  { %16 = vsyncpa [#allocation10], 0 }
   0x8   :  { %18 = vsyncpa [#allocation10 + $0x1], 0 }
   0x9   :  { %19 = vsyncpa [#allocation13], 0 }
   0xa   :  { %20 = vsyncpa [#allocation16], 0  ;;  %s8233_s30 = smov 0   ;;  %s8235_s10 = smov 0  }
   0xb   :  { %s8237_s11 = smov 0   ;;  %s8239_s12 = smov 0  }
   0xc LB: > { %s8164_s13 = smov [#allocation6]   ;;  %s8254_s15 = sadd.s32 4294967295, %s8162_s12   ;;  %s8162_s12 = sphi %s8239_s12, %s9659_s12   ;;  %s8158_s11 = sphi %s8237_s11, %s9663_s11   ;;  %s8154_s10 = sphi %s8235_s10, %s9662_s10   ;;  %s8150_s30 = sphi %s8233_s30, %s9661_s30  }
   0xd   : > { %s274_s14 = sshll.u32 %s8164_s13, 4  ;;  %p6135_p0 = scmp.ge.s32.totalorder %s8162_s12, 1  ;;  %s8260_s14 = int_to_ptr.vmem [resolvable:$true] %s274_s14 }
   0xe   : > { %p9615_p1 = scmp.eq.s32.totalorder %s8254_s15, 0  ;;  %p251_p2 = scmp.lt.s32.totalorder %s8162_s12, 8 }
   0xf   : > { %s8165_s17 = smov [#allocation12]   ;;  %s9632_s1 = sld [smem:[#allocation24_spill]] }
  0x10   : > { %p8262_p4 = pnand %p6135_p0, %p251_p2  ;;  %s298_s18 = sshll.u32 %s8165_s17, 4  ;;  %s8274_s18 = int_to_ptr.vmem [resolvable:$true] %s298_s18 }
  0x12   : > { %s9630_s16 = scalar_select %p8262_p4, 1, 0 }
  0x13   : > { %p6976_p5 = pneg %p8262_p4 }
  0x15   : > { %p8270_p6 = pnand %p6976_p5, %p9615_p1  ;;  %s7884_s22 = scalar_lea.hbm %s9632_s1, 3584 }
  0x16   : > { %p7885_p7 = scmp.ne.s32.totalorder %s9632_s1, %s7884_s22  ;;  %p7891_p11 = scmp.lt.u32.totalorder %s7884_s22, %s9632_s1 }
  0x17   : > { %s9631_s19 = scalar_select %p8270_p6, 1, 0 }
  0x18   : > { %p8284_p8 = pneg %p8270_p6 }
  0x1a   : > { %p7887_p9 = pnand %p8284_p8, %p7885_p7 }
  0x1c   : > { %p7888_p10 = pneg %p7887_p9 }
  0x1e   : > { %p7893_p12 = pnand %p7891_p11, %p7888_p10 }
  0x20   : > { %7896 = shalt.err (!%p7893_p12)
}
  0x21   : > { %s7897_s28 = scalar_lea.vmem %s8260_s14, 3584  ;;  %p7905_p5 = scmp.lt.s32.totalorder %s8260_s14, %s8260_s14 }
  0x22   : > { %p7898_p13 = scmp.ne.s32.totalorder %s8260_s14, %s7897_s28  ;;  %p7906_p3 = scmp.lt.s32.totalorder %s7897_s28, %s7897_s28 }
  0x24   : > { %p7900_p0 = pnand %p7898_p13, %p8284_p8  ;;  %p7907_p7 = por %p7906_p3, %p7905_p5 }
  0x26   : > { %p7901_p2 = pneg %p7900_p0 }
  0x28   : > { %p7908_p9 = pnand %p7907_p7, %p7901_p2 }
  0x2a   : > { %7911 = shalt.err (!%p7908_p9)
}
  0x2b   : > { %s8166_s29 = smov 512   ;;  %s8167_s13 = smov 32  }
  0x2c   : > { %6982 = dma.hbm_to_vmem [thread:$0]  (!%p8270_p6), %s9632_s1, 3584, %s8260_s14, [#allocation7], %s8166_s29, %s8166_s29, %s8167_s13  }
  0x2d   : > { %s9634_s5 = sld [smem:[#allocation26_spill]] }
  0x33   : > { %s7912_s23 = scalar_lea.hbm %s9634_s5, 2048 }
  0x34   : > { %p7913_p3 = scmp.ne.s32.totalorder %s9634_s5, %s7912_s23  ;;  %p7919_p12 = scmp.lt.u32.totalorder %s7912_s23, %s9634_s5 }
  0x36   : > { %p7915_p10 = pnand %p7913_p3, %p8284_p8 }
  0x38   : > { %p7916_p11 = pneg %p7915_p10 }
  0x3a   : > { %p7921_p13 = pnand %p7919_p12, %p7916_p11 }
  0x3c   : > { %7924 = shalt.err (!%p7921_p13)
}
  0x3d   : > { %s7925_s14 = scalar_lea.vmem %s8274_s18, 2048  ;;  %p7933_p7 = scmp.lt.s32.totalorder %s8274_s18, %s8274_s18 }
  0x3e   : > { %p7926_p0 = scmp.ne.s32.totalorder %s8274_s18, %s7925_s14  ;;  %p7934_p9 = scmp.lt.s32.totalorder %s7925_s14, %s7925_s14 }
  0x40   : > { %p7928_p2 = pnand %p7926_p0, %p8284_p8  ;;  %p7935_p3 = por %p7934_p9, %p7933_p7 }
  0x42   : > { %p7929_p5 = pneg %p7928_p2 }
  0x44   : > { %p7936_p10 = pnand %p7935_p3, %p7929_p5 }
  0x46   : > { %7939 = shalt.err (!%p7936_p10)
}
  0x47   : > { %s8168_s29 = smov 128   ;;  %s8169_s13 = smov 8  }
  0x48   : > { %6988 = dma.hbm_to_vmem [thread:$0]  (!%p8270_p6), %s9634_s5, 2048, %s8274_s18, [#allocation13], %s8168_s29, %s8168_s29, %s8169_s13  }
  0x49   : > { %s8329_s21 = sadd.s32 1, %s8162_s12   ;;  %s96_s22 = sadd.s32 1, %s8158_s11 }
  0x4a   : > { %9635 = sst [smem:[#allocation22_spill]] %s8329_s21  ;;  %s93_s23 = ssub.s32 %s8162_s12, %s8329_s21 }
  0x4b   : > { %p103_p11 = scmp.ne.s32.totalorder %s8158_s11, %s8154_s10  ;;  %p94_p12 = scmp.eq.s32.totalorder %s93_s23, 0 }
  0x4c   : > { %p104_p13 = scmp.eq.s32.totalorder %s8162_s12, 0  ;;  %p109_p0 = scmp.ne.s32.totalorder %s8154_s10, %s8150_s30 }
  0x4d   : > { %p7008_p2 = scmp.lt.s32.totalorder %s8162_s12, 7  ;;  %s337_s18 = sand.u32 1, %s8162_s12  }
  0x4e   : > { %s8341_s24 = scalar_select %p94_p12, %s8158_s11, %s96_s22  }
  0x4f   : > { %p105_p5 = por %p104_p13, %p103_p11  ;;  %p8345_p7 = por %p9615_p1, %p109_p0 }
  0x50   : > { %9636 = sst [smem:[#allocation23_spill]] %s8341_s24  ;;  %s9613_s27 = sand.u32 1, %s8158_s11  }
  0x51   : > { %s9637_s26 = scalar_select %p8345_p7, 1, 0 }
  0x52   : > { %s6944_s28 = smul.u32 3584, %s9613_s27  ;;  %p8354_p9 = pnand %p7008_p2, %p105_p5 }
  0x53   : > { %s9614_s14 = smul.u32 448, %s8162_s12  ;;  %s9639_s3 = sld [smem:[#allocation25_spill]] }
  0x54   : > { %s9638_s29 = scalar_select %p8354_p9, 1, 0 }
  0x55   : > { %s341_s20 = scalar_lea.vmem [#allocation9], %s6944_s28  ;;  %s8367_s23 = scalar_lea.sflag [#allocation10], %s337_s18 }
  0x56   : > { %s348_s22 = sshll.u32 %s341_s20, 4  ;;  %p9623_p10 = pneg %p8354_p9  ;;  %s8365_s22 = int_to_ptr.vmem [resolvable:$true] %s348_s22 }
  0x59   : > { %s8363_s17 = scalar_lea.hbm %s9639_s3, %s9614_s14  ;;  %s7945_s14 = scalar_lea.hbm %s9639_s3, 401408 }
  0x5a   : > { %s7940_s27 = scalar_lea.hbm %s8363_s17, 57344  ;;  %p7946_p13 = scmp.lt.u32.totalorder %s8363_s17, %s9639_s3 }
  0x5b   : > { %p7941_p3 = scmp.ne.s32.totalorder %s8363_s17, %s7940_s27  ;;  %p7947_p0 = scmp.lt.u32.totalorder %s7945_s14, %s7940_s27 }
  0x5c   : > { %p7949_p5 = scmp.lt.u32.totalorder %s7940_s27, %s8363_s17 }
  0x5d   : > { %p7943_p11 = pnand %p9623_p10, %p7941_p3  ;;  %p7948_p2 = por %p7947_p0, %p7946_p13 }
  0x5f   : > { %p7944_p12 = pneg %p7943_p11  ;;  %p7950_p1 = por %p7949_p5, %p7948_p2 }
  0x61   : > { %p7951_p7 = pnand %p7950_p1, %p7944_p12 }
  0x63   : > { %7954 = shalt.err (!%p7951_p7)
}
  0x64   : > { %s7955_s18 = scalar_lea.vmem %s8365_s22, 57344  ;;  %s8170_s28 = smov [#allocation9]  }
  0x65   : > { %p7956_p3 = scmp.ne.s32.totalorder %s8365_s22, %s7955_s18  ;;  %s7960_s20 = sshll.u32 %s8170_s28, 4  ;;  %s7961_s20 = int_to_ptr.vmem [resolvable:$false] %s7960_s20 }
  0x66   : > { %s7962_s1 = scalar_lea.vmem %s7961_s20, 114688  ;;  %p7963_p6 = scmp.lt.s32.totalorder %s8365_s22, %s7961_s20 }
  0x67   : > { %p7958_p11 = pnand %p7956_p3, %p9623_p10  ;;  %p7964_p13 = scmp.lt.s32.totalorder %s7962_s1, %s7955_s18 }
  0x69   : > { %p7959_p4 = pneg %p7958_p11  ;;  %p7965_p0 = por %p7964_p13, %p7963_p6 }
  0x6b   : > { %p7966_p2 = pnand %p7965_p0, %p7959_p4 }
  0x6d   : > { %7969 = shalt.err (!%p7966_p2)
}
  0x6e   : > { %s8171_s5 = smov 3136   ;;  %s8172_s27 = smov 448  }
  0x6f   : > { %s8173_s14 = smov 28   ;;  %s8174_s30 = smov [#allocation4]  }
  0x70   : > { %6998 = dma.hbm_to_vmem [thread:$0]  (!%p8354_p9), %s8363_s17, 57344, %s8365_s22, %s8367_s23, %s8171_s5, %s8172_s27, %s8173_s14  }
  0x71   : > { %s264_s13 = sshll.u32 %s8174_s30, 4  ;;  %s8175_s28 = smov [#allocation8]   ;;  %s265_s13 = int_to_ptr.vmem [resolvable:$true] %s264_s13 }
  0x72   : > { %s288_s3 = sshll.u32 %s8175_s28, 4  ;;  %s7970_s1 = scalar_lea.hbm %s9603_s0, 64  ;;  %s8395_s3 = int_to_ptr.vmem [resolvable:$true] %s288_s3 }
  0x73   : > { %p7971_p1 = scmp.ne.s32.totalorder %s9603_s0, %s7970_s1  ;;  %p7977_p7 = scmp.lt.u32.totalorder %s7970_s1, %s9603_s0 }
  0x75   : > { %p7973_p4 = pnand %p7971_p1, %p8284_p8 }
  0x77   : > { %p7974_p6 = pneg %p7973_p4 }
  0x79   : > { %p7979_p12 = pnand %p7977_p7, %p7974_p6 }
  0x7b   : > { %7982 = shalt.err (!%p7979_p12)
}
  0x7c   : > { %s7983_s22 = scalar_lea.vmem %s265_s13, 64  ;;  %p7991_p13 = scmp.lt.s32.totalorder %s265_s13, %s265_s13 }
  0x7d   : > { %p7984_p5 = scmp.ne.s32.totalorder %s265_s13, %s7983_s22  ;;  %p7992_p0 = scmp.lt.s32.totalorder %s7983_s22, %s7983_s22 }
  0x7f   : > { %p7986_p3 = pnand %p7984_p5, %p8284_p8  ;;  %p7993_p2 = por %p7992_p0, %p7991_p13 }
  0x81   : > { %p7987_p11 = pneg %p7986_p3 }
  0x83   : > { %p7994_p10 = pnand %p7993_p2, %p7987_p11 }
  0x85   : > { %7997 = shalt.err (!%p7994_p10)
}
  0x86   : > { %p9640_p1 = scmp.ne.s32.totalorder %s9631_s19, 0  ;;  %s7998_s27 = scalar_lea.hbm %s9605_s2, 512 }
  0x87   : > { %p7999_p4 = scmp.ne.s32.totalorder %s9605_s2, %s7998_s27  ;;  %p8005_p10 = scmp.lt.u32.totalorder %s7998_s27, %s9605_s2 }
  0x88   : > { %6979 = dma.hbm_to_vmem [thread:$0]  (!%p9640_p1), %s9603_s0, 64, %s265_s13, [#allocation5]  }
  0x89   : > { %p8001_p6 = pnand %p7999_p4, %p8284_p8 }
  0x8b   : > { %p8002_p7 = pneg %p8001_p6 }
  0x8d   : > { %p8007_p12 = pnand %p8005_p10, %p8002_p7 }
  0x8f   : > { %8010 = shalt.err (!%p8007_p12)
}
  0x90   : > { %s8011_s13 = scalar_lea.vmem %s8395_s3, 512  ;;  %p8019_p13 = scmp.lt.s32.totalorder %s8395_s3, %s8395_s3 }
  0x91   : > { %p8012_p5 = scmp.ne.s32.totalorder %s8395_s3, %s8011_s13  ;;  %p8020_p0 = scmp.lt.s32.totalorder %s8011_s13, %s8011_s13 }
  0x93   : > { %p8014_p3 = pnand %p8012_p5, %p8284_p8  ;;  %p8021_p2 = por %p8020_p0, %p8019_p13 }
  0x95   : > { %p8015_p11 = pneg %p8014_p3 }
  0x97   : > { %p8022_p4 = pnand %p8021_p2, %p8015_p11 }
  0x99   : > { %8025 = shalt.err (!%p8022_p4)
}
  0x9a   : > { %6985 = dma.hbm_to_vmem [thread:$0]  (!%p9640_p1), %s9605_s2, 512, %s8395_s3, [#allocation7]  }
  0x9b   : > { %s8176_s17 = smov [#allocation14]   ;;  %s8177_s21 = smov [#allocation15]  }
  0x9c   : > { %s312_s22 = sshll.u32 %s8176_s17, 4  ;;  %s326_s24 = sshll.u32 %s8177_s21, 4  ;;  %s313_s22 = int_to_ptr.vmem [resolvable:$true] %s312_s22  ;;  %s8438_s24 = int_to_ptr.vmem [resolvable:$true] %s326_s24 }
  0x9d   : > { %s8026_s27 = scalar_lea.hbm %s9609_s6, 32 }
  0x9e   : > { %p8027_p6 = scmp.ne.s32.totalorder %s9609_s6, %s8026_s27  ;;  %p8033_p12 = scmp.lt.u32.totalorder %s8026_s27, %s9609_s6 }
  0xa0   : > { %p8029_p7 = pnand %p8027_p6, %p8284_p8 }
  0xa2   : > { %p8030_p10 = pneg %p8029_p7 }
  0xa4   : > { %p8035_p5 = pnand %p8033_p12, %p8030_p10 }
  0xa6   : > { %8038 = shalt.err (!%p8035_p5)
}
  0xa7   : > { %s8039_s18 = scalar_lea.vmem %s313_s22, 32  ;;  %p8047_p0 = scmp.lt.s32.totalorder %s313_s22, %s313_s22 }
  0xa8   : > { %p8040_p3 = scmp.ne.s32.totalorder %s313_s22, %s8039_s18  ;;  %p8048_p2 = scmp.lt.s32.totalorder %s8039_s18, %s8039_s18 }
  0xaa   : > { %p8042_p11 = pnand %p8040_p3, %p8284_p8  ;;  %p8049_p4 = por %p8048_p2, %p8047_p0 }
  0xac   : > { %p8043_p13 = pneg %p8042_p11 }
  0xae   : > { %p8050_p9 = pnand %p8049_p4, %p8043_p13 }
  0xb0   : > { %8053 = shalt.err (!%p8050_p9)
}
  0xb1   : > { %6991 = dma.hbm_to_vmem [thread:$0]  (!%p9640_p1), %s9609_s6, 32, %s313_s22, [#allocation13]  }
  0xb2   : > { %s8054_s21 = scalar_lea.hbm %s9611_s8, 16 }
  0xb3   : > { %p8055_p6 = scmp.ne.s32.totalorder %s9611_s8, %s8054_s21  ;;  %p8061_p9 = scmp.lt.u32.totalorder %s8054_s21, %s9611_s8 }
  0xb5   : > { %p8057_p7 = pnand %p8055_p6, %p8284_p8 }
  0xb7   : > { %p8058_p10 = pneg %p8057_p7 }
  0xb9   : > { %p8063_p12 = pnand %p8061_p9, %p8058_p10 }
  0xbb   : > { %8066 = shalt.err (!%p8063_p12)
}
  0xbc   : > { %s8067_s22 = scalar_lea.vmem %s8438_s24, 16  ;;  %s8074_s30 = scalar_lea.vmem %s8438_s24, 32 }
  0xbd   : > { %p8068_p5 = scmp.ne.s32.totalorder %s8438_s24, %s8067_s22  ;;  %p8075_p13 = scmp.lt.s32.totalorder %s8438_s24, %s8438_s24 }
  0xbe   : > { %p8076_p0 = scmp.lt.s32.totalorder %s8074_s30, %s8067_s22 }
  0xbf   : > { %p8070_p3 = pnand %p8068_p5, %p8284_p8 }
  0xc0   : > { %p8077_p2 = por %p8076_p0, %p8075_p13 }
  0xc1   : > { %p8071_p11 = pneg %p8070_p3 }
  0xc3   : > { %p8078_p4 = pnand %p8077_p2, %p8071_p11 }
  0xc5   : > { %8081 = shalt.err (!%p8078_p4)
}
  0xc6   : > { %6994 = dma.hbm_to_vmem [thread:$0]  (!%p9640_p1), %s9611_s8, 16, %s8438_s24, [#allocation16]  }
  0xc7   : > { %s9641_s25 = sand.u32 1, %s8158_s11   ;;  %s9642_s13 = smul.u32 448, %s8162_s12 }
  0xc8   : > { %s6945_s18 = smul.u32 28, %s9641_s25  ;;  %p9643_p6 = scmp.ne.s32.totalorder %s9638_s29, 0 }
  0xc9   : > { %s8489_s17 = scalar_lea.hbm %s9607_s4, %s9642_s13  ;;  %s8087_s5 = scalar_lea.hbm %s9607_s4, 3136 }
  0xca   : > { %s362_s19 = scalar_lea.vmem [#allocation11], %s6945_s18  ;;  %s8082_s9 = scalar_lea.hbm %s8489_s17, 448 }
  0xcb   : > { %s370_s21 = sshll.u32 %s362_s19, 4  ;;  %p8083_p8 = scmp.ne.s32.totalorder %s8489_s17, %s8082_s9  ;;  %s371_s21 = int_to_ptr.vmem [resolvable:$true] %s370_s21 }
  0xcc   : > { %p9644_p7 = pneg %p9643_p6  ;;  %p8088_p9 = scmp.lt.u32.totalorder %s8489_s17, %s9607_s4 }
  0xcd   : > { %p8089_p12 = scmp.lt.u32.totalorder %s8087_s5, %s8082_s9  ;;  %p8091_p3 = scmp.lt.u32.totalorder %s8082_s9, %s8489_s17 }
  0xce   : > { %p8085_p1 = pnand %p8083_p8, %p9644_p7 }
  0xcf   : > { %p8090_p5 = por %p8089_p12, %p8088_p9 }
  0xd0   : > { %p8086_p10 = pneg %p8085_p1 }
  0xd1   : > { %p8092_p11 = por %p8091_p3, %p8090_p5 }
  0xd3   : > { %p8093_p13 = pnand %p8092_p11, %p8086_p10 }
  0xd5   : > { %8096 = shalt.err (!%p8093_p13)
}
  0xd6   : > { %s8097_s22 = scalar_lea.vmem %s371_s21, 448  ;;  %p9645_p2 = pmov %p9644_p7 }
  0xd7   : > { %p8098_p0 = scmp.ne.s32.totalorder %s371_s21, %s8097_s22  ;;  %s8178_s30 = smov [#allocation11]  }
  0xd8   : > { %s8102_s28 = sshll.u32 %s8178_s30, 4  ;;  %s8103_s28 = int_to_ptr.vmem [resolvable:$false] %s8102_s28 }
  0xd9   : > { %p8100_p4 = pnand %p8098_p0, %p9645_p2  ;;  %s8104_s3 = scalar_lea.vmem %s8103_s28, 896 }
  0xda   : > { %p8105_p7 = scmp.lt.s32.totalorder %s371_s21, %s8103_s28  ;;  %p8106_p1 = scmp.lt.s32.totalorder %s8104_s3, %s8097_s22 }
  0xdb   : > { %p8101_p8 = pneg %p8100_p4 }
  0xdc   : > { %p8107_p9 = por %p8106_p1, %p8105_p7 }
  0xde   : > { %p8108_p12 = pnand %p8107_p9, %p8101_p8 }
  0xe0   : > { %8111 = shalt.err (!%p8108_p12)
}
  0xe1   : > { %7001 = dma.hbm_to_vmem [thread:$0]  (!%p9643_p6), %s8489_s17, 448, %s371_s21, %s8367_s23  }
  0xe2   : > { %p9646_p10 = scmp.ne.s32.totalorder %s9630_s16, 0 }
  0xe3   : > { %p9647_p5 = scmp.eq.s32.totalorder (!%p9646_p10), %s8254_s15, 0 }
  0xe4   : > { %379 = sbr.rel (%p9646_p10) target bundleno = 1878 (0x756), region = 56 }
  0xeb   : > { %8129 = dma.done.wait (%p9647_p5), [#allocation5], 64   ;;  %p9648_p3 = pmov %p9647_p5 }
  0xed   : > { %8131 = vsyncadd (%p9648_p3), [#allocation5], 4294967232  ;;  %p9649_p11 = pmov %p9648_p3 }
  0xee   : > { %p9650_p13 = pmov %p9648_p3 }
  0xef   : > { %8133 = dma.done.wait (%p9649_p11), [#allocation7], 4096  }
  0xf0   : > { %8135 = vsyncadd (%p9650_p13), [#allocation7], 4294963200  ;;  %s393_s29 = sand.u32 1, %s8254_s15   ;;  %s395_s23 = sand.u32 1, %s8154_s10  }
  0xf1   : > { %s6946_s25 = smul.u32 3584, %s395_s23  ;;  %s394_s16 = scalar_lea.sflag [#allocation10], %s393_s29 }
  0xf2   : > { %p9651_p6 = scmp.ne.s32.totalorder %s9637_s26, 0 }
  0xf3   : > { %s8523_s18 = scalar_lea.vmem [#allocation9], %s6946_s25 }
  0xf4   : > { %8137 = dma.done.wait (%p9651_p6), %s394_s16, 57792  }
  0xf5   : > { %8139 = vsyncadd (%p9651_p6), %s394_s16, 4294909504  ;;  %s6947_s13 = smul.u32 28, %s395_s23  ;;  %p9652_p0 = pmov %p9648_p3 }
  0xf7   : > { %s8529_s20 = scalar_lea.vmem [#allocation11], %s6947_s13 }
  0xf8   : > { %8141 = dma.done.wait (%p9652_p0), [#allocation13], 2080   ;;  %p9653_p2 = pmov %p9652_p0 }
  0xf9   : > { %p9654_p4 = pmov %p9652_p0 }
  0xfa   : > { %8143 = vsyncadd (%p9653_p2), [#allocation13], 4294965216 }
  0xfb   : > { %8145 = dma.done.wait (%p9654_p4), [#allocation16], 16   ;;  %p9655_p8 = pmov %p9652_p0 }
  0xfc   : > { %p9656_p7 = scmp.ne.s32.totalorder %s8254_s15, 0 }
  0xfd   : > { %8147 = vsyncadd (%p9655_p8), [#allocation16], 4294967280  ;;  %v462_v0 = vld [vmem:[#allocation6] sm:$0xff] (!%p9656_p7)  ;;  %v463_v2 = vld [vmem:[#allocation6 + $0x8] sm:$0xff] (!%p9656_p7)  ;;  %v8179_v8 = vmov (!%p9656_p7), 0   ;;  %vm676_vm0 = vcmask (!%p9656_p7), 1040384  }
  0xfe   : > { %459 = sbr.rel (%p9656_p7) target bundleno = 575 (0x23f), region = 92  ;;  %v466_v1 = vld [vmem:[#allocation6 + $0x20] sm:$0xff] (!%p9656_p7)  ;;  %v467_v4 = vld [vmem:[#allocation6 + $0x28] sm:$0xff] (!%p9656_p7)  ;;  %733 = vmatprep.mubr.bf16.mxu0 (!%p9656_p7), %v8179_v8  ;;  %774 = vmatprep.mubr.bf16.mxu1 (!%p9656_p7), %v8179_v8  ;;  %v464_v31 = vld [vmem:[#allocation6 + $0x10] sm:$0xff] (!%p9656_p7)  ;;  %vm672_vm1 = vcmask (!%p9656_p7), 408576   ;;  %vm865_vm2 = vcmask (!%p9656_p7), 1043456  }
  0xff   : > { %v6154_v3 = vcombine.high (!%p9656_p7), %v462_v0, %v466_v1  ;;  %v6153_v5 = vcombine.low (!%p9656_p7), %v462_v0, %v466_v1  ;;  %v470_v6 = vld [vmem:[#allocation6 + $0x40] sm:$0xff] (!%p9656_p7)  ;;  %v6156_v9 = vcombine.high (!%p9656_p7), %v463_v2, %v467_v4  ;;  %v6155_v10 = vcombine.low (!%p9656_p7), %v463_v2, %v467_v4  ;;  %v471_v12 = vld [vmem:[#allocation6 + $0x48] sm:$0xff] (!%p9656_p7)  ;;  %v468_v32 = vld [vmem:[#allocation6 + $0x30] sm:$0xff] (!%p9656_p7) }
 0x100   : > { %v474_v7 = vld [vmem:[#allocation6 + $0x60] sm:$0xff] (!%p9656_p7)  ;;  %v475_v13 = vld [vmem:[#allocation6 + $0x68] sm:$0xff] (!%p9656_p7)  ;;  %v465_v33 = vld [vmem:[#allocation6 + $0x18] sm:$0xff] (!%p9656_p7)  ;;  %v6158_v37 = vcombine.high (!%p9656_p7), %v464_v31, %v468_v32  ;;  %v6157_v45 = vcombine.low (!%p9656_p7), %v464_v31, %v468_v32 }
 0x101   : > { %v6162_v11 = vcombine.high (!%p9656_p7), %v470_v6, %v474_v7  ;;  %v478_v14 = vld [vmem:[#allocation6 + $0x80] sm:$0xff] (!%p9656_p7)  ;;  %701 = vmatprep.subr.bf16.mxu0 (!%p9656_p7), %v6154_v3  ;;  %v6164_v15 = vcombine.high (!%p9656_p7), %v471_v12, %v475_v13  ;;  %v479_v17 = vld [vmem:[#allocation6 + $0x88] sm:$0xff] (!%p9656_p7)  ;;  %742 = vmatprep.subr.bf16.mxu1 (!%p9656_p7), %v6156_v9  ;;  %v6161_v19 = vcombine.low (!%p9656_p7), %v470_v6, %v474_v7  ;;  %v469_v34 = vld [vmem:[#allocation6 + $0x38] sm:$0xff] (!%p9656_p7)  ;;  %v492_v3 = vlaneseq (!%p9656_p7) }
 0x102   : > { %v482_v16 = vld [vmem:[#allocation6 + $0xa0] sm:$0xff] (!%p9656_p7)  ;;  %v483_v18 = vld [vmem:[#allocation6 + $0xa8] sm:$0xff] (!%p9656_p7)  ;;  %702 = vmatpush1.bf16.msra.mxu0 (!%p9656_p7), %v6153_v5  ;;  %743 = vmatpush1.bf16.msra.mxu1 (!%p9656_p7), %v6155_v10  ;;  %v6163_v20 = vcombine.low (!%p9656_p7), %v471_v12, %v475_v13  ;;  %v460_v35 = vld [vmem:[#allocation4] sm:$0xf] (!%p9656_p7)  ;;  %v6160_v39 = vcombine.high (!%p9656_p7), %v465_v33, %v469_v34  ;;  %v6159_v46 = vcombine.low (!%p9656_p7), %v465_v33, %v469_v34 }
 0x103   : > { %703 = vmatprep.subr.bf16.mxu0 (!%p9656_p7), %v6162_v11  ;;  %v6170_v21 = vcombine.high (!%p9656_p7), %v478_v14, %v482_v16  ;;  %744 = vmatprep.subr.bf16.mxu1 (!%p9656_p7), %v6164_v15  ;;  %v6172_v22 = vcombine.high (!%p9656_p7), %v479_v17, %v483_v18  ;;  %v486_v23 = vld [vmem:[#allocation6 + $0xc0] sm:$0x11] (!%p9656_p7)  ;;  %v487_v24 = vld [vmem:[#allocation6 + $0xc8] sm:$0x11] (!%p9656_p7)  ;;  %v6169_v25 = vcombine.low (!%p9656_p7), %v478_v14, %v482_v16  ;;  %v472_v40 = vld [vmem:[#allocation6 + $0x50] sm:$0xff] (!%p9656_p7)  ;;  %v8557_v4 = vshrl.u32 (!%p9656_p7), %v492_v3, 7 }
 0x104   : > { %v6171_v26 = vcombine.low (!%p9656_p7), %v479_v17, %v483_v18  ;;  %v6178_v27 = vcombine.high (!%p9656_p7), %v486_v23, %v486_v23  ;;  %v6177_v28 = vcombine.low (!%p9656_p7), %v486_v23, %v486_v23  ;;  %v6180_v29 = vcombine.high (!%p9656_p7), %v487_v24, %v487_v24  ;;  %v476_v41 = vld [vmem:[#allocation6 + $0x70] sm:$0xff] (!%p9656_p7)  ;;  %v473_v43 = vld [vmem:[#allocation6 + $0x58] sm:$0xff] (!%p9656_p7) }
 0x105   : > { %v6179_v30 = vcombine.low %v487_v24, %v487_v24  ;;  %v461_v42 = vpack.c.bf16 %v460_v35, %v460_v35  ;;  %v477_v44 = vld [vmem:[#allocation6 + $0x78] sm:$0xff]  ;;  %v6166_v47 = vcombine.high %v472_v40, %v476_v41  ;;  %v480_v49 = vld [vmem:[#allocation6 + $0x90] sm:$0xff]  ;;  %v6165_v53 = vcombine.low %v472_v40, %v476_v41 }
 0x106   : > { %704 = vmatpush1.bf16.msra.mxu0 %v6161_v19  ;;  %745 = vmatpush1.bf16.msra.mxu1 %v6163_v20  ;;  %v678_v36 = vsel %vm676_vm0, %v6177_v28, 0  ;;  %v6168_v48 = vcombine.high %v473_v43, %v477_v44  ;;  %v484_v50 = vld [vmem:[#allocation6 + $0xb0] sm:$0xff]  ;;  %v481_v51 = vld [vmem:[#allocation6 + $0x98] sm:$0xff]  ;;  %v6167_v54 = vcombine.low %v473_v43, %v477_v44  ;;  %v8560_v5 = vsub.s32 0, %v8557_v4 }
 0x107   : > { %705 = vmatprep.subr.bf16.mxu0 %v6170_v21  ;;  %746 = vmatprep.subr.bf16.mxu1 %v6172_v22  ;;  %v684_v38 = vsel %vm676_vm0, %v6179_v30, 0  ;;  %v485_v52 = vld [vmem:[#allocation6 + $0xb8] sm:$0xff]  ;;  %v6174_v55 = vcombine.high %v480_v49, %v484_v50  ;;  %v488_v57 = vld [vmem:[#allocation6 + $0xd0] sm:$0x11]  ;;  %v6173_v59 = vcombine.low %v480_v49, %v484_v50  ;;  %v8565_v7 = vsub.s32 2, %v8557_v4 }
 0x108   : > { %v6176_v56 = vcombine.high %v481_v51, %v485_v52  ;;  %v489_v58 = vld [vmem:[#allocation6 + $0xd8] sm:$0x11]  ;;  %v6175_v60 = vcombine.low %v481_v51, %v485_v52  ;;  %v6182_v61 = vcombine.high %v488_v57, %v488_v57  ;;  %v6181_v62 = vcombine.low %v488_v57, %v488_v57 }
 0x109   : > { %v6184_v63 = vcombine.high %v489_v58, %v489_v58  ;;  %v6183_v0 = vcombine.low %v489_v58, %v489_v58  ;;  %v8562_v6 = vld [vmem:[#allocation8] ss:$4 sm:$0xff]  ;;  %v8571_v9 = vsub.s32 3, %v8557_v4  ;;  %v8586_v41 = vsub.s32 4, %v8557_v4 }
 0x10a   : > { %706 = vmatpush1.bf16.msra.mxu0 %v6169_v25  ;;  %747 = vmatpush1.bf16.msra.mxu1 %v6171_v26  ;;  %v690_v1 = vsel %vm676_vm0, %v6181_v62, 0  ;;  %v495_v10 = vrot.slane %v8562_v6, %v8560_v5  ;;  %v503_v11 = vrot.slane %v8562_v6, %v8565_v7  ;;  %v8589_v44 = vsub.s32 6, %v8557_v4 }
 0x10b   : > { %6185 = vmatprep.subr.msk.bf16.mxu0 %vm676_vm0, %v6178_v27  ;;  %6187 = vmatprep.subr.msk.bf16.mxu1 %vm676_vm0, %v6180_v29  ;;  %v696_v2 = vsel %vm676_vm0, %v6183_v0, 0  ;;  %v507_v13 = vrot.slane %v8562_v6, %v8571_v9 }
 0x10e   : > { %708 = vmatpush1.bf16.msra.mxu0 %v678_v36  ;;  %749 = vmatpush1.bf16.msra.mxu1 %v684_v38 }
 0x10f   : > { %783 = vmatprep.subr.bf16.mxu0 %v6158_v37  ;;  %824 = vmatprep.subr.bf16.mxu1 %v6160_v39 }
 0x111   : > { %6186 = vmatmul.mubr.msk.bf16.vlgmr.msra.gmra.mrb[0].mxu0 %vm672_vm1, %v461_v42  ;;  %6188 = vmatmul.mubr.msk.bf16.vlgmr.msra.gmra.mrb[0].mxu1 %vm672_vm1, %v461_v42 }
 0x112   : > { %784 = vmatpush1.bf16.msra.mxu0 %v6157_v45  ;;  %825 = vmatpush1.bf16.msra.mxu1 %v6159_v46  ;;  %v8592_v45 = vsub.s32 5, %v8557_v4 }
 0x113   : > { %785 = vmatprep.subr.bf16.mxu0 %v6166_v47  ;;  %826 = vmatprep.subr.bf16.mxu1 %v6168_v48  ;;  %v8595_v48 = vsub.s32 7, %v8557_v4 }
 0x114   : > { %815 = vmatprep.mubr.bf16.mxu0 %v8179_v8  ;;  %856 = vmatprep.mubr.bf16.mxu1 %v8179_v8  ;;  %v8568_v8 = vsub.s32 1, %v8557_v4  ;;  %v515_v57 = vrot.slane %v8562_v6, %v8592_v45 }
 0x116   : > { %786 = vmatpush1.bf16.msra.mxu0 %v6165_v53  ;;  %827 = vmatpush1.bf16.msra.mxu1 %v6167_v54  ;;  %v499_v12 = vrot.slane %v8562_v6, %v8568_v8  ;;  %v511_v53 = vrot.slane %v8562_v6, %v8586_v41 }
 0x117   : > { %787 = vmatprep.subr.bf16.mxu0 %v6174_v55  ;;  %828 = vmatprep.subr.bf16.mxu1 %v6176_v56  ;;  %v519_v56 = vrot.slane %v8562_v6, %v8589_v44 }
 0x11a   : > { %788 = vmatpush1.bf16.msra.mxu0 %v6173_v59  ;;  %829 = vmatpush1.bf16.msra.mxu1 %v6175_v60  ;;  %v523_v60 = vrot.slane %v8562_v6, %v8595_v48 }
 0x11b   : > { %6189 = vmatprep.subr.msk.bf16.mxu0 %vm676_vm0, %v6182_v61  ;;  %6191 = vmatprep.subr.msk.bf16.mxu1 %vm676_vm0, %v6184_v63 }
 0x11e   : > { %790 = vmatpush1.bf16.msra.mxu0 %v690_v1  ;;  %831 = vmatpush1.bf16.msra.mxu1 %v696_v2 }
 0x121   : > { %6190 = vmatmul.mubr.msk.bf16.vlgmr.msra.gmra.mrb[4].mxu0 %vm672_vm1, %v461_v42  ;;  %6192 = vmatmul.mubr.msk.bf16.vlgmr.msra.gmra.mrb[4].mxu1 %vm672_vm1, %v461_v42 }
 0x1e4   : > { %v735_v14 = vpop.f32.mrb[0].mxu0  ;;  %v776_v16 = vpop.f32.mrb[0].mxu1 }
 0x1e5   : > { %v736_v15 = vadd.f32 %v735_v14, %v495_v10  ;;  %v737_v17 = vpop.f32.mrb[1].mxu0  ;;  %v777_v18 = vadd.f32 %v776_v16, %v503_v11  ;;  %v778_v20 = vpop.f32.mrb[1].mxu1 }
 0x1e6   : > { %v738_v19 = vadd.f32 %v737_v17, %v499_v12  ;;  %v739_v21 = vpop.f32.mrb[2].mxu0  ;;  %v779_v23 = vadd.f32 %v778_v20, %v507_v13  ;;  %v780_v24 = vpop.f32.mrb[2].mxu1 }
 0x1e7   : > { %v866_v22 = vsel %vm865_vm2, %v736_v15, 0.0  ;;  %v740_v25 = vpop.f32.mrb[3].mxu0  ;;  %v880_v27 = vsel %vm865_vm2, %v777_v18, 0.0  ;;  %v781_v29 = vpop.f32.mrb[3].mxu1 }
 0x1e8   : > { %v867_v26 = vrot.slane %v866_v22, 4  ;;  %v873_v28 = vsel %vm865_vm2, %v738_v19, 0.0  ;;  %v881_v30 = vrot.slane %v880_v27, 4  ;;  %v887_v32 = vsel %vm865_vm2, %v779_v23, 0.0 }
 0x1e9   : > { %v874_v31 = vrot.slane %v873_v28, 4  ;;  %v888_v34 = vrot.slane %v887_v32, 4 }
 0x1ea   : > { %v868_v33 = vadd.f32 %v867_v26, %v866_v22  ;;  %v882_v35 = vadd.f32 %v881_v30, %v880_v27 }
 0x1eb   : > { %v875_v36 = vadd.f32 %v874_v31, %v873_v28  ;;  %v889_v38 = vadd.f32 %v888_v34, %v887_v32 }
 0x1ec   : > { %v869_v37 = vrot.slane %v868_v33, 2  ;;  %v883_v39 = vrot.slane %v882_v35, 2 }
 0x1ed   : > { %v876_v40 = vrot.slane %v875_v36, 2  ;;  %v890_v43 = vrot.slane %v889_v38, 2 }
 0x1ee   : > { %v870_v42 = vadd.f32 %v869_v37, %v868_v33  ;;  %v884_v46 = vadd.f32 %v883_v39, %v882_v35 }
 0x1ef   : > { %v877_v47 = vadd.f32 %v876_v40, %v875_v36  ;;  %v891_v50 = vadd.f32 %v890_v43, %v889_v38 }
 0x1f0   : > { %v871_v49 = vrot.slane %v870_v42, 1  ;;  %v885_v51 = vrot.slane %v884_v46, 1 }
 0x1f1   : > { %v878_v52 = vrot.slane %v877_v47, 1  ;;  %v892_v55 = vrot.slane %v891_v50, 1 }
 0x1f2   : > { %v872_v54 = vadd.f32 %v871_v49, %v870_v42  ;;  %v886_v58 = vadd.f32 %v885_v51, %v884_v46 }
 0x1f3   : > { %v879_v59 = vadd.f32 %v878_v52, %v877_v47  ;;  %v893_v62 = vadd.f32 %v892_v55, %v891_v50 }
 0x1f4   : > { %v923_v61 = vmul.f32 0.25, %v872_v54  ;;  %v817_v63 = vpop.f32.mrb[4].mxu0  ;;  %v925_v0 = vmul.f32 0.25, %v886_v58  ;;  %v858_v3 = vpop.f32.mrb[4].mxu1 }
 0x1f5   : > { %v924_v1 = vmul.f32 0.25, %v879_v59  ;;  %v8605_v2 = vadd.f32 %v817_v63, %v511_v53  ;;  %v819_v10 = vpop.f32.mrb[5].mxu0  ;;  %v926_v12 = vmul.f32 0.25, %v893_v62  ;;  %v8609_v13 = vadd.f32 %v858_v3, %v519_v56  ;;  %v860_v16 = vpop.f32.mrb[5].mxu1 }
 0x1f6   : > { %v8607_v11 = vsub.f32 %v736_v15, %v923_v61  ;;  %v8611_v14 = vadd.f32 %v819_v10, %v515_v57  ;;  %v821_v17 = vpop.f32.mrb[6].mxu0  ;;  %v8613_v20 = vsub.f32 %v777_v18, %v925_v0  ;;  %v8619_v22 = vadd.f32 %v860_v16, %v523_v60  ;;  %v862_v24 = vpop.f32.mrb[6].mxu1 }
 0x1f7   : > { %v8615_v6 = vsub.f32 %v738_v19, %v924_v1  ;;  %v894_v21 = vsel %vm865_vm2, %v8605_v2, 0.0  ;;  %v822_v25 = vpop.f32.mrb[7].mxu0  ;;  %v8623_v26 = vsub.f32 %v779_v23, %v926_v12  ;;  %v908_v28 = vsel %vm865_vm2, %v8609_v13, 0.0  ;;  %v863_v18 = vpop.f32.mrb[7].mxu1 }
 0x1f8   : > { %v939_v15 = vmul.f32 %v8607_v11, %v8607_v11  ;;  %v895_v27 = vrot.slane %v894_v21, 4  ;;  %v941_v19 = vmul.f32 %v8613_v20, %v8613_v20  ;;  %v909_v30 = vrot.slane %v908_v28, 4 }
 0x1f9   : > { %v940_v29 = vmul.f32 %v8615_v6, %v8615_v6  ;;  %v901_v31 = vsel %vm865_vm2, %v8611_v14, 0.0  ;;  %v942_v23 = vmul.f32 %v8623_v26, %v8623_v26  ;;  %v915_v54 = vsel %vm865_vm2, %v8619_v22, 0.0 }
 0x1fa   : > { %v947_v32 = vsel %vm865_vm2, %v939_v15, 0.0  ;;  %v896_v33 = vadd.f32 %v895_v27, %v894_v21  ;;  %v902_v34 = vrot.slane %v901_v31, 4  ;;  %v961_v36 = vsel %vm865_vm2, %v941_v19, 0.0 }
 0x1fb   : > { %v948_v35 = vrot.slane %v947_v32, 4  ;;  %v954_v37 = vsel %vm865_vm2, %v940_v29, 0.0  ;;  %v910_v38 = vadd.f32 %v909_v30, %v908_v28  ;;  %v962_v39 = vrot.slane %v961_v36, 4 }
 0x1fc   : > { %v955_v40 = vrot.slane %v954_v37, 4  ;;  %v968_v42 = vsel %vm865_vm2, %v942_v23, 0.0  ;;  %v897_v43 = vrot.slane %v896_v33, 2  ;;  %v903_v50 = vadd.f32 %v902_v34, %v901_v31 }
 0x1fd   : > { %v949_v46 = vadd.f32 %v948_v35, %v947_v32  ;;  %v969_v47 = vrot.slane %v968_v42, 4  ;;  %v911_v49 = vrot.slane %v910_v38, 2  ;;  %v963_v51 = vadd.f32 %v962_v39, %v961_v36 }
 0x1fe   : > { %v956_v52 = vadd.f32 %v955_v40, %v954_v37  ;;  %v898_v53 = vadd.f32 %v897_v43, %v896_v33  ;;  %v904_v58 = vrot.slane %v903_v50, 2  ;;  %v916_v62 = vrot.slane %v915_v54, 4 }
 0x1ff   : > { %v950_v55 = vrot.slane %v949_v46, 2  ;;  %v970_v56 = vadd.f32 %v969_v47, %v968_v42  ;;  %v912_v57 = vadd.f32 %v911_v49, %v910_v38  ;;  %v964_v59 = vrot.slane %v963_v51, 2 }
 0x200   : > { %v957_v60 = vrot.slane %v956_v52, 2  ;;  %v899_v61 = vrot.slane %v898_v53, 1  ;;  %v905_v3 = vadd.f32 %v904_v58, %v903_v50  ;;  %v917_v17 = vadd.f32 %v916_v62, %v915_v54 }
 0x201   : > { %v951_v63 = vadd.f32 %v950_v55, %v949_v46  ;;  %v971_v0 = vrot.slane %v970_v56, 2  ;;  %v913_v1 = vrot.slane %v912_v57, 1  ;;  %v965_v10 = vadd.f32 %v964_v59, %v963_v51 }
 0x202   : > { %v958_v12 = vadd.f32 %v957_v60, %v956_v52  ;;  %v900_v16 = vadd.f32 %v899_v61, %v898_v53  ;;  %v906_v15 = vrot.slane %v905_v3, 1  ;;  %v918_v19 = vrot.slane %v917_v17, 2 }
 0x203   : > { %v952_v21 = vrot.slane %v951_v63, 1  ;;  %v972_v24 = vadd.f32 %v971_v0, %v970_v56  ;;  %v914_v25 = vadd.f32 %v913_v1, %v912_v57  ;;  %v966_v27 = vrot.slane %v965_v10, 1 }
 0x204   : > { %v959_v28 = vrot.slane %v958_v12, 1  ;;  %v927_v18 = vmul.f32 0.25, %v900_v16  ;;  %v907_v32 = vadd.f32 %v906_v15, %v905_v3  ;;  %v919_v35 = vadd.f32 %v918_v19, %v917_v17  ;;  %v8666_v17 = vld [vmem:[#allocation8 + $0x2] ss:$4 sm:$0xff] }
 0x205   : > { %v953_v29 = vadd.f32 %v952_v21, %v951_v63  ;;  %v973_v30 = vrot.slane %v972_v24, 1  ;;  %v929_v31 = vmul.f32 0.25, %v914_v25  ;;  %v967_v23 = vadd.f32 %v966_v27, %v965_v10  ;;  %v8662_v63 = vld [vmem:[#allocation8 + $0x1] ss:$4 sm:$0xff] }
 0x206   : > { %v960_v33 = vadd.f32 %v959_v28, %v958_v12  ;;  %v8642_v34 = vsub.f32 %v8605_v2, %v927_v18  ;;  %v928_v39 = vmul.f32 0.25, %v907_v32  ;;  %v920_v46 = vrot.slane %v919_v35, 1 }
 0x207   : > { %v1003_v36 = vmul.f32 0.25, %v953_v29  ;;  %v974_v37 = vadd.f32 %v973_v30, %v972_v24  ;;  %v8645_v38 = vsub.f32 %v8609_v13, %v929_v31  ;;  %v1005_v40 = vmul.f32 0.25, %v967_v23 }
 0x208   : > { %v1004_v42 = vmul.f32 0.25, %v960_v33  ;;  %v943_v43 = vmul.f32 %v8642_v34, %v8642_v34  ;;  %v8652_v2 = vsub.f32 %v8611_v14, %v928_v39  ;;  %v921_v53 = vadd.f32 %v920_v46, %v919_v35 }
 0x209   : > { %v1011_v47 = vadd.f32 1e-05, %v1003_v36  ;;  %v1006_v49 = vmul.f32 0.25, %v974_v37  ;;  %v945_v50 = vmul.f32 %v8645_v38, %v8645_v38  ;;  %v1013_v51 = vadd.f32 1e-05, %v1005_v40 }
 0x20a   : > { %v1012_v52 = vadd.f32 1e-05, %v1004_v42  ;;  %v975_v13 = vsel %vm865_vm2, %v943_v43, 0.0  ;;  %v944_v58 = vmul.f32 %v8652_v2, %v8652_v2  ;;  %v930_v59 = vmul.f32 0.25, %v921_v53 }
 0x20b   : > { %7072 = vrsqrt.f32 %v1011_v47  ;;  %v1014_v54 = vadd.f32 1e-05, %v1006_v49  ;;  %v976_v55 = vrot.slane %v975_v13, 4  ;;  %v989_v56 = vsel %vm865_vm2, %v945_v50, 0.0 }
 0x20c   : > { %7074 = vrsqrt.f32 %v1013_v51  ;;  %v990_v57 = vrot.slane %v989_v56, 4  ;;  %v982_v61 = vsel %vm865_vm2, %v944_v58, 0.0  ;;  %v8660_v62 = vsub.f32 %v8619_v22, %v930_v59 }
 0x20d   : > { %7076 = vrsqrt.f32 %v1012_v52  ;;  %v977_v60 = vadd.f32 %v976_v55, %v975_v13  ;;  %v983_v1 = vrot.slane %v982_v61, 4  ;;  %v8180_v3 = vmov 1983009808  }
 0x20e   : > { %7078 = vrsqrt.f32 %v1014_v54  ;;  %v991_v14 = vadd.f32 %v990_v57, %v989_v56  ;;  %v1180_v10 = vunpack.c.l.s4 %v8180_v3  ;;  %v946_v16 = vmul.f32 %v8660_v62, %v8660_v62 }
 0x20f   : > { %v978_v0 = vrot.slane %v977_v60, 2  ;;  %v984_v24 = vadd.f32 %v983_v1, %v982_v61  ;;  %v1041_v25 = vrot.slane %v8662_v63, %v8560_v5  ;;  %v1049_v22 = vrot.slane %v8662_v63, %v8565_v7 }
 0x210   : > { %v992_v12 = vrot.slane %v991_v14, 2  ;;  %v996_v27 = vsel %vm865_vm2, %v946_v16, 0.0  ;;  %v1045_v28 = vrot.slane %v8662_v63, %v8568_v8  ;;  %v1092_v30 = vrot.slane %v8666_v17, %v8560_v5 }
 0x211   : > { %v979_v21 = vadd.f32 %v978_v0, %v977_v60  ;;  %v985_v19 = vrot.slane %v984_v24, 2  ;;  %v997_v29 = vrot.slane %v996_v27, 4  ;;  %v1100_v31 = vrot.slane %v8666_v17, %v8565_v7 }
 0x212   : > { %v993_v15 = vadd.f32 %v992_v12, %v991_v14  ;;  %v1181_v32 = vunpack.c.0.s8 %v1180_v10  ;;  %v1053_v35 = vrot.slane %v8662_v63, %v8571_v9  ;;  %v1096_v43 = vrot.slane %v8666_v17, %v8568_v8 }
 0x213   : > { %v980_v18 = vrot.slane %v979_v21, 1  ;;  %v986_v37 = vadd.f32 %v985_v19, %v984_v24  ;;  %v998_v39 = vadd.f32 %v997_v29, %v996_v27  ;;  %v1104_v5 = vrot.slane %v8666_v17, %v8571_v9 }
 0x214   : > { %v994_v23 = vrot.slane %v993_v15, 1  ;;  %v8689_v54 = vsub.s32 %v1181_v32, %v8557_v4  ;;  %v1057_v29 = vrot.slane %v8662_v63, %v8586_v41 }
 0x215   : > { %v7073_v33 = vpop.eup %7072  ;;  %v981_v36 = vadd.f32 %v980_v18, %v979_v21  ;;  %v987_v50 = vrot.slane %v986_v37, 1  ;;  %v999_v51 = vrot.slane %v998_v39, 2 }
 0x216   : > { %v7075_v40 = vpop.eup %7074  ;;  %v1027_v42 = vmul.f32 %v7073_v33, %v8607_v11  ;;  %v995_v46 = vadd.f32 %v994_v23, %v993_v15 }
 0x217   : > { %v7077_v7 = vpop.eup %7076  ;;  %v1029_v47 = vmul.f32 %v7075_v40, %v8613_v20  ;;  %v1007_v49 = vmul.f32 0.25, %v981_v36  ;;  %v988_v9 = vadd.f32 %v987_v50, %v986_v37  ;;  %v1000_v20 = vadd.f32 %v999_v51, %v998_v39 }
 0x218   : > { %v7079_v52 = vpop.eup %7078  ;;  %v1078_v13 = vmul.f32 %v1041_v25, %v1027_v42  ;;  %v1028_v53 = vmul.f32 %v7077_v7, %v8615_v6  ;;  %v1009_v11 = vmul.f32 0.25, %v995_v46  ;;  %v1065_v37 = vrot.slane %v8662_v63, %v8589_v44 }
 0x219   : > { %v1080_v55 = vmul.f32 %v1049_v22, %v1029_v47  ;;  %v1030_v8 = vmul.f32 %v7079_v52, %v8623_v26  ;;  %v1015_v56 = vadd.f32 1e-05, %v1007_v49  ;;  %v1008_v61 = vmul.f32 0.25, %v988_v9 }
 0x21a   : > { %v1129_v57 = vadd.f32 %v1092_v30, %v1078_v13  ;;  %v1079_v58 = vmul.f32 %v1045_v28, %v1028_v53  ;;  %v1017_v59 = vadd.f32 1e-05, %v1009_v11  ;;  %v1001_v12 = vrot.slane %v1000_v20, 1 }
 0x21b   : > { %v1131_v60 = vadd.f32 %v1100_v31, %v1080_v55  ;;  %v1081_v14 = vmul.f32 %v1053_v35, %v1030_v8  ;;  %7080 = vrsqrt.f32 %v1015_v56  ;;  %v1016_v3 = vadd.f32 1e-05, %v1008_v61 }
 0x21c   : > { %vm1137_vm3 = vcmp.gt.f32.partialorder %v1129_v57, 0.0  ;;  %v1145_v0 = vmul.f32 0.01, %v1129_v57  ;;  %v1130_v6 = vadd.f32 %v1096_v43, %v1079_v58  ;;  %7082 = vrsqrt.f32 %v1017_v59 }
 0x21d   : > { %vm1139_vm4 = vcmp.gt.f32.partialorder %v1131_v60, 0.0  ;;  %v1147_v4 = vmul.f32 0.01, %v1131_v60  ;;  %v1132_v1 = vadd.f32 %v1104_v5, %v1081_v14  ;;  %7084 = vrsqrt.f32 %v1016_v3 }
 0x21e   : > { %v1153_v10 = vsel %vm1137_vm3, %v1129_v57, %v1145_v0  ;;  %vm1138_vm5 = vcmp.gt.f32.partialorder %v1130_v6, 0.0  ;;  %v1146_v26 = vmul.f32 0.01, %v1130_v6  ;;  %v1002_v25 = vadd.f32 %v1001_v12, %v1000_v20 }
 0x21f   : > { %v1155_v16 = vsel %vm1139_vm4, %v1131_v60, %v1147_v4  ;;  %vm1140_vm6 = vcmp.gt.f32.partialorder %v1132_v1, 0.0  ;;  %v1148_v21 = vmul.f32 0.01, %v1132_v1  ;;  %v1108_v35 = vrot.slane %v8666_v17, %v8586_v41 }
 0x220   : > { %v1154_v24 = vsel %vm1138_vm5, %v1130_v6, %v1146_v26  ;;  %v1010_v28 = vmul.f32 0.25, %v1002_v25  ;;  %v1061_v40 = vrot.slane %v8662_v63, %v8592_v45  ;;  %v1116_v41 = vrot.slane %v8666_v17, %v8589_v44 }
 0x221   : > { %v6193_v22 = vpack.c.bf16 %v1154_v24, %v1153_v10  ;;  %v1156_v15 = vsel %vm1140_vm6, %v1132_v1, %v1148_v21  ;;  %v1069_v50 = vrot.slane %v8662_v63, %v8595_v48 }
 0x222   : > { %v6194_v27 = vpack.c.bf16 %v1156_v15, %v1155_v16  ;;  %v1018_v30 = vadd.f32 1e-05, %v1010_v28 }
 0x223   : > { %v1185_v18 = vrot.slane %v6193_v22, %v8689_v54 }
 0x224   : > { %v1192_v19 = vrot.slane %v6194_v27, %v8689_v54  ;;  %7086 = vrsqrt.f32 %v1018_v30 }
 0x225   : > { %v7081_v31 = vpop.eup %7080 }
 0x226   : > { %v7083_v32 = vpop.eup %7082  ;;  %v1193_v23 = vcombine.low %v1185_v18, %v1192_v19  ;;  %v1031_v33 = vmul.f32 %v7081_v31, %v8642_v34  ;;  %v1112_v34 = vrot.slane %v8666_v17, %v8592_v45  ;;  %v1120_v45 = vrot.slane %v8666_v17, %v8595_v48 }
 0x227   : > { %v1033_v36 = vmul.f32 %v7083_v32, %v8645_v38  ;;  %v7085_v42 = vpop.eup %7084 }
 0x228   : > { %1213 = vst [vmem:[#allocation2] sm:$0xff] %v1193_v23  ;;  %v1082_v39 = vmul.f32 %v1057_v29, %v1031_v33  ;;  %v1032_v5 = vmul.f32 %v7085_v42, %v8652_v2 }
 0x229   : > { %v1084_v46 = vmul.f32 %v1065_v37, %v1033_v36 }
 0x22a   : > { %v1133_v43 = vadd.f32 %v1108_v35, %v1082_v39  ;;  %v1083_v7 = vmul.f32 %v1061_v40, %v1032_v5 }
 0x22b   : > { %v1135_v49 = vadd.f32 %v1116_v41, %v1084_v46 }
 0x22c   : > { %v1149_v38 = vmul.f32 0.01, %v1133_v43  ;;  %vm1141_vm7 = vcmp.gt.f32.partialorder %v1133_v43, 0.0  ;;  %v1134_v47 = vadd.f32 %v1112_v34, %v1083_v7 }
 0x22d   : > { %v1151_v11 = vmul.f32 0.01, %v1135_v49  ;;  %vm1143_vm9 = vcmp.gt.f32.partialorder %v1135_v49, 0.0 }
 0x22e   : > { %v7087_v51 = vpop.eup %7086  ;;  %v1157_v52 = vsel %vm1141_vm7, %v1133_v43, %v1149_v38  ;;  %vm1142_vm8 = vcmp.gt.f32.partialorder %v1134_v47, 0.0  ;;  %v1150_v13 = vmul.f32 0.01, %v1134_v47 }
 0x22f   : > { %v1034_v2 = vmul.f32 %v7087_v51, %v8660_v62  ;;  %v1159_v56 = vsel %vm1143_vm9, %v1135_v49, %v1151_v11 }
 0x230   : > { %v1158_v53 = vsel %vm1142_vm8, %v1134_v47, %v1150_v13 }
 0x231   : > { %v6195_v44 = vpack.c.bf16 %v1158_v53, %v1157_v52  ;;  %v1085_v55 = vmul.f32 %v1069_v50, %v1034_v2 }
 0x233   : > { %v1136_v8 = vadd.f32 %v1120_v45, %v1085_v55  ;;  %v1202_v63 = vrot.slane %v6195_v44, %v8689_v54 }
 0x235   : > { %vm1144_vm10 = vcmp.gt.f32.partialorder %v1136_v8, 0.0  ;;  %v1152_v9 = vmul.f32 0.01, %v1136_v8 }
 0x237   : > { %v1160_v57 = vsel %vm1144_vm10, %v1136_v8, %v1152_v9 }
 0x238   : > { %v6196_v58 = vpack.c.bf16 %v1160_v57, %v1159_v56 }
 0x23a   : > { %v1209_v59 = vrot.slane %v6196_v58, %v8689_v54 }
 0x23c   : > { %v1210_v20 = vcombine.low %v1202_v63, %v1209_v59 }
 0x23e   : > { %1214 = vst [vmem:[#allocation2 + $0x8] sm:$0xff] %v1210_v20 }
 0x23f PF: > { %v7088_v48 = vld [vmem:[%s8523_s18 + $0x4] ss:$28 sps:$4 sm:$0xff]   ;;  %v7094_v60 = vld [vmem:[%s8523_s18 + $0x3c] ss:$28 sps:$4 sm:$0xff]   ;;  %v7100_v6 = vld [vmem:[%s8523_s18 + $0x74] ss:$28 sps:$4 sm:$0xff]   ;;  %v1731_v42 = vlaneseq }
 0x240   : > { %v7090_v62 = vld [vmem:[%s8523_s18 + $0x384] ss:$28 sps:$4 sm:$0xff]   ;;  %4114 = vmatprep.subr.bf16.mxu1 %v7088_v48  ;;  %v7096_v14 = vld [vmem:[%s8523_s18 + $0x3bc] ss:$28 sps:$4 sm:$0xff]   ;;  %v7102_v4 = vld [vmem:[%s8523_s18 + $0x3f4] ss:$28 sps:$4 sm:$0xff]  }
 0x241   : > { %v7092_v17 = vld [vmem:[%s8523_s18] ss:$28 sps:$4 sm:$0xff]   ;;  %4155 = vmatprep.subr.bf16.mxu0 %v7090_v62  ;;  %v7098_v61 = vld [vmem:[%s8523_s18 + $0x38] ss:$28 sps:$4 sm:$0xff]   ;;  %v7104_v1 = vld [vmem:[%s8523_s18 + $0x70] ss:$28 sps:$4 sm:$0xff]  }
 0x242   : > { %v7093_v54 = vld [vmem:[%s8523_s18 + $0x380] ss:$28 sps:$4 sm:$0xff]   ;;  %4115 = vmatpush1.bf16.msra.mxu1 %v7092_v17  ;;  %v7099_v0 = vld [vmem:[%s8523_s18 + $0x3b8] ss:$28 sps:$4 sm:$0xff]   ;;  %v7105_v3 = vld [vmem:[%s8523_s18 + $0x3f0] ss:$28 sps:$4 sm:$0xff]  }
 0x243   : > { %4156 = vmatpush1.bf16.msra.mxu0 %v7093_v54  ;;  %4116 = vmatprep.subr.bf16.mxu1 %v7094_v60  ;;  %v7106_v10 = vld [vmem:[%s8523_s18 + $0xac] ss:$28 sps:$4 sm:$0xff]   ;;  %v7112_v21 = vld [vmem:[%s8523_s18 + $0xe4] ss:$28 sps:$4 sm:$0xff]   ;;  %v7118_v15 = vld [vmem:[%s8523_s18 + $0x11c] ss:$28 sps:$4 sm:$0xff]  }
 0x244   : > { %4157 = vmatprep.subr.bf16.mxu0 %v7096_v14  ;;  %v7108_v26 = vld [vmem:[%s8523_s18 + $0x42c] ss:$28 sps:$4 sm:$0xff]   ;;  %v7114_v24 = vld [vmem:[%s8523_s18 + $0x464] ss:$28 sps:$4 sm:$0xff]   ;;  %v7120_v27 = vld [vmem:[%s8523_s18 + $0x49c] ss:$28 sps:$4 sm:$0xff]  }
 0x245   : > { %v7110_v12 = vld [vmem:[%s8523_s18 + $0xa8] ss:$28 sps:$4 sm:$0xff]   ;;  %v7116_v25 = vld [vmem:[%s8523_s18 + $0xe0] ss:$28 sps:$4 sm:$0xff]   ;;  %v7122_v28 = vld [vmem:[%s8523_s18 + $0x118] ss:$28 sps:$4 sm:$0xff]  }
 0x246   : > { %4117 = vmatpush1.bf16.msra.mxu1 %v7098_v61  ;;  %v7111_v16 = vld [vmem:[%s8523_s18 + $0x428] ss:$28 sps:$4 sm:$0xff]   ;;  %v7117_v22 = vld [vmem:[%s8523_s18 + $0x460] ss:$28 sps:$4 sm:$0xff]   ;;  %v7123_v18 = vld [vmem:[%s8523_s18 + $0x498] ss:$28 sps:$4 sm:$0xff]  }
 0x247   : > { %4158 = vmatpush1.bf16.msra.mxu0 %v7099_v0  ;;  %4118 = vmatprep.subr.bf16.mxu1 %v7100_v6  ;;  %v7124_v19 = vld [vmem:[%s8523_s18 + $0x154] ss:$28 sps:$4 sm:$0xff]   ;;  %v7130_v32 = vld [vmem:[%s8523_s18 + $0x18c] ss:$28 sps:$4 sm:$0xff]   ;;  %v7136_v36 = vld [vmem:[%s8523_s18 + $0x1c4] ss:$28 sps:$4 sm:$0xff]  }
 0x248   : > { %4159 = vmatprep.subr.bf16.mxu0 %v7102_v4  ;;  %v7126_v29 = vld [vmem:[%s8523_s18 + $0x4d4] ss:$28 sps:$4 sm:$0xff]   ;;  %v7132_v23 = vld [vmem:[%s8523_s18 + $0x50c] ss:$28 sps:$4 sm:$0xff]   ;;  %v7138_v37 = vld [vmem:[%s8523_s18 + $0x544] ss:$28 sps:$4 sm:$0xff]  }
 0x249   : > { %v7128_v30 = vld [vmem:[%s8523_s18 + $0x150] ss:$28 sps:$4 sm:$0xff]   ;;  %v7134_v33 = vld [vmem:[%s8523_s18 + $0x188] ss:$28 sps:$4 sm:$0xff]   ;;  %v7140_v39 = vld [vmem:[%s8523_s18 + $0x1c0] ss:$28 sps:$4 sm:$0xff]  }
 0x24a   : > { %4119 = vmatpush1.bf16.msra.mxu1 %v7104_v1  ;;  %v7129_v31 = vld [vmem:[%s8523_s18 + $0x4d0] ss:$28 sps:$4 sm:$0xff]   ;;  %v7135_v35 = vld [vmem:[%s8523_s18 + $0x508] ss:$28 sps:$4 sm:$0xff]   ;;  %v7141_v40 = vld [vmem:[%s8523_s18 + $0x540] ss:$28 sps:$4 sm:$0xff]  }
 0x24b   : > { %4160 = vmatpush1.bf16.msra.mxu0 %v7105_v3  ;;  %4120 = vmatprep.subr.bf16.mxu1 %v7106_v10  ;;  %v8181_v43 = vmov 1983009808   ;;  %v7142_v34 = vld [vmem:[%s8523_s18 + $0x1fc] ss:$28 sps:$4 sm:$0xff]   ;;  %v8755_v38 = vshrl.u32 %v1731_v42, 7  ;;  %v1215_v53 = vld [vmem:[#allocation2] sm:$0xff] }
 0x24c   : > { %4161 = vmatprep.subr.bf16.mxu0 %v7108_v26  ;;  %v1770_v5 = vunpack.c.l.s4 %v8181_v43  ;;  %v7144_v46 = vld [vmem:[%s8523_s18 + $0x57c] ss:$28 sps:$4 sm:$0xff]   ;;  %v7148_v49 = vld [vmem:[%s8523_s18 + $0x234] ss:$28 sps:$4 sm:$0xff]   ;;  %v7154_v2 = vld [vmem:[%s8523_s18 + $0x26c] ss:$28 sps:$4 sm:$0xff]   ;;  %v1768_v55 = vcombine.high %v1215_v53, %v1215_v53 }
 0x24d   : > { %v7146_v41 = vld [vmem:[%s8523_s18 + $0x1f8] ss:$28 sps:$4 sm:$0xff]   ;;  %v7152_v51 = vld [vmem:[%s8523_s18 + $0x230] ss:$28 sps:$4 sm:$0xff]   ;;  %v7158_v11 = vld [vmem:[%s8523_s18 + $0x268] ss:$28 sps:$4 sm:$0xff]  }
 0x24e   : > { %4121 = vmatpush1.bf16.msra.mxu1 %v7110_v12  ;;  %v1771_v7 = vunpack.c.0.s8 %v1770_v5  ;;  %v7147_v47 = vld [vmem:[%s8523_s18 + $0x578] ss:$28 sps:$4 sm:$0xff]   ;;  %v7153_v52 = vld [vmem:[%s8523_s18 + $0x5b0] ss:$28 sps:$4 sm:$0xff]   ;;  %v7159_v8 = vld [vmem:[%s8523_s18 + $0x5e8] ss:$28 sps:$4 sm:$0xff]  }
 0x24f   : > { %4162 = vmatpush1.bf16.msra.mxu0 %v7111_v16  ;;  %4122 = vmatprep.subr.bf16.mxu1 %v7112_v21  ;;  %v7150_v50 = vld [vmem:[%s8523_s18 + $0x5b4] ss:$28 sps:$4 sm:$0xff]   ;;  %v7156_v45 = vld [vmem:[%s8523_s18 + $0x5ec] ss:$28 sps:$4 sm:$0xff]   ;;  %v7160_v56 = vld [vmem:[%s8523_s18 + $0x2a4] ss:$28 sps:$4 sm:$0xff]  }
 0x250   : > { %4163 = vmatprep.subr.bf16.mxu0 %v7114_v24  ;;  %v8763_v13 = vsub.s32 %v1771_v7, %v8755_v38  ;;  %v7162_v9 = vld [vmem:[%s8523_s18 + $0x624] ss:$28 sps:$4 sm:$0xff]   ;;  %v7166_v48 = vld [vmem:[%s8523_s18 + $0x2dc] ss:$28 sps:$4 sm:$0xff]   ;;  %v7172_v60 = vld [vmem:[%s8523_s18 + $0x314] ss:$28 sps:$4 sm:$0xff]  }
 0x251   : > { %v7164_v58 = vld [vmem:[%s8523_s18 + $0x2a0] ss:$28 sps:$4 sm:$0xff]   ;;  %v7170_v17 = vld [vmem:[%s8523_s18 + $0x2d8] ss:$28 sps:$4 sm:$0xff]   ;;  %v7176_v61 = vld [vmem:[%s8523_s18 + $0x310] ss:$28 sps:$4 sm:$0xff]  }
 0x252   : > { %4123 = vmatpush1.bf16.msra.mxu1 %v7116_v25  ;;  %v8769_v44 = vrot.slane %v1215_v53, %v8763_v13  ;;  %v8779_v63 = vrot.slane %v1768_v55, %v8763_v13  ;;  %v7165_v20 = vld [vmem:[%s8523_s18 + $0x620] ss:$28 sps:$4 sm:$0xff]   ;;  %v7171_v54 = vld [vmem:[%s8523_s18 + $0x658] ss:$28 sps:$4 sm:$0xff]   ;;  %v7177_v0 = vld [vmem:[%s8523_s18 + $0x690] ss:$28 sps:$4 sm:$0xff]  }
 0x253   : > { %4164 = vmatpush1.bf16.msra.mxu0 %v7117_v22  ;;  %4124 = vmatprep.subr.bf16.mxu1 %v7118_v15  ;;  %v7168_v62 = vld [vmem:[%s8523_s18 + $0x65c] ss:$28 sps:$4 sm:$0xff]   ;;  %v7174_v14 = vld [vmem:[%s8523_s18 + $0x694] ss:$28 sps:$4 sm:$0xff]   ;;  %v7178_v6 = vld [vmem:[%s8523_s18 + $0x34c] ss:$28 sps:$4 sm:$0xff]  }
 0x254   : > { %4165 = vmatprep.subr.bf16.mxu0 %v7120_v27  ;;  %v8776_v57 = vcombine.high %v8769_v44, %v8769_v44  ;;  %v8785_v59 = vcombine.high %v8779_v63, %v8779_v63  ;;  %v7180_v4 = vld [vmem:[%s8523_s18 + $0x6cc] ss:$28 sps:$4 sm:$0xff]   ;;  %v7187_v10 = vld [vmem:[%s8523_s18 + $0x704] ss:$28 sps:$4 sm:$0xff]   ;;  %v7193_v21 = vld [vmem:[%s8523_s18 + $0x73c] ss:$28 sps:$4 sm:$0xff]  }
 0x255   : > { %v7182_v1 = vld [vmem:[%s8523_s18 + $0x348] ss:$28 sps:$4 sm:$0xff]   ;;  %v7185_v12 = vld [vmem:[%s8523_s18 + $0x700] ss:$28 sps:$4 sm:$0xff]   ;;  %v7191_v25 = vld [vmem:[%s8523_s18 + $0x738] ss:$28 sps:$4 sm:$0xff]  }
 0x256   : > { %4125 = vmatpush1.bf16.msra.mxu1 %v7122_v28  ;;  %4146 = vmatprep.mubr.bf16.mxu1 %v8776_v57  ;;  %v7183_v3 = vld [vmem:[%s8523_s18 + $0x6c8] ss:$28 sps:$4 sm:$0xff]   ;;  %v7194_v22 = vld [vmem:[%s8523_s18 + $0x40] ss:$28 sps:$4 sm:$0xff]   ;;  %v7199_v15 = vld [vmem:[%s8523_s18 + $0x774] ss:$28 sps:$4 sm:$0xff]  }
 0x257   : > { %4166 = vmatpush1.bf16.msra.mxu0 %v7123_v18  ;;  %4126 = vmatprep.subr.bf16.mxu1 %v7124_v19  ;;  %v7190_v26 = vld [vmem:[%s8523_s18 + $0xc] ss:$28 sps:$4 sm:$0xff]   ;;  %v7196_v24 = vld [vmem:[%s8523_s18 + $0x44] ss:$28 sps:$4 sm:$0xff]   ;;  %v7202_v27 = vld [vmem:[%s8523_s18 + $0x7c] ss:$28 sps:$4 sm:$0xff]  }
 0x258   : > { %4167 = vmatprep.subr.bf16.mxu0 %v7126_v29  ;;  %4187 = vmatprep.mubr.bf16.mxu0 %v8785_v59  ;;  %v7188_v16 = vld [vmem:[%s8523_s18 + $0x8] ss:$28 sps:$4 sm:$0xff]   ;;  %v7197_v28 = vld [vmem:[%s8523_s18 + $0x770] ss:$28 sps:$4 sm:$0xff]   ;;  %v7200_v18 = vld [vmem:[%s8523_s18 + $0x78] ss:$28 sps:$4 sm:$0xff]  }
 0x259   : > { %v7205_v19 = vld [vmem:[%s8523_s18 + $0x7ac] ss:$28 sps:$4 sm:$0xff]   ;;  %v7208_v29 = vld [vmem:[%s8523_s18 + $0xb4] ss:$28 sps:$4 sm:$0xff]   ;;  %v7226_v43 = vld [vmem:[%s8523_s18 + $0x15c] ss:$28 sps:$4 sm:$0xff]  }
 0x25a   : > { %4127 = vmatpush1.bf16.msra.mxu1 %v7128_v30  ;;  %v7203_v30 = vld [vmem:[%s8523_s18 + $0x7a8] ss:$28 sps:$4 sm:$0xff]   ;;  %v7223_v42 = vld [vmem:[%s8523_s18 + $0x854] ss:$28 sps:$4 sm:$0xff]   ;;  %vm4766_vm11 = vcmask 1043456   ;;  %s5026_s26 = smul.u32 28, %s8254_s15 }
 0x25b   : > { %4168 = vmatpush1.bf16.msra.mxu0 %v7129_v31  ;;  %4128 = vmatprep.subr.bf16.mxu1 %v7130_v32  ;;  %v7206_v31 = vld [vmem:[%s8523_s18 + $0xb0] ss:$28 sps:$4 sm:$0xff]   ;;  %v7211_v32 = vld [vmem:[%s8523_s18 + $0x7e4] ss:$28 sps:$4 sm:$0xff]   ;;  %p6659_p1 = scmp.ne.s32.totalorder %s8254_s15, 6 }
 0x25c   : > { %4169 = vmatprep.subr.bf16.mxu0 %v7132_v23  ;;  %v7214_v23 = vld [vmem:[%s8523_s18 + $0xec] ss:$28 sps:$4 sm:$0xff]   ;;  %v7244_v55 = vld [vmem:[%s8523_s18 + $0x204] ss:$28 sps:$4 sm:$0xff]   ;;  %s9282_s1 = scalar_lea.vmem [#allocation3], %s5026_s26  ;;  %s9657_s30 = sld [smem:[#allocation27_spill]] (!%p6659_p1) }
 0x25d   : > { %v8830_v5 = vld [vmem:[#allocation2 + $0x8] sm:$0xff]  ;;  %v7236_v53 = vld [vmem:[%s8523_s18 + $0x1c8] ss:$28 sps:$4 sm:$0xff]  }
 0x25e   : > { %4129 = vmatpush1.bf16.msra.mxu1 %v7134_v33  ;;  %v7209_v33 = vld [vmem:[%s8523_s18 + $0x7e0] ss:$28 sps:$4 sm:$0xff]  }
 0x25f   : > { %4170 = vmatpush1.bf16.msra.mxu0 %v7135_v35  ;;  %4130 = vmatprep.subr.bf16.mxu1 %v7136_v36  ;;  %v7212_v35 = vld [vmem:[%s8523_s18 + $0xe8] ss:$28 sps:$4 sm:$0xff]   ;;  %v7217_v36 = vld [vmem:[%s8523_s18 + $0x81c] ss:$28 sps:$4 sm:$0xff]  }
 0x260   : > { %4171 = vmatprep.subr.bf16.mxu0 %v7138_v37  ;;  %v7220_v37 = vld [vmem:[%s8523_s18 + $0x124] ss:$28 sps:$4 sm:$0xff]  }
 0x262   : > { %4131 = vmatpush1.bf16.msra.mxu1 %v7140_v39  ;;  %v7215_v39 = vld [vmem:[%s8523_s18 + $0x818] ss:$28 sps:$4 sm:$0xff]   ;;  %s9658_s28 = smov (!%p6659_p1), %s9657_s30 }
 0x263   : > { %4172 = vmatpush1.bf16.msra.mxu0 %v7141_v40  ;;  %4132 = vmatprep.subr.bf16.mxu1 %v7142_v34  ;;  %v7218_v40 = vld [vmem:[%s8523_s18 + $0x120] ss:$28 sps:$4 sm:$0xff]   ;;  %v8834_v34 = vrot.slane %v8830_v5, %v8763_v13 }
 0x264   : > { %4173 = vmatprep.subr.bf16.mxu0 %v7144_v46  ;;  %v7221_v46 = vld [vmem:[%s8523_s18 + $0x850] ss:$28 sps:$4 sm:$0xff]  }
 0x265   : > { %v8840_v7 = vcombine.high %v8834_v34, %v8834_v34 }
 0x266   : > { %4133 = vmatpush1.bf16.msra.mxu1 %v7146_v41  ;;  %v7224_v41 = vld [vmem:[%s8523_s18 + $0x158] ss:$28 sps:$4 sm:$0xff]  }
 0x267   : > { %4174 = vmatpush1.bf16.msra.mxu0 %v7147_v47  ;;  %4134 = vmatprep.subr.bf16.mxu1 %v7148_v49  ;;  %v7229_v47 = vld [vmem:[%s8523_s18 + $0x88c] ss:$28 sps:$4 sm:$0xff]   ;;  %v7232_v49 = vld [vmem:[%s8523_s18 + $0x194] ss:$28 sps:$4 sm:$0xff]  }
 0x268   : > { %4175 = vmatprep.subr.bf16.mxu0 %v7150_v50  ;;  %v7227_v50 = vld [vmem:[%s8523_s18 + $0x888] ss:$28 sps:$4 sm:$0xff]  }
 0x26a   : > { %4135 = vmatpush1.bf16.msra.mxu1 %v7152_v51  ;;  %v7230_v51 = vld [vmem:[%s8523_s18 + $0x190] ss:$28 sps:$4 sm:$0xff]  }
 0x26b   : > { %4176 = vmatpush1.bf16.msra.mxu0 %v7153_v52  ;;  %4136 = vmatprep.subr.bf16.mxu1 %v7154_v2  ;;  %v7235_v52 = vld [vmem:[%s8523_s18 + $0x8c4] ss:$28 sps:$4 sm:$0xff]   ;;  %v7238_v2 = vld [vmem:[%s8523_s18 + $0x1cc] ss:$28 sps:$4 sm:$0xff]  }
 0x26c   : > { %4177 = vmatprep.subr.bf16.mxu0 %v7156_v45  ;;  %v7233_v45 = vld [vmem:[%s8523_s18 + $0x8c0] ss:$28 sps:$4 sm:$0xff]  }
 0x26e   : > { %4137 = vmatpush1.bf16.msra.mxu1 %v7158_v11  ;;  %v7241_v11 = vld [vmem:[%s8523_s18 + $0x8fc] ss:$28 sps:$4 sm:$0xff]  }
 0x26f   : > { %4178 = vmatpush1.bf16.msra.mxu0 %v7159_v8  ;;  %4138 = vmatprep.subr.bf16.mxu1 %v7160_v56  ;;  %v7239_v8 = vld [vmem:[%s8523_s18 + $0x8f8] ss:$28 sps:$4 sm:$0xff]   ;;  %v7242_v56 = vld [vmem:[%s8523_s18 + $0x200] ss:$28 sps:$4 sm:$0xff]  }
 0x270   : > { %4179 = vmatprep.subr.bf16.mxu0 %v7162_v9  ;;  %v7247_v9 = vld [vmem:[%s8523_s18 + $0x934] ss:$28 sps:$4 sm:$0xff]  }
 0x272   : > { %4139 = vmatpush1.bf16.msra.mxu1 %v7164_v58  ;;  %v7250_v58 = vld [vmem:[%s8523_s18 + $0x23c] ss:$28 sps:$4 sm:$0xff]  }
 0x273   : > { %4180 = vmatpush1.bf16.msra.mxu0 %v7165_v20  ;;  %4140 = vmatprep.subr.bf16.mxu1 %v7166_v48  ;;  %v7245_v20 = vld [vmem:[%s8523_s18 + $0x930] ss:$28 sps:$4 sm:$0xff]   ;;  %v7248_v48 = vld [vmem:[%s8523_s18 + $0x238] ss:$28 sps:$4 sm:$0xff]  }
 0x274   : > { %4181 = vmatprep.subr.bf16.mxu0 %v7168_v62  ;;  %v7253_v62 = vld [vmem:[%s8523_s18 + $0x96c] ss:$28 sps:$4 sm:$0xff]  }
 0x276   : > { %4141 = vmatpush1.bf16.msra.mxu1 %v7170_v17  ;;  %v7256_v17 = vld [vmem:[%s8523_s18 + $0x274] ss:$28 sps:$4 sm:$0xff]  }
 0x277   : > { %4182 = vmatpush1.bf16.msra.mxu0 %v7171_v54  ;;  %4142 = vmatprep.subr.bf16.mxu1 %v7172_v60  ;;  %v7251_v54 = vld [vmem:[%s8523_s18 + $0x968] ss:$28 sps:$4 sm:$0xff]   ;;  %v7254_v60 = vld [vmem:[%s8523_s18 + $0x270] ss:$28 sps:$4 sm:$0xff]  }
 0x278   : > { %4183 = vmatprep.subr.bf16.mxu0 %v7174_v14  ;;  %v7259_v14 = vld [vmem:[%s8523_s18 + $0x9a4] ss:$28 sps:$4 sm:$0xff]  }
 0x27a   : > { %4143 = vmatpush1.bf16.msra.mxu1 %v7176_v61  ;;  %v7262_v61 = vld [vmem:[%s8523_s18 + $0x2ac] ss:$28 sps:$4 sm:$0xff]  }
 0x27b   : > { %4184 = vmatpush1.bf16.msra.mxu0 %v7177_v0  ;;  %4144 = vmatprep.subr.bf16.mxu1 %v7178_v6  ;;  %v7257_v0 = vld [vmem:[%s8523_s18 + $0x9a0] ss:$28 sps:$4 sm:$0xff]   ;;  %v7260_v6 = vld [vmem:[%s8523_s18 + $0x2a8] ss:$28 sps:$4 sm:$0xff]  }
 0x27c   : > { %4185 = vmatprep.subr.bf16.mxu0 %v7180_v4  ;;  %v7265_v4 = vld [vmem:[%s8523_s18 + $0x9dc] ss:$28 sps:$4 sm:$0xff]  }
 0x27e   : > { %4145 = vmatpush1.bf16.msra.mxu1 %v7182_v1  ;;  %v7268_v1 = vld [vmem:[%s8523_s18 + $0x2e4] ss:$28 sps:$4 sm:$0xff]  }
 0x27f   : > { %4186 = vmatpush1.bf16.msra.mxu0 %v7183_v3  ;;  %4278 = vmatprep.subr.bf16.mxu1 %v7190_v26  ;;  %v7263_v3 = vld [vmem:[%s8523_s18 + $0x9d8] ss:$28 sps:$4 sm:$0xff]  }
 0x280   : > { %4196 = vmatprep.subr.bf16.mxu0 %v7187_v10  ;;  %v7266_v10 = vld [vmem:[%s8523_s18 + $0x2e0] ss:$28 sps:$4 sm:$0xff]   ;;  %v7271_v26 = vld [vmem:[%s8523_s18 + $0xa14] ss:$28 sps:$4 sm:$0xff]  }
 0x281   : > { %4147 = vmatmul.mubr.bf16.vlgmr.msra.gmra.mrb[0].mxu1 %v8769_v44 }
 0x282   : > { %4188 = vmatmul.mubr.bf16.vlgmr.msra.gmra.mrb[0].mxu0 %v8779_v63  ;;  %4279 = vmatpush1.bf16.msra.mxu1 %v7188_v16  ;;  %v7269_v16 = vld [vmem:[%s8523_s18 + $0xa10] ss:$28 sps:$4 sm:$0xff]  }
 0x283   : > { %4197 = vmatpush1.bf16.msra.mxu0 %v7185_v12  ;;  %4280 = vmatprep.subr.bf16.mxu1 %v7196_v24  ;;  %v7274_v12 = vld [vmem:[%s8523_s18 + $0x31c] ss:$28 sps:$4 sm:$0xff]   ;;  %v7277_v24 = vld [vmem:[%s8523_s18 + $0xa4c] ss:$28 sps:$4 sm:$0xff]  }
 0x284   : > { %4198 = vmatprep.subr.bf16.mxu0 %v7193_v21  ;;  %4310 = vmatprep.mubr.bf16.mxu1 %v8776_v57  ;;  %v7272_v21 = vld [vmem:[%s8523_s18 + $0x318] ss:$28 sps:$4 sm:$0xff]  }
 0x285   : > { %4228 = vmatprep.mubr.bf16.mxu0 %v8840_v7 }
 0x286   : > { %4281 = vmatpush1.bf16.msra.mxu1 %v7194_v22  ;;  %v1785_v22 = vcombine.high %v8830_v5, %v8830_v5  ;;  %v7302_v5 = vld [vmem:[%s8523_s18 + $0x430] ss:$28 sps:$4 sm:$0xff]  }
 0x287   : > { %4199 = vmatpush1.bf16.msra.mxu0 %v7191_v25  ;;  %4282 = vmatprep.subr.bf16.mxu1 %v7202_v27  ;;  %v7280_v25 = vld [vmem:[%s8523_s18 + $0x354] ss:$28 sps:$4 sm:$0xff]  }
 0x288   : > { %4200 = vmatprep.subr.bf16.mxu0 %v7199_v15  ;;  %v7275_v15 = vld [vmem:[%s8523_s18 + $0xa48] ss:$28 sps:$4 sm:$0xff]   ;;  %v7278_v27 = vld [vmem:[%s8523_s18 + $0x350] ss:$28 sps:$4 sm:$0xff]  }
 0x28a   : > { %4283 = vmatpush1.bf16.msra.mxu1 %v7200_v18  ;;  %v7286_v18 = vld [vmem:[%s8523_s18 + $0x38c] ss:$28 sps:$4 sm:$0xff]  }
 0x28b   : > { %4201 = vmatpush1.bf16.msra.mxu0 %v7197_v28  ;;  %4284 = vmatprep.subr.bf16.mxu1 %v7208_v29  ;;  %v7283_v28 = vld [vmem:[%s8523_s18 + $0xa84] ss:$28 sps:$4 sm:$0xff]  }
 0x28c   : > { %4202 = vmatprep.subr.bf16.mxu0 %v7205_v19  ;;  %v8884_v19 = vrot.slane %v1785_v22, %v8763_v13  ;;  %v7281_v29 = vld [vmem:[%s8523_s18 + $0xa80] ss:$28 sps:$4 sm:$0xff]   ;;  %v7287_v13 = vld [vmem:[%s8523_s18 + $0xab8] ss:$28 sps:$4 sm:$0xff]  }
 0x28d   : > { %v7361_v22 = vld [vmem:[%s8523_s18 + $0xd5c] ss:$28 sps:$4 sm:$0xff]  }
 0x28e   : > { %4285 = vmatpush1.bf16.msra.mxu1 %v7206_v31  ;;  %v7289_v31 = vld [vmem:[%s8523_s18 + $0xabc] ss:$28 sps:$4 sm:$0xff]  }
 0x28f   : > { %4203 = vmatpush1.bf16.msra.mxu0 %v7203_v30  ;;  %4286 = vmatprep.subr.bf16.mxu1 %v7214_v23  ;;  %v7284_v30 = vld [vmem:[%s8523_s18 + $0x388] ss:$28 sps:$4 sm:$0xff]   ;;  %v8892_v23 = vcombine.high %v8884_v19, %v8884_v19 }
 0x290   : > { %4204 = vmatprep.subr.bf16.mxu0 %v7211_v32  ;;  %v7292_v32 = vld [vmem:[%s8523_s18 + $0x3c4] ss:$28 sps:$4 sm:$0xff]  }
 0x292   : > { %4287 = vmatpush1.bf16.msra.mxu1 %v7212_v35  ;;  %v7295_v35 = vld [vmem:[%s8523_s18 + $0xaf4] ss:$28 sps:$4 sm:$0xff]  }
 0x293   : > { %4205 = vmatpush1.bf16.msra.mxu0 %v7209_v33  ;;  %4288 = vmatprep.subr.bf16.mxu1 %v7220_v37  ;;  %v7290_v33 = vld [vmem:[%s8523_s18 + $0x3c0] ss:$28 sps:$4 sm:$0xff]   ;;  %v7293_v37 = vld [vmem:[%s8523_s18 + $0xaf0] ss:$28 sps:$4 sm:$0xff]  }
 0x294   : > { %4206 = vmatprep.subr.bf16.mxu0 %v7217_v36  ;;  %v7298_v36 = vld [vmem:[%s8523_s18 + $0x3fc] ss:$28 sps:$4 sm:$0xff]  }
 0x296   : > { %4289 = vmatpush1.bf16.msra.mxu1 %v7218_v40  ;;  %v7301_v40 = vld [vmem:[%s8523_s18 + $0xb2c] ss:$28 sps:$4 sm:$0xff]  }
 0x297   : > { %4207 = vmatpush1.bf16.msra.mxu0 %v7215_v39  ;;  %4290 = vmatprep.subr.bf16.mxu1 %v7226_v43  ;;  %v7296_v39 = vld [vmem:[%s8523_s18 + $0x3f8] ss:$28 sps:$4 sm:$0xff]   ;;  %v7299_v43 = vld [vmem:[%s8523_s18 + $0xb28] ss:$28 sps:$4 sm:$0xff]  }
 0x298   : > { %4208 = vmatprep.subr.bf16.mxu0 %v7223_v42  ;;  %v7304_v42 = vld [vmem:[%s8523_s18 + $0x434] ss:$28 sps:$4 sm:$0xff]  }
 0x29a   : > { %4291 = vmatpush1.bf16.msra.mxu1 %v7224_v41  ;;  %v7310_v41 = vld [vmem:[%s8523_s18 + $0x46c] ss:$28 sps:$4 sm:$0xff]  }
 0x29b   : > { %4209 = vmatpush1.bf16.msra.mxu0 %v7221_v46  ;;  %4292 = vmatprep.subr.bf16.mxu1 %v7232_v49  ;;  %v7307_v46 = vld [vmem:[%s8523_s18 + $0xb64] ss:$28 sps:$4 sm:$0xff]  }
 0x29c   : > { %4210 = vmatprep.subr.bf16.mxu0 %v7229_v47  ;;  %v7305_v47 = vld [vmem:[%s8523_s18 + $0xb60] ss:$28 sps:$4 sm:$0xff]   ;;  %v7308_v49 = vld [vmem:[%s8523_s18 + $0x468] ss:$28 sps:$4 sm:$0xff]  }
 0x29e   : > { %4293 = vmatpush1.bf16.msra.mxu1 %v7230_v51  ;;  %v7316_v51 = vld [vmem:[%s8523_s18 + $0x4a4] ss:$28 sps:$4 sm:$0xff]  }
 0x29f   : > { %4211 = vmatpush1.bf16.msra.mxu0 %v7227_v50  ;;  %4294 = vmatprep.subr.bf16.mxu1 %v7238_v2  ;;  %v7313_v50 = vld [vmem:[%s8523_s18 + $0xb9c] ss:$28 sps:$4 sm:$0xff]  }
 0x2a0   : > { %4212 = vmatprep.subr.bf16.mxu0 %v7235_v52  ;;  %v7311_v52 = vld [vmem:[%s8523_s18 + $0xb98] ss:$28 sps:$4 sm:$0xff]   ;;  %v7314_v2 = vld [vmem:[%s8523_s18 + $0x4a0] ss:$28 sps:$4 sm:$0xff]  }
 0x2a2   : > { %4295 = vmatpush1.bf16.msra.mxu1 %v7236_v53  ;;  %v7322_v53 = vld [vmem:[%s8523_s18 + $0x4dc] ss:$28 sps:$4 sm:$0xff]  }
 0x2a3   : > { %4213 = vmatpush1.bf16.msra.mxu0 %v7233_v45  ;;  %4296 = vmatprep.subr.bf16.mxu1 %v7244_v55  ;;  %v7319_v45 = vld [vmem:[%s8523_s18 + $0xbd4] ss:$28 sps:$4 sm:$0xff]  }
 0x2a4   : > { %4214 = vmatprep.subr.bf16.mxu0 %v7241_v11  ;;  %v7317_v11 = vld [vmem:[%s8523_s18 + $0xbd0] ss:$28 sps:$4 sm:$0xff]   ;;  %v7320_v55 = vld [vmem:[%s8523_s18 + $0x4d8] ss:$28 sps:$4 sm:$0xff]  }
 0x2a6   : > { %4297 = vmatpush1.bf16.msra.mxu1 %v7242_v56  ;;  %v7328_v56 = vld [vmem:[%s8523_s18 + $0x514] ss:$28 sps:$4 sm:$0xff]  }
 0x2a7   : > { %4215 = vmatpush1.bf16.msra.mxu0 %v7239_v8  ;;  %4298 = vmatprep.subr.bf16.mxu1 %v7250_v58  ;;  %v7325_v8 = vld [vmem:[%s8523_s18 + $0xc0c] ss:$28 sps:$4 sm:$0xff]  }
 0x2a8   : > { %4216 = vmatprep.subr.bf16.mxu0 %v7247_v9  ;;  %v7323_v9 = vld [vmem:[%s8523_s18 + $0xc08] ss:$28 sps:$4 sm:$0xff]   ;;  %v7326_v58 = vld [vmem:[%s8523_s18 + $0x510] ss:$28 sps:$4 sm:$0xff]  }
 0x2aa   : > { %4299 = vmatpush1.bf16.msra.mxu1 %v7248_v48  ;;  %v7334_v48 = vld [vmem:[%s8523_s18 + $0x54c] ss:$28 sps:$4 sm:$0xff]  }
 0x2ab   : > { %4217 = vmatpush1.bf16.msra.mxu0 %v7245_v20  ;;  %4300 = vmatprep.subr.bf16.mxu1 %v7256_v17  ;;  %v7331_v20 = vld [vmem:[%s8523_s18 + $0xc44] ss:$28 sps:$4 sm:$0xff]  }
 0x2ac   : > { %4218 = vmatprep.subr.bf16.mxu0 %v7253_v62  ;;  %v7329_v62 = vld [vmem:[%s8523_s18 + $0xc40] ss:$28 sps:$4 sm:$0xff]   ;;  %v7332_v17 = vld [vmem:[%s8523_s18 + $0x548] ss:$28 sps:$4 sm:$0xff]  }
 0x2ae   : > { %4301 = vmatpush1.bf16.msra.mxu1 %v7254_v60  ;;  %v7340_v60 = vld [vmem:[%s8523_s18 + $0x584] ss:$28 sps:$4 sm:$0xff]  }
 0x2af   : > { %4219 = vmatpush1.bf16.msra.mxu0 %v7251_v54  ;;  %4302 = vmatprep.subr.bf16.mxu1 %v7262_v61  ;;  %v7337_v54 = vld [vmem:[%s8523_s18 + $0xc7c] ss:$28 sps:$4 sm:$0xff]  }
 0x2b0   : > { %4220 = vmatprep.subr.bf16.mxu0 %v7259_v14  ;;  %v7335_v14 = vld [vmem:[%s8523_s18 + $0xc78] ss:$28 sps:$4 sm:$0xff]   ;;  %v7338_v61 = vld [vmem:[%s8523_s18 + $0x580] ss:$28 sps:$4 sm:$0xff]  }
 0x2b2   : > { %4303 = vmatpush1.bf16.msra.mxu1 %v7260_v6  ;;  %v7346_v6 = vld [vmem:[%s8523_s18 + $0x5bc] ss:$28 sps:$4 sm:$0xff]  }
 0x2b3   : > { %4221 = vmatpush1.bf16.msra.mxu0 %v7257_v0  ;;  %4304 = vmatprep.subr.bf16.mxu1 %v7268_v1  ;;  %v7343_v0 = vld [vmem:[%s8523_s18 + $0xcb4] ss:$28 sps:$4 sm:$0xff]  }
 0x2b4   : > { %4222 = vmatprep.subr.bf16.mxu0 %v7265_v4  ;;  %v7341_v4 = vld [vmem:[%s8523_s18 + $0xcb0] ss:$28 sps:$4 sm:$0xff]   ;;  %v7344_v1 = vld [vmem:[%s8523_s18 + $0x5b8] ss:$28 sps:$4 sm:$0xff]  }
 0x2b6   : > { %4305 = vmatpush1.bf16.msra.mxu1 %v7266_v10  ;;  %v7352_v10 = vld [vmem:[%s8523_s18 + $0x5f4] ss:$28 sps:$4 sm:$0xff]  }
 0x2b7   : > { %4223 = vmatpush1.bf16.msra.mxu0 %v7263_v3  ;;  %4306 = vmatprep.subr.bf16.mxu1 %v7274_v12  ;;  %v7349_v3 = vld [vmem:[%s8523_s18 + $0xcec] ss:$28 sps:$4 sm:$0xff]  }
 0x2b8   : > { %4224 = vmatprep.subr.bf16.mxu0 %v7271_v26  ;;  %v7347_v26 = vld [vmem:[%s8523_s18 + $0xce8] ss:$28 sps:$4 sm:$0xff]   ;;  %v7350_v12 = vld [vmem:[%s8523_s18 + $0x5f0] ss:$28 sps:$4 sm:$0xff]  }
 0x2ba   : > { %4307 = vmatpush1.bf16.msra.mxu1 %v7272_v21  ;;  %v7358_v21 = vld [vmem:[%s8523_s18 + $0x62c] ss:$28 sps:$4 sm:$0xff]  }
 0x2bb   : > { %4225 = vmatpush1.bf16.msra.mxu0 %v7269_v16  ;;  %4308 = vmatprep.subr.bf16.mxu1 %v7280_v25  ;;  %v7355_v16 = vld [vmem:[%s8523_s18 + $0xd24] ss:$28 sps:$4 sm:$0xff]  }
 0x2bc   : > { %4226 = vmatprep.subr.bf16.mxu0 %v7277_v24  ;;  %v7353_v24 = vld [vmem:[%s8523_s18 + $0xd20] ss:$28 sps:$4 sm:$0xff]   ;;  %v7356_v25 = vld [vmem:[%s8523_s18 + $0x628] ss:$28 sps:$4 sm:$0xff]  }
 0x2be   : > { %4309 = vmatpush1.bf16.msra.mxu1 %v7278_v27  ;;  %v7359_v27 = vld [vmem:[%s8523_s18 + $0xd58] ss:$28 sps:$4 sm:$0xff]  }
 0x2bf   : > { %4227 = vmatpush1.bf16.msra.mxu0 %v7275_v15  ;;  %4319 = vmatprep.subr.bf16.mxu1 %v7286_v18  ;;  %v7364_v15 = vld [vmem:[%s8523_s18 + $0x664] ss:$28 sps:$4 sm:$0xff]   ;;  %v7367_v18 = vld [vmem:[%s8523_s18 + $0xd94] ss:$28 sps:$4 sm:$0xff]  }
 0x2c0   : > { %4237 = vmatprep.subr.bf16.mxu0 %v7283_v28  ;;  %v7362_v28 = vld [vmem:[%s8523_s18 + $0x660] ss:$28 sps:$4 sm:$0xff]  }
 0x2c1   : > { %4311 = vmatmul.mubr.bf16.vlgmr.msra.gmra.mrb[4].mxu1 %v8769_v44 }
 0x2c2   : > { %4229 = vmatmul.mubr.bf16.vlgmr.msra.gmra.mrb[0].mxu0 %v8834_v34  ;;  %4320 = vmatpush1.bf16.msra.mxu1 %v7284_v30  ;;  %v7365_v30 = vld [vmem:[%s8523_s18 + $0xd90] ss:$28 sps:$4 sm:$0xff]  }
 0x2c3   : > { %4238 = vmatpush1.bf16.msra.mxu0 %v7281_v29  ;;  %4321 = vmatprep.subr.bf16.mxu1 %v7292_v32  ;;  %v7370_v29 = vld [vmem:[%s8523_s18 + $0x69c] ss:$28 sps:$4 sm:$0xff]   ;;  %v7373_v32 = vld [vmem:[%s8523_s18 + $0xdcc] ss:$28 sps:$4 sm:$0xff]  }
 0x2c4   : > { %4239 = vmatprep.subr.bf16.mxu0 %v7289_v31  ;;  %4269 = vmatprep.mubr.bf16.mxu0 %v8892_v23  ;;  %v7368_v31 = vld [vmem:[%s8523_s18 + $0x698] ss:$28 sps:$4 sm:$0xff]  }
 0x2c5   : > { %4351 = vmatprep.mubr.bf16.mxu1 %v8785_v59 }
 0x2c6   : > { %4322 = vmatpush1.bf16.msra.mxu1 %v7290_v33  ;;  %v7371_v33 = vld [vmem:[%s8523_s18 + $0xdc8] ss:$28 sps:$4 sm:$0xff]  }
 0x2c7   : > { %4240 = vmatpush1.bf16.msra.mxu0 %v7287_v13  ;;  %4323 = vmatprep.subr.bf16.mxu1 %v7298_v36  ;;  %v7376_v13 = vld [vmem:[%s8523_s18 + $0x6d4] ss:$28 sps:$4 sm:$0xff]   ;;  %v7380_v36 = vld [vmem:[%s8523_s18 + $0x70c] ss:$28 sps:$4 sm:$0xff]  }
 0x2c8   : > { %4241 = vmatprep.subr.bf16.mxu0 %v7295_v35  ;;  %v7374_v35 = vld [vmem:[%s8523_s18 + $0x6d0] ss:$28 sps:$4 sm:$0xff]  }
 0x2ca   : > { %4324 = vmatpush1.bf16.msra.mxu1 %v7296_v39  ;;  %v7378_v39 = vld [vmem:[%s8523_s18 + $0x708] ss:$28 sps:$4 sm:$0xff]  }
 0x2cb   : > { %4242 = vmatpush1.bf16.msra.mxu0 %v7293_v37  ;;  %4325 = vmatprep.subr.bf16.mxu1 %v7304_v42  ;;  %v7383_v37 = vld [vmem:[%s8523_s18 + $0x14] ss:$28 sps:$4 sm:$0xff]   ;;  %v7386_v42 = vld [vmem:[%s8523_s18 + $0x744] ss:$28 sps:$4 sm:$0xff]  }
 0x2cc   : > { %4243 = vmatprep.subr.bf16.mxu0 %v7301_v40  ;;  %v7381_v40 = vld [vmem:[%s8523_s18 + $0x10] ss:$28 sps:$4 sm:$0xff]  }
 0x2ce   : > { %4326 = vmatpush1.bf16.msra.mxu1 %v7302_v5  ;;  %v7384_v5 = vld [vmem:[%s8523_s18 + $0x740] ss:$28 sps:$4 sm:$0xff]  }
 0x2cf   : > { %4244 = vmatpush1.bf16.msra.mxu0 %v7299_v43  ;;  %4327 = vmatprep.subr.bf16.mxu1 %v7310_v41  ;;  %v7389_v43 = vld [vmem:[%s8523_s18 + $0x4c] ss:$28 sps:$4 sm:$0xff]   ;;  %v7392_v41 = vld [vmem:[%s8523_s18 + $0x77c] ss:$28 sps:$4 sm:$0xff]  }
 0x2d0   : > { %4245 = vmatprep.subr.bf16.mxu0 %v7307_v46  ;;  %v7387_v46 = vld [vmem:[%s8523_s18 + $0x48] ss:$28 sps:$4 sm:$0xff]  }
 0x2d2   : > { %4328 = vmatpush1.bf16.msra.mxu1 %v7308_v49  ;;  %v7390_v49 = vld [vmem:[%s8523_s18 + $0x778] ss:$28 sps:$4 sm:$0xff]  }
 0x2d3   : > { %4246 = vmatpush1.bf16.msra.mxu0 %v7305_v47  ;;  %4329 = vmatprep.subr.bf16.mxu1 %v7316_v51  ;;  %v7395_v47 = vld [vmem:[%s8523_s18 + $0x84] ss:$28 sps:$4 sm:$0xff]   ;;  %v7398_v51 = vld [vmem:[%s8523_s18 + $0x7b4] ss:$28 sps:$4 sm:$0xff]  }
 0x2d4   : > { %4247 = vmatprep.subr.bf16.mxu0 %v7313_v50  ;;  %v7393_v50 = vld [vmem:[%s8523_s18 + $0x80] ss:$28 sps:$4 sm:$0xff]  }
 0x2d6   : > { %4330 = vmatpush1.bf16.msra.mxu1 %v7314_v2  ;;  %v7396_v2 = vld [vmem:[%s8523_s18 + $0x7b0] ss:$28 sps:$4 sm:$0xff]  }
 0x2d7   : > { %4248 = vmatpush1.bf16.msra.mxu0 %v7311_v52  ;;  %4331 = vmatprep.subr.bf16.mxu1 %v7322_v53  ;;  %v7401_v52 = vld [vmem:[%s8523_s18 + $0xbc] ss:$28 sps:$4 sm:$0xff]   ;;  %v7404_v53 = vld [vmem:[%s8523_s18 + $0x7ec] ss:$28 sps:$4 sm:$0xff]  }
 0x2d8   : > { %4249 = vmatprep.subr.bf16.mxu0 %v7319_v45  ;;  %v7399_v45 = vld [vmem:[%s8523_s18 + $0xb8] ss:$28 sps:$4 sm:$0xff]  }
 0x2da   : > { %4332 = vmatpush1.bf16.msra.mxu1 %v7320_v55  ;;  %v7402_v55 = vld [vmem:[%s8523_s18 + $0x7e8] ss:$28 sps:$4 sm:$0xff]  }
 0x2db   : > { %4250 = vmatpush1.bf16.msra.mxu0 %v7317_v11  ;;  %4333 = vmatprep.subr.bf16.mxu1 %v7328_v56  ;;  %v7407_v11 = vld [vmem:[%s8523_s18 + $0xf4] ss:$28 sps:$4 sm:$0xff]   ;;  %v7410_v56 = vld [vmem:[%s8523_s18 + $0x824] ss:$28 sps:$4 sm:$0xff]  }
 0x2dc   : > { %4251 = vmatprep.subr.bf16.mxu0 %v7325_v8  ;;  %v7405_v8 = vld [vmem:[%s8523_s18 + $0xf0] ss:$28 sps:$4 sm:$0xff]  }
 0x2de   : > { %4334 = vmatpush1.bf16.msra.mxu1 %v7326_v58  ;;  %v7408_v58 = vld [vmem:[%s8523_s18 + $0x820] ss:$28 sps:$4 sm:$0xff]  }
 0x2df   : > { %4252 = vmatpush1.bf16.msra.mxu0 %v7323_v9  ;;  %4335 = vmatprep.subr.bf16.mxu1 %v7334_v48  ;;  %v7413_v9 = vld [vmem:[%s8523_s18 + $0x12c] ss:$28 sps:$4 sm:$0xff]   ;;  %v7416_v48 = vld [vmem:[%s8523_s18 + $0x85c] ss:$28 sps:$4 sm:$0xff]  }
 0x2e0   : > { %4253 = vmatprep.subr.bf16.mxu0 %v7331_v20  ;;  %v7411_v20 = vld [vmem:[%s8523_s18 + $0x128] ss:$28 sps:$4 sm:$0xff]  }
 0x2e2   : > { %4336 = vmatpush1.bf16.msra.mxu1 %v7332_v17  ;;  %v7414_v17 = vld [vmem:[%s8523_s18 + $0x858] ss:$28 sps:$4 sm:$0xff]  }
 0x2e3   : > { %4254 = vmatpush1.bf16.msra.mxu0 %v7329_v62  ;;  %4337 = vmatprep.subr.bf16.mxu1 %v7340_v60  ;;  %v7419_v62 = vld [vmem:[%s8523_s18 + $0x164] ss:$28 sps:$4 sm:$0xff]   ;;  %v7422_v60 = vld [vmem:[%s8523_s18 + $0x894] ss:$28 sps:$4 sm:$0xff]  }
 0x2e4   : > { %4255 = vmatprep.subr.bf16.mxu0 %v7337_v54  ;;  %v7417_v54 = vld [vmem:[%s8523_s18 + $0x160] ss:$28 sps:$4 sm:$0xff]  }
 0x2e6   : > { %4338 = vmatpush1.bf16.msra.mxu1 %v7338_v61  ;;  %v7420_v61 = vld [vmem:[%s8523_s18 + $0x890] ss:$28 sps:$4 sm:$0xff]  }
 0x2e7   : > { %4256 = vmatpush1.bf16.msra.mxu0 %v7335_v14  ;;  %4339 = vmatprep.subr.bf16.mxu1 %v7346_v6  ;;  %v7425_v14 = vld [vmem:[%s8523_s18 + $0x19c] ss:$28 sps:$4 sm:$0xff]   ;;  %v7428_v6 = vld [vmem:[%s8523_s18 + $0x8cc] ss:$28 sps:$4 sm:$0xff]  }
 0x2e8   : > { %4257 = vmatprep.subr.bf16.mxu0 %v7343_v0  ;;  %v7423_v0 = vld [vmem:[%s8523_s18 + $0x198] ss:$28 sps:$4 sm:$0xff]  }
 0x2ea   : > { %4340 = vmatpush1.bf16.msra.mxu1 %v7344_v1  ;;  %v7426_v1 = vld [vmem:[%s8523_s18 + $0x8c8] ss:$28 sps:$4 sm:$0xff]  }
 0x2eb   : > { %4258 = vmatpush1.bf16.msra.mxu0 %v7341_v4  ;;  %4341 = vmatprep.subr.bf16.mxu1 %v7352_v10  ;;  %v7431_v4 = vld [vmem:[%s8523_s18 + $0x1d4] ss:$28 sps:$4 sm:$0xff]   ;;  %v7434_v10 = vld [vmem:[%s8523_s18 + $0x904] ss:$28 sps:$4 sm:$0xff]  }
 0x2ec   : > { %4259 = vmatprep.subr.bf16.mxu0 %v7349_v3  ;;  %v7429_v3 = vld [vmem:[%s8523_s18 + $0x1d0] ss:$28 sps:$4 sm:$0xff]  }
 0x2ee   : > { %4342 = vmatpush1.bf16.msra.mxu1 %v7350_v12  ;;  %v7432_v12 = vld [vmem:[%s8523_s18 + $0x900] ss:$28 sps:$4 sm:$0xff]  }
 0x2ef   : > { %4260 = vmatpush1.bf16.msra.mxu0 %v7347_v26  ;;  %4343 = vmatprep.subr.bf16.mxu1 %v7358_v21  ;;  %v7437_v26 = vld [vmem:[%s8523_s18 + $0x20c] ss:$28 sps:$4 sm:$0xff]   ;;  %v7440_v21 = vld [vmem:[%s8523_s18 + $0x93c] ss:$28 sps:$4 sm:$0xff]  }
 0x2f0   : > { %4261 = vmatprep.subr.bf16.mxu0 %v7355_v16  ;;  %v7435_v16 = vld [vmem:[%s8523_s18 + $0x208] ss:$28 sps:$4 sm:$0xff]  }
 0x2f2   : > { %4344 = vmatpush1.bf16.msra.mxu1 %v7356_v25  ;;  %v7438_v25 = vld [vmem:[%s8523_s18 + $0x938] ss:$28 sps:$4 sm:$0xff]  }
 0x2f3   : > { %4262 = vmatpush1.bf16.msra.mxu0 %v7353_v24  ;;  %4345 = vmatprep.subr.bf16.mxu1 %v7364_v15  ;;  %v7443_v24 = vld [vmem:[%s8523_s18 + $0x244] ss:$28 sps:$4 sm:$0xff]   ;;  %v7446_v15 = vld [vmem:[%s8523_s18 + $0x974] ss:$28 sps:$4 sm:$0xff]  }
 0x2f4   : > { %4263 = vmatprep.subr.bf16.mxu0 %v7361_v22  ;;  %v7441_v22 = vld [vmem:[%s8523_s18 + $0x240] ss:$28 sps:$4 sm:$0xff]  }
 0x2f6   : > { %4346 = vmatpush1.bf16.msra.mxu1 %v7362_v28  ;;  %v7444_v28 = vld [vmem:[%s8523_s18 + $0x970] ss:$28 sps:$4 sm:$0xff]  }
 0x2f7   : > { %4264 = vmatpush1.bf16.msra.mxu0 %v7359_v27  ;;  %4347 = vmatprep.subr.bf16.mxu1 %v7370_v29  ;;  %v7449_v27 = vld [vmem:[%s8523_s18 + $0x27c] ss:$28 sps:$4 sm:$0xff]   ;;  %v7452_v29 = vld [vmem:[%s8523_s18 + $0x9ac] ss:$28 sps:$4 sm:$0xff]  }
 0x2f8   : > { %4265 = vmatprep.subr.bf16.mxu0 %v7367_v18  ;;  %v7447_v18 = vld [vmem:[%s8523_s18 + $0x278] ss:$28 sps:$4 sm:$0xff]  }
 0x2fa   : > { %4348 = vmatpush1.bf16.msra.mxu1 %v7368_v31  ;;  %v7450_v31 = vld [vmem:[%s8523_s18 + $0x9a8] ss:$28 sps:$4 sm:$0xff]  }
 0x2fb   : > { %4266 = vmatpush1.bf16.msra.mxu0 %v7365_v30  ;;  %4349 = vmatprep.subr.bf16.mxu1 %v7376_v13  ;;  %v7455_v30 = vld [vmem:[%s8523_s18 + $0x2b4] ss:$28 sps:$4 sm:$0xff]   ;;  %v7458_v13 = vld [vmem:[%s8523_s18 + $0x9e4] ss:$28 sps:$4 sm:$0xff]  }
 0x2fc   : > { %4267 = vmatprep.subr.bf16.mxu0 %v7373_v32  ;;  %v7453_v32 = vld [vmem:[%s8523_s18 + $0x2b0] ss:$28 sps:$4 sm:$0xff]  }
 0x2fe   : > { %4350 = vmatpush1.bf16.msra.mxu1 %v7374_v35  ;;  %v7456_v35 = vld [vmem:[%s8523_s18 + $0x9e0] ss:$28 sps:$4 sm:$0xff]  }
 0x2ff   : > { %4268 = vmatpush1.bf16.msra.mxu0 %v7371_v33  ;;  %4360 = vmatprep.subr.bf16.mxu1 %v7380_v36  ;;  %v7461_v33 = vld [vmem:[%s8523_s18 + $0x2ec] ss:$28 sps:$4 sm:$0xff]  }
 0x300   : > { %4442 = vmatprep.subr.bf16.mxu0 %v7383_v37  ;;  %v7459_v36 = vld [vmem:[%s8523_s18 + $0x2e8] ss:$28 sps:$4 sm:$0xff]   ;;  %v7464_v37 = vld [vmem:[%s8523_s18 + $0xa1c] ss:$28 sps:$4 sm:$0xff]  }
 0x301   : > { %4352 = vmatmul.mubr.bf16.vlgmr.msra.gmra.mrb[4].mxu1 %v8779_v63 }
 0x302   : > { %4270 = vmatmul.mubr.bf16.vlgmr.msra.gmra.mrb[0].mxu0 %v8884_v19  ;;  %4361 = vmatpush1.bf16.msra.mxu1 %v7378_v39  ;;  %v7467_v39 = vld [vmem:[%s8523_s18 + $0x324] ss:$28 sps:$4 sm:$0xff]  }
 0x303   : > { %4443 = vmatpush1.bf16.msra.mxu0 %v7381_v40  ;;  %4362 = vmatprep.subr.bf16.mxu1 %v7386_v42  ;;  %v7462_v40 = vld [vmem:[%s8523_s18 + $0xa18] ss:$28 sps:$4 sm:$0xff]   ;;  %v7465_v42 = vld [vmem:[%s8523_s18 + $0x320] ss:$28 sps:$4 sm:$0xff]  }
 0x304   : > { %4444 = vmatprep.subr.bf16.mxu0 %v7389_v43  ;;  %4392 = vmatprep.mubr.bf16.mxu1 %v8840_v7  ;;  %v7470_v43 = vld [vmem:[%s8523_s18 + $0xa54] ss:$28 sps:$4 sm:$0xff]  }
 0x305   : > { %4474 = vmatprep.mubr.bf16.mxu0 %v8776_v57 }
 0x306   : > { %4363 = vmatpush1.bf16.msra.mxu1 %v7384_v5  ;;  %v7473_v5 = vld [vmem:[%s8523_s18 + $0x35c] ss:$28 sps:$4 sm:$0xff]  }
 0x307   : > { %4445 = vmatpush1.bf16.msra.mxu0 %v7387_v46  ;;  %4364 = vmatprep.subr.bf16.mxu1 %v7392_v41  ;;  %v7468_v46 = vld [vmem:[%s8523_s18 + $0xa50] ss:$28 sps:$4 sm:$0xff]   ;;  %v7471_v41 = vld [vmem:[%s8523_s18 + $0x358] ss:$28 sps:$4 sm:$0xff]  }
 0x308   : > { %4446 = vmatprep.subr.bf16.mxu0 %v7395_v47  ;;  %v7476_v47 = vld [vmem:[%s8523_s18 + $0xa8c] ss:$28 sps:$4 sm:$0xff]  }
 0x30a   : > { %4365 = vmatpush1.bf16.msra.mxu1 %v7390_v49  ;;  %v7479_v49 = vld [vmem:[%s8523_s18 + $0x394] ss:$28 sps:$4 sm:$0xff]  }
 0x30b   : > { %4447 = vmatpush1.bf16.msra.mxu0 %v7393_v50  ;;  %4366 = vmatprep.subr.bf16.mxu1 %v7398_v51  ;;  %v7474_v50 = vld [vmem:[%s8523_s18 + $0xa88] ss:$28 sps:$4 sm:$0xff]   ;;  %v7477_v51 = vld [vmem:[%s8523_s18 + $0x390] ss:$28 sps:$4 sm:$0xff]  }
 0x30c   : > { %4448 = vmatprep.subr.bf16.mxu0 %v7401_v52  ;;  %v7482_v52 = vld [vmem:[%s8523_s18 + $0xac4] ss:$28 sps:$4 sm:$0xff]  }
 0x30e   : > { %4367 = vmatpush1.bf16.msra.mxu1 %v7396_v2  ;;  %v7485_v2 = vld [vmem:[%s8523_s18 + $0x3cc] ss:$28 sps:$4 sm:$0xff]  }
 0x30f   : > { %4449 = vmatpush1.bf16.msra.mxu0 %v7399_v45  ;;  %4368 = vmatprep.subr.bf16.mxu1 %v7404_v53  ;;  %v7480_v45 = vld [vmem:[%s8523_s18 + $0xac0] ss:$28 sps:$4 sm:$0xff]   ;;  %v7483_v53 = vld [vmem:[%s8523_s18 + $0x3c8] ss:$28 sps:$4 sm:$0xff]  }
 0x310   : > { %4450 = vmatprep.subr.bf16.mxu0 %v7407_v11  ;;  %v7488_v11 = vld [vmem:[%s8523_s18 + $0xafc] ss:$28 sps:$4 sm:$0xff]  }
 0x312   : > { %4369 = vmatpush1.bf16.msra.mxu1 %v7402_v55  ;;  %v7491_v55 = vld [vmem:[%s8523_s18 + $0x404] ss:$28 sps:$4 sm:$0xff]  }
 0x313   : > { %4451 = vmatpush1.bf16.msra.mxu0 %v7405_v8  ;;  %4370 = vmatprep.subr.bf16.mxu1 %v7410_v56  ;;  %v7486_v8 = vld [vmem:[%s8523_s18 + $0xaf8] ss:$28 sps:$4 sm:$0xff]   ;;  %v7489_v56 = vld [vmem:[%s8523_s18 + $0x400] ss:$28 sps:$4 sm:$0xff]  }
 0x314   : > { %4452 = vmatprep.subr.bf16.mxu0 %v7413_v9  ;;  %v7494_v9 = vld [vmem:[%s8523_s18 + $0xb34] ss:$28 sps:$4 sm:$0xff]  }
 0x316   : > { %4371 = vmatpush1.bf16.msra.mxu1 %v7408_v58  ;;  %v7497_v58 = vld [vmem:[%s8523_s18 + $0x43c] ss:$28 sps:$4 sm:$0xff]  }
 0x317   : > { %4453 = vmatpush1.bf16.msra.mxu0 %v7411_v20  ;;  %4372 = vmatprep.subr.bf16.mxu1 %v7416_v48  ;;  %v7492_v20 = vld [vmem:[%s8523_s18 + $0xb30] ss:$28 sps:$4 sm:$0xff]   ;;  %v7495_v48 = vld [vmem:[%s8523_s18 + $0x438] ss:$28 sps:$4 sm:$0xff]  }
 0x318   : > { %4454 = vmatprep.subr.bf16.mxu0 %v7419_v62  ;;  %v7500_v62 = vld [vmem:[%s8523_s18 + $0xb6c] ss:$28 sps:$4 sm:$0xff]  }
 0x31a   : > { %4373 = vmatpush1.bf16.msra.mxu1 %v7414_v17  ;;  %v7503_v17 = vld [vmem:[%s8523_s18 + $0x474] ss:$28 sps:$4 sm:$0xff]  }
 0x31b   : > { %4455 = vmatpush1.bf16.msra.mxu0 %v7417_v54  ;;  %4374 = vmatprep.subr.bf16.mxu1 %v7422_v60  ;;  %v7498_v54 = vld [vmem:[%s8523_s18 + $0xb68] ss:$28 sps:$4 sm:$0xff]   ;;  %v7501_v60 = vld [vmem:[%s8523_s18 + $0x470] ss:$28 sps:$4 sm:$0xff]  }
 0x31c   : > { %4456 = vmatprep.subr.bf16.mxu0 %v7425_v14  ;;  %v7506_v14 = vld [vmem:[%s8523_s18 + $0xba4] ss:$28 sps:$4 sm:$0xff]  }
 0x31e   : > { %4375 = vmatpush1.bf16.msra.mxu1 %v7420_v61  ;;  %v7509_v61 = vld [vmem:[%s8523_s18 + $0x4ac] ss:$28 sps:$4 sm:$0xff]  }
 0x31f   : > { %4457 = vmatpush1.bf16.msra.mxu0 %v7423_v0  ;;  %4376 = vmatprep.subr.bf16.mxu1 %v7428_v6  ;;  %v7504_v0 = vld [vmem:[%s8523_s18 + $0xba0] ss:$28 sps:$4 sm:$0xff]   ;;  %v7507_v6 = vld [vmem:[%s8523_s18 + $0x4a8] ss:$28 sps:$4 sm:$0xff]  }
 0x320   : > { %4458 = vmatprep.subr.bf16.mxu0 %v7431_v4  ;;  %v7512_v4 = vld [vmem:[%s8523_s18 + $0xbdc] ss:$28 sps:$4 sm:$0xff]  }
 0x322   : > { %4377 = vmatpush1.bf16.msra.mxu1 %v7426_v1  ;;  %v7515_v1 = vld [vmem:[%s8523_s18 + $0x4e4] ss:$28 sps:$4 sm:$0xff]  }
 0x323   : > { %4459 = vmatpush1.bf16.msra.mxu0 %v7429_v3  ;;  %4378 = vmatprep.subr.bf16.mxu1 %v7434_v10  ;;  %v7510_v10 = vld [vmem:[%s8523_s18 + $0xbd8] ss:$28 sps:$4 sm:$0xff]  }
 0x324   : > { %4460 = vmatprep.subr.bf16.mxu0 %v7437_v26  ;;  %v7513_v26 = vld [vmem:[%s8523_s18 + $0x4e0] ss:$28 sps:$4 sm:$0xff]  }
 0x326   : > { %4379 = vmatpush1.bf16.msra.mxu1 %v7432_v12 }
 0x327   : > { %4461 = vmatpush1.bf16.msra.mxu0 %v7435_v16  ;;  %4380 = vmatprep.subr.bf16.mxu1 %v7440_v21  ;;  %v7518_v21 = vld [vmem:[%s8523_s18 + $0xc14] ss:$28 sps:$4 sm:$0xff]  }
 0x328   : > { %4462 = vmatprep.subr.bf16.mxu0 %v7443_v24 }
 0x32a   : > { %4381 = vmatpush1.bf16.msra.mxu1 %v7438_v25  ;;  %v7521_v25 = vld [vmem:[%s8523_s18 + $0x51c] ss:$28 sps:$4 sm:$0xff]  }
 0x32b   : > { %4463 = vmatpush1.bf16.msra.mxu0 %v7441_v22  ;;  %4382 = vmatprep.subr.bf16.mxu1 %v7446_v15  ;;  %v7516_v22 = vld [vmem:[%s8523_s18 + $0xc10] ss:$28 sps:$4 sm:$0xff]   ;;  %v7519_v15 = vld [vmem:[%s8523_s18 + $0x518] ss:$28 sps:$4 sm:$0xff]  }
 0x32c   : > { %4464 = vmatprep.subr.bf16.mxu0 %v7449_v27  ;;  %v7524_v27 = vld [vmem:[%s8523_s18 + $0xc4c] ss:$28 sps:$4 sm:$0xff]  }
 0x32e   : > { %4383 = vmatpush1.bf16.msra.mxu1 %v7444_v28  ;;  %v7527_v28 = vld [vmem:[%s8523_s18 + $0x554] ss:$28 sps:$4 sm:$0xff]  }
 0x32f   : > { %4465 = vmatpush1.bf16.msra.mxu0 %v7447_v18  ;;  %4384 = vmatprep.subr.bf16.mxu1 %v7452_v29  ;;  %v7522_v18 = vld [vmem:[%s8523_s18 + $0xc48] ss:$28 sps:$4 sm:$0xff]   ;;  %v7525_v29 = vld [vmem:[%s8523_s18 + $0x550] ss:$28 sps:$4 sm:$0xff]  }
 0x330   : > { %4466 = vmatprep.subr.bf16.mxu0 %v7455_v30  ;;  %v7530_v30 = vld [vmem:[%s8523_s18 + $0xc84] ss:$28 sps:$4 sm:$0xff]  }
 0x332   : > { %4385 = vmatpush1.bf16.msra.mxu1 %v7450_v31  ;;  %v7533_v31 = vld [vmem:[%s8523_s18 + $0x58c] ss:$28 sps:$4 sm:$0xff]  }
 0x333   : > { %4467 = vmatpush1.bf16.msra.mxu0 %v7453_v32  ;;  %4386 = vmatprep.subr.bf16.mxu1 %v7458_v13  ;;  %v7528_v32 = vld [vmem:[%s8523_s18 + $0xc80] ss:$28 sps:$4 sm:$0xff]   ;;  %v7531_v13 = vld [vmem:[%s8523_s18 + $0x588] ss:$28 sps:$4 sm:$0xff]  }
 0x334   : > { %4468 = vmatprep.subr.bf16.mxu0 %v7461_v33  ;;  %v7536_v33 = vld [vmem:[%s8523_s18 + $0xcbc] ss:$28 sps:$4 sm:$0xff]  }
 0x336   : > { %4387 = vmatpush1.bf16.msra.mxu1 %v7456_v35  ;;  %v7539_v35 = vld [vmem:[%s8523_s18 + $0x5c4] ss:$28 sps:$4 sm:$0xff]  }
 0x337   : > { %4469 = vmatpush1.bf16.msra.mxu0 %v7459_v36  ;;  %4388 = vmatprep.subr.bf16.mxu1 %v7464_v37  ;;  %v7534_v36 = vld [vmem:[%s8523_s18 + $0xcb8] ss:$28 sps:$4 sm:$0xff]   ;;  %v7537_v37 = vld [vmem:[%s8523_s18 + $0x5c0] ss:$28 sps:$4 sm:$0xff]  }
 0x338   : > { %4470 = vmatprep.subr.bf16.mxu0 %v7467_v39  ;;  %v7542_v39 = vld [vmem:[%s8523_s18 + $0xcf4] ss:$28 sps:$4 sm:$0xff]  }
 0x33a   : > { %4389 = vmatpush1.bf16.msra.mxu1 %v7462_v40  ;;  %v7545_v40 = vld [vmem:[%s8523_s18 + $0x5fc] ss:$28 sps:$4 sm:$0xff]  }
 0x33b   : > { %4471 = vmatpush1.bf16.msra.mxu0 %v7465_v42  ;;  %4390 = vmatprep.subr.bf16.mxu1 %v7470_v43  ;;  %v7540_v42 = vld [vmem:[%s8523_s18 + $0xcf0] ss:$28 sps:$4 sm:$0xff]   ;;  %v7543_v43 = vld [vmem:[%s8523_s18 + $0x5f8] ss:$28 sps:$4 sm:$0xff]  }
 0x33c   : > { %4472 = vmatprep.subr.bf16.mxu0 %v7473_v5  ;;  %v7548_v5 = vld [vmem:[%s8523_s18 + $0xd2c] ss:$28 sps:$4 sm:$0xff]  }
 0x33e   : > { %4391 = vmatpush1.bf16.msra.mxu1 %v7468_v46  ;;  %v7551_v46 = vld [vmem:[%s8523_s18 + $0x634] ss:$28 sps:$4 sm:$0xff]  }
 0x33f   : > { %4473 = vmatpush1.bf16.msra.mxu0 %v7471_v41  ;;  %4401 = vmatprep.subr.bf16.mxu1 %v7476_v47  ;;  %v7546_v41 = vld [vmem:[%s8523_s18 + $0xd28] ss:$28 sps:$4 sm:$0xff]   ;;  %v7549_v47 = vld [vmem:[%s8523_s18 + $0x630] ss:$28 sps:$4 sm:$0xff]  }
 0x340   : > { %4483 = vmatprep.subr.bf16.mxu0 %v7479_v49  ;;  %v7554_v49 = vld [vmem:[%s8523_s18 + $0xd64] ss:$28 sps:$4 sm:$0xff]  }
 0x341   : > { %4393 = vmatmul.mubr.bf16.vlgmr.msra.gmra.mrb[4].mxu1 %v8834_v34 }
 0x342   : > { %4475 = vmatmul.mubr.bf16.vlgmr.msra.gmra.mrb[4].mxu0 %v8769_v44  ;;  %4402 = vmatpush1.bf16.msra.mxu1 %v7474_v50  ;;  %v7557_v50 = vld [vmem:[%s8523_s18 + $0x66c] ss:$28 sps:$4 sm:$0xff]  }
 0x343   : > { %4484 = vmatpush1.bf16.msra.mxu0 %v7477_v51  ;;  %4403 = vmatprep.subr.bf16.mxu1 %v7482_v52  ;;  %v7552_v51 = vld [vmem:[%s8523_s18 + $0xd60] ss:$28 sps:$4 sm:$0xff]   ;;  %v7555_v52 = vld [vmem:[%s8523_s18 + $0x668] ss:$28 sps:$4 sm:$0xff]  }
 0x344   : > { %4485 = vmatprep.subr.bf16.mxu0 %v7485_v2  ;;  %4433 = vmatprep.mubr.bf16.mxu1 %v8892_v23  ;;  %v7560_v2 = vld [vmem:[%s8523_s18 + $0xd9c] ss:$28 sps:$4 sm:$0xff]  }
 0x345   : > { %4515 = vmatprep.mubr.bf16.mxu0 %v8785_v59 }
 0x346   : > { %4404 = vmatpush1.bf16.msra.mxu1 %v7480_v45  ;;  %v7563_v45 = vld [vmem:[%s8523_s18 + $0x6a4] ss:$28 sps:$4 sm:$0xff]  }
 0x347   : > { %4486 = vmatpush1.bf16.msra.mxu0 %v7483_v53  ;;  %4405 = vmatprep.subr.bf16.mxu1 %v7488_v11  ;;  %v7558_v53 = vld [vmem:[%s8523_s18 + $0xd98] ss:$28 sps:$4 sm:$0xff]   ;;  %v7561_v11 = vld [vmem:[%s8523_s18 + $0x6a0] ss:$28 sps:$4 sm:$0xff]  }
 0x348   : > { %4487 = vmatprep.subr.bf16.mxu0 %v7491_v55  ;;  %v7566_v55 = vld [vmem:[%s8523_s18 + $0xdd4] ss:$28 sps:$4 sm:$0xff]  }
 0x34a   : > { %4406 = vmatpush1.bf16.msra.mxu1 %v7486_v8  ;;  %v7569_v8 = vld [vmem:[%s8523_s18 + $0x6dc] ss:$28 sps:$4 sm:$0xff]  }
 0x34b   : > { %4488 = vmatpush1.bf16.msra.mxu0 %v7489_v56  ;;  %4407 = vmatprep.subr.bf16.mxu1 %v7494_v9  ;;  %v7564_v56 = vld [vmem:[%s8523_s18 + $0xdd0] ss:$28 sps:$4 sm:$0xff]   ;;  %v7567_v9 = vld [vmem:[%s8523_s18 + $0x6d8] ss:$28 sps:$4 sm:$0xff]  }
 0x34c   : > { %4489 = vmatprep.subr.bf16.mxu0 %v7497_v58  ;;  %v7572_v58 = vld [vmem:[%s8523_s18 + $0x714] ss:$28 sps:$4 sm:$0xff]  }
 0x34e   : > { %4408 = vmatpush1.bf16.msra.mxu1 %v7492_v20  ;;  %v7573_v20 = vld [vmem:[%s8523_s18 + $0x1d8] ss:$28 sps:$4 sm:$0xff]  }
 0x34f   : > { %4490 = vmatpush1.bf16.msra.mxu0 %v7495_v48  ;;  %4409 = vmatprep.subr.bf16.mxu1 %v7500_v62  ;;  %v7570_v48 = vld [vmem:[%s8523_s18 + $0x710] ss:$28 sps:$4 sm:$0xff]   ;;  %v7574_v62 = vld [vmem:[%s8523_s18 + $0x18] ss:$28 sps:$4 sm:$0xff]  }
 0x350   : > { %4491 = vmatprep.subr.bf16.mxu0 %v7503_v17  ;;  %v7577_v17 = vld [vmem:[%s8523_s18 + $0x74c] ss:$28 sps:$4 sm:$0xff]  }
 0x352   : > { %4410 = vmatpush1.bf16.msra.mxu1 %v7498_v54  ;;  %v7578_v54 = vld [vmem:[%s8523_s18 + $0x210] ss:$28 sps:$4 sm:$0xff]  }
 0x353   : > { %4492 = vmatpush1.bf16.msra.mxu0 %v7501_v60  ;;  %4411 = vmatprep.subr.bf16.mxu1 %v7506_v14  ;;  %v7575_v60 = vld [vmem:[%s8523_s18 + $0x748] ss:$28 sps:$4 sm:$0xff]   ;;  %v7579_v14 = vld [vmem:[%s8523_s18 + $0x50] ss:$28 sps:$4 sm:$0xff]  }
 0x354   : > { %4493 = vmatprep.subr.bf16.mxu0 %v7509_v61  ;;  %v9054_v3 = vpop.f32.mrb[0].mxu1  ;;  %v7582_v61 = vld [vmem:[%s8523_s18 + $0x784] ss:$28 sps:$4 sm:$0xff]  }
 0x355   : > { %v9058_v12 = vpop.f32.mrb[1].mxu1 }
 0x356   : > { %v4152_v16 = vpop.f32.mrb[2].mxu1  ;;  %4412 = vmatpush1.bf16.msra.mxu1 %v7504_v0  ;;  %v7583_v0 = vld [vmem:[%s8523_s18 + $0x248] ss:$28 sps:$4 sm:$0xff]  }
 0x357   : > { %4494 = vmatpush1.bf16.msra.mxu0 %v7507_v6  ;;  %v4153_v24 = vpop.f32.mrb[3].mxu1  ;;  %4413 = vmatprep.subr.bf16.mxu1 %v7512_v4  ;;  %v7580_v6 = vld [vmem:[%s8523_s18 + $0x780] ss:$28 sps:$4 sm:$0xff]   ;;  %v7584_v4 = vld [vmem:[%s8523_s18 + $0x88] ss:$28 sps:$4 sm:$0xff]  }
 0x358   : > { %4495 = vmatprep.subr.bf16.mxu0 %v7515_v1  ;;  %v7587_v1 = vld [vmem:[%s8523_s18 + $0x7bc] ss:$28 sps:$4 sm:$0xff]   ;;  %v7592_v16 = vld [vmem:[%s8523_s18 + $0x7f4] ss:$28 sps:$4 sm:$0xff]  }
 0x359   : > { %v7590_v24 = vld [vmem:[%s8523_s18 + $0x7f0] ss:$28 sps:$4 sm:$0xff]  }
 0x35a   : > { %4414 = vmatpush1.bf16.msra.mxu1 %v7510_v10  ;;  %v7588_v10 = vld [vmem:[%s8523_s18 + $0x280] ss:$28 sps:$4 sm:$0xff]  }
 0x35b   : > { %4496 = vmatpush1.bf16.msra.mxu0 %v7513_v26  ;;  %4415 = vmatprep.subr.bf16.mxu1 %v7518_v21  ;;  %v7585_v26 = vld [vmem:[%s8523_s18 + $0x7b8] ss:$28 sps:$4 sm:$0xff]  }
 0x35c   : > { %4497 = vmatprep.subr.bf16.mxu0 %v7521_v25  ;;  %v7593_v21 = vld [vmem:[%s8523_s18 + $0x2b8] ss:$28 sps:$4 sm:$0xff]  }
 0x35d   : > { %v7594_v25 = vld [vmem:[%s8523_s18 + $0xf8] ss:$28 sps:$4 sm:$0xff]  }
 0x35e   : > { %4416 = vmatpush1.bf16.msra.mxu1 %v7516_v22  ;;  %v7597_v22 = vld [vmem:[%s8523_s18 + $0x82c] ss:$28 sps:$4 sm:$0xff]  }
 0x35f   : > { %4498 = vmatpush1.bf16.msra.mxu0 %v7519_v15  ;;  %4417 = vmatprep.subr.bf16.mxu1 %v7524_v27  ;;  %v7598_v15 = vld [vmem:[%s8523_s18 + $0x2f0] ss:$28 sps:$4 sm:$0xff]   ;;  %v7595_v27 = vld [vmem:[%s8523_s18 + $0x828] ss:$28 sps:$4 sm:$0xff]  }
 0x360   : > { %4499 = vmatprep.subr.bf16.mxu0 %v7527_v28  ;;  %v7599_v28 = vld [vmem:[%s8523_s18 + $0x130] ss:$28 sps:$4 sm:$0xff]  }
 0x362   : > { %4418 = vmatpush1.bf16.msra.mxu1 %v7522_v18  ;;  %v7602_v18 = vld [vmem:[%s8523_s18 + $0x864] ss:$28 sps:$4 sm:$0xff]  }
 0x363   : > { %4500 = vmatpush1.bf16.msra.mxu0 %v7525_v29  ;;  %4419 = vmatprep.subr.bf16.mxu1 %v7530_v30  ;;  %v7603_v29 = vld [vmem:[%s8523_s18 + $0x328] ss:$28 sps:$4 sm:$0xff]   ;;  %v7600_v30 = vld [vmem:[%s8523_s18 + $0x860] ss:$28 sps:$4 sm:$0xff]  }
 0x364   : > { %4501 = vmatprep.subr.bf16.mxu0 %v7533_v31  ;;  %v7604_v31 = vld [vmem:[%s8523_s18 + $0x168] ss:$28 sps:$4 sm:$0xff]  }
 0x366   : > { %4420 = vmatpush1.bf16.msra.mxu1 %v7528_v32  ;;  %v7607_v32 = vld [vmem:[%s8523_s18 + $0x89c] ss:$28 sps:$4 sm:$0xff]  }
 0x367   : > { %4502 = vmatpush1.bf16.msra.mxu0 %v7531_v13  ;;  %4421 = vmatprep.subr.bf16.mxu1 %v7536_v33  ;;  %v7608_v13 = vld [vmem:[%s8523_s18 + $0x360] ss:$28 sps:$4 sm:$0xff]   ;;  %v7605_v33 = vld [vmem:[%s8523_s18 + $0x898] ss:$28 sps:$4 sm:$0xff]  }
 0x368   : > { %4503 = vmatprep.subr.bf16.mxu0 %v7539_v35  ;;  %v7609_v35 = vld [vmem:[%s8523_s18 + $0x1a0] ss:$28 sps:$4 sm:$0xff]  }
 0x36a   : > { %4422 = vmatpush1.bf16.msra.mxu1 %v7534_v36  ;;  %v7612_v36 = vld [vmem:[%s8523_s18 + $0x8d4] ss:$28 sps:$4 sm:$0xff]  }
 0x36b   : > { %4504 = vmatpush1.bf16.msra.mxu0 %v7537_v37  ;;  %4423 = vmatprep.subr.bf16.mxu1 %v7542_v39  ;;  %v7613_v37 = vld [vmem:[%s8523_s18 + $0x558] ss:$28 sps:$4 sm:$0xff]   ;;  %v7610_v39 = vld [vmem:[%s8523_s18 + $0x8d0] ss:$28 sps:$4 sm:$0xff]  }
 0x36c   : > { %4505 = vmatprep.subr.bf16.mxu0 %v7545_v40  ;;  %v7614_v40 = vld [vmem:[%s8523_s18 + $0x398] ss:$28 sps:$4 sm:$0xff]  }
 0x36e   : > { %4424 = vmatpush1.bf16.msra.mxu1 %v7540_v42  ;;  %v7617_v42 = vld [vmem:[%s8523_s18 + $0x90c] ss:$28 sps:$4 sm:$0xff]  }
 0x36f   : > { %4506 = vmatpush1.bf16.msra.mxu0 %v7543_v43  ;;  %4425 = vmatprep.subr.bf16.mxu1 %v7548_v5  ;;  %v7618_v43 = vld [vmem:[%s8523_s18 + $0x590] ss:$28 sps:$4 sm:$0xff]   ;;  %v7615_v5 = vld [vmem:[%s8523_s18 + $0x908] ss:$28 sps:$4 sm:$0xff]  }
 0x370   : > { %4507 = vmatprep.subr.bf16.mxu0 %v7551_v46  ;;  %v7619_v46 = vld [vmem:[%s8523_s18 + $0x3d0] ss:$28 sps:$4 sm:$0xff]  }
 0x372   : > { %4426 = vmatpush1.bf16.msra.mxu1 %v7546_v41  ;;  %v7622_v41 = vld [vmem:[%s8523_s18 + $0x944] ss:$28 sps:$4 sm:$0xff]  }
 0x373   : > { %4508 = vmatpush1.bf16.msra.mxu0 %v7549_v47  ;;  %4427 = vmatprep.subr.bf16.mxu1 %v7554_v49  ;;  %v7623_v47 = vld [vmem:[%s8523_s18 + $0x5c8] ss:$28 sps:$4 sm:$0xff]   ;;  %v7620_v49 = vld [vmem:[%s8523_s18 + $0x940] ss:$28 sps:$4 sm:$0xff]  }
 0x374   : > { %4509 = vmatprep.subr.bf16.mxu0 %v7557_v50  ;;  %v7627_v50 = vld [vmem:[%s8523_s18 + $0x97c] ss:$28 sps:$4 sm:$0xff]  }
 0x376   : > { %4428 = vmatpush1.bf16.msra.mxu1 %v7552_v51  ;;  %v7628_v51 = vld [vmem:[%s8523_s18 + $0x600] ss:$28 sps:$4 sm:$0xff]  }
 0x377   : > { %4510 = vmatpush1.bf16.msra.mxu0 %v7555_v52  ;;  %4429 = vmatprep.subr.bf16.mxu1 %v7560_v2  ;;  %v7625_v52 = vld [vmem:[%s8523_s18 + $0x978] ss:$28 sps:$4 sm:$0xff]   ;;  %v7629_v2 = vld [vmem:[%s8523_s18 + $0x440] ss:$28 sps:$4 sm:$0xff]  }
 0x378   : > { %4511 = vmatprep.subr.bf16.mxu0 %v7563_v45  ;;  %v7633_v45 = vld [vmem:[%s8523_s18 + $0x638] ss:$28 sps:$4 sm:$0xff]  }
 0x37a   : > { %4430 = vmatpush1.bf16.msra.mxu1 %v7558_v53  ;;  %v7630_v53 = vld [vmem:[%s8523_s18 + $0x9b0] ss:$28 sps:$4 sm:$0xff]  }
 0x37b   : > { %4512 = vmatpush1.bf16.msra.mxu0 %v7561_v11  ;;  %4431 = vmatprep.subr.bf16.mxu1 %v7566_v55  ;;  %v7634_v11 = vld [vmem:[%s8523_s18 + $0x478] ss:$28 sps:$4 sm:$0xff]   ;;  %v7637_v55 = vld [vmem:[%s8523_s18 + $0x9ec] ss:$28 sps:$4 sm:$0xff]  }
 0x37c   : > { %4513 = vmatprep.subr.bf16.mxu0 %v7569_v8  ;;  %v7638_v8 = vld [vmem:[%s8523_s18 + $0x670] ss:$28 sps:$4 sm:$0xff]  }
 0x37e   : > { %4432 = vmatpush1.bf16.msra.mxu1 %v7564_v56  ;;  %v7635_v56 = vld [vmem:[%s8523_s18 + $0x9e8] ss:$28 sps:$4 sm:$0xff]  }
 0x37f   : > { %4514 = vmatpush1.bf16.msra.mxu0 %v7567_v9  ;;  %6722 = vmatprep.subr.bf16.mxu1 %v7573_v20  ;;  %v7639_v9 = vld [vmem:[%s8523_s18 + $0x4b0] ss:$28 sps:$4 sm:$0xff]   ;;  %v7643_v20 = vld [vmem:[%s8523_s18 + $0x6a8] ss:$28 sps:$4 sm:$0xff]  }
 0x380   : > { %4524 = vmatprep.subr.bf16.mxu0 %v7572_v58  ;;  %v7642_v58 = vld [vmem:[%s8523_s18 + $0xa24] ss:$28 sps:$4 sm:$0xff]  }
 0x381   : > { %4434 = vmatmul.mubr.bf16.vlgmr.msra.gmra.mrb[4].mxu1 %v8884_v19 }
 0x382   : > { %4516 = vmatmul.mubr.bf16.vlgmr.msra.gmra.mrb[4].mxu0 %v8779_v63  ;;  %6723 = vmatpush3.bf16.msra.mxu1 %v7574_v62  ;;  %v7644_v62 = vld [vmem:[%s8523_s18 + $0x4e8] ss:$28 sps:$4 sm:$0xff]  }
 0x383   : > { %4525 = vmatpush1.bf16.msra.mxu0 %v7570_v48  ;;  %6724 = vmatprep.subr.bf16.mxu1 %v7578_v54  ;;  %v7640_v48 = vld [vmem:[%s8523_s18 + $0xa20] ss:$28 sps:$4 sm:$0xff]  }
 0x384   : > { %4526 = vmatprep.subr.bf16.mxu0 %v7577_v17  ;;  %4638 = vmatprep.mubr.bf16.mxu1 %v8776_v57  ;;  %v7589_v57 = vld [vmem:[%s8523_s18 + $0xc0] ss:$28 sps:$4 sm:$0xff]  }
 0x385   : > { %4556 = vmatprep.mubr.bf16.mxu0 %v8840_v7  ;;  %v7647_v17 = vld [vmem:[%s8523_s18 + $0xa5c] ss:$28 sps:$4 sm:$0xff]  }
 0x386   : > { %6725 = vmatpush3.bf16.msra.mxu1 %v7579_v14  ;;  %v7648_v54 = vld [vmem:[%s8523_s18 + $0x6e0] ss:$28 sps:$4 sm:$0xff]  }
 0x387   : > { %4527 = vmatpush1.bf16.msra.mxu0 %v7575_v60  ;;  %6726 = vmatprep.subr.bf16.mxu1 %v7583_v0  ;;  %v7645_v60 = vld [vmem:[%s8523_s18 + $0xa58] ss:$28 sps:$4 sm:$0xff]   ;;  %v7649_v14 = vld [vmem:[%s8523_s18 + $0x520] ss:$28 sps:$4 sm:$0xff]  }
 0x388   : > { %4528 = vmatprep.subr.bf16.mxu0 %v7582_v61  ;;  %v7652_v61 = vld [vmem:[%s8523_s18 + $0xa94] ss:$28 sps:$4 sm:$0xff]  }
 0x389   : > { %v7653_v0 = vld [vmem:[%s8523_s18 + $0x8d8] ss:$28 sps:$4 sm:$0xff]  }
 0x38a   : > { %6727 = vmatpush3.bf16.msra.mxu1 %v7584_v4  ;;  %v7654_v4 = vld [vmem:[%s8523_s18 + $0x718] ss:$28 sps:$4 sm:$0xff]  }
 0x38b   : > { %4529 = vmatpush1.bf16.msra.mxu0 %v7580_v6  ;;  %6728 = vmatprep.subr.bf16.mxu1 %v7588_v10  ;;  %v7650_v6 = vld [vmem:[%s8523_s18 + $0xa90] ss:$28 sps:$4 sm:$0xff]  }
 0x38c   : > { %4530 = vmatprep.subr.bf16.mxu0 %v7587_v1  ;;  %v7657_v1 = vld [vmem:[%s8523_s18 + $0xacc] ss:$28 sps:$4 sm:$0xff]  }
 0x38d   : > { %v7658_v10 = vld [vmem:[%s8523_s18 + $0x910] ss:$28 sps:$4 sm:$0xff]  }
 0x38e   : > { %6729 = vmatpush3.bf16.msra.mxu1 %v7589_v57  ;;  %v7659_v57 = vld [vmem:[%s8523_s18 + $0x750] ss:$28 sps:$4 sm:$0xff]  }
 0x38f   : > { %4531 = vmatpush1.bf16.msra.mxu0 %v7585_v26  ;;  %6730 = vmatprep.subr.bf16.mxu1 %v7593_v21  ;;  %v7655_v26 = vld [vmem:[%s8523_s18 + $0xac8] ss:$28 sps:$4 sm:$0xff]  }
 0x390   : > { %4532 = vmatprep.subr.bf16.mxu0 %v7592_v16  ;;  %v7662_v16 = vld [vmem:[%s8523_s18 + $0xb04] ss:$28 sps:$4 sm:$0xff]  }
 0x391   : > { %v7663_v21 = vld [vmem:[%s8523_s18 + $0x948] ss:$28 sps:$4 sm:$0xff]  }
 0x392   : > { %6731 = vmatpush3.bf16.msra.mxu1 %v7594_v25  ;;  %v7667_v25 = vld [vmem:[%s8523_s18 + $0xb3c] ss:$28 sps:$4 sm:$0xff]  }
 0x393   : > { %4533 = vmatpush1.bf16.msra.mxu0 %v7590_v24  ;;  %6732 = vmatprep.subr.bf16.mxu1 %v7598_v15  ;;  %v7664_v24 = vld [vmem:[%s8523_s18 + $0x788] ss:$28 sps:$4 sm:$0xff]   ;;  %v7665_v15 = vld [vmem:[%s8523_s18 + $0xb38] ss:$28 sps:$4 sm:$0xff]  }
 0x394   : > { %4534 = vmatprep.subr.bf16.mxu0 %v7597_v22  ;;  %v7668_v22 = vld [vmem:[%s8523_s18 + $0x980] ss:$28 sps:$4 sm:$0xff]  }
 0x396   : > { %6733 = vmatpush3.bf16.msra.mxu1 %v7599_v28  ;;  %v7672_v28 = vld [vmem:[%s8523_s18 + $0xb74] ss:$28 sps:$4 sm:$0xff]  }
 0x397   : > { %4535 = vmatpush1.bf16.msra.mxu0 %v7595_v27  ;;  %6734 = vmatprep.subr.bf16.mxu1 %v7603_v29  ;;  %v9187_v27 = vsub.s32 0, %v8755_v38  ;;  %v9192_v29 = vld [vmem:[%s8529_s20] ss:$4 sm:$0xff] }
 0x398   : > { %4536 = vmatprep.subr.bf16.mxu0 %v7602_v18  ;;  %v7673_v18 = vld [vmem:[%s8523_s18 + $0x9b8] ss:$28 sps:$4 sm:$0xff]  }
 0x39a   : > { %6735 = vmatpush3.bf16.msra.mxu1 %v7604_v31  ;;  %v7670_v31 = vld [vmem:[%s8523_s18 + $0xb70] ss:$28 sps:$4 sm:$0xff]  }
 0x39b   : > { %4537 = vmatpush1.bf16.msra.mxu0 %v7600_v30  ;;  %6736 = vmatprep.subr.bf16.mxu1 %v7608_v13  ;;  %v9195_v30 = vsub.s32 1, %v8755_v38  ;;  %v1734_v13 = vrot.slane %v9192_v29, %v9187_v27 }
 0x39c   : > { %4538 = vmatprep.subr.bf16.mxu0 %v7607_v32  ;;  %v7674_v32 = vld [vmem:[%s8523_s18 + $0x7f8] ss:$28 sps:$4 sm:$0xff]  }
 0x39e   : > { %6737 = vmatpush3.bf16.msra.mxu1 %v7609_v35  ;;  %v7678_v35 = vld [vmem:[%s8523_s18 + $0x9f0] ss:$28 sps:$4 sm:$0xff]  }
 0x39f   : > { %4539 = vmatpush1.bf16.msra.mxu0 %v7605_v33  ;;  %6744 = vmatprep.subr.bf16.mxu1 %v7613_v37  ;;  %v7677_v33 = vld [vmem:[%s8523_s18 + $0xbac] ss:$28 sps:$4 sm:$0xff]  }
 0x3a0   : > { %4540 = vmatprep.subr.bf16.mxu0 %v7612_v36  ;;  %v1738_v36 = vrot.slane %v9192_v29, %v9195_v30  ;;  %v7675_v37 = vld [vmem:[%s8523_s18 + $0xba8] ss:$28 sps:$4 sm:$0xff]  }
 0x3a1   : > { %4639 = vmatmul.mubr.bf16.vlgmr.msra.gmra.mrb[8].mxu1 %v8769_v44  ;;  %v7624_v44 = vld [vmem:[%s8523_s18 + $0x408] ss:$28 sps:$4 sm:$0xff]  }
 0x3a2   : > { %6745 = vmatpush3.bf16.msra.mxu1 %v7614_v40  ;;  %4678 = vmatprep.mubr.bf16.mxu1 %v8785_v59  ;;  %v7632_v59 = vld [vmem:[%s8523_s18 + $0x9b4] ss:$28 sps:$4 sm:$0xff]   ;;  %v4149_v40 = vadd.f32 %v9054_v3, %v1734_v13  ;;  %v7684_v3 = vld [vmem:[%s8523_s18 + $0x868] ss:$28 sps:$4 sm:$0xff]  }
 0x3a3   : > { %4541 = vmatpush1.bf16.msra.mxu0 %v7610_v39  ;;  %6746 = vmatprep.subr.bf16.mxu1 %v7618_v43  ;;  %v7679_v39 = vld [vmem:[%s8523_s18 + $0x830] ss:$28 sps:$4 sm:$0xff]   ;;  %v7683_v43 = vld [vmem:[%s8523_s18 + $0xa28] ss:$28 sps:$4 sm:$0xff]  }
 0x3a4   : > { %4542 = vmatprep.subr.bf16.mxu0 %v7617_v42  ;;  %v7682_v42 = vld [vmem:[%s8523_s18 + $0xbe4] ss:$28 sps:$4 sm:$0xff]  }
 0x3a6   : > { %6747 = vmatpush3.bf16.msra.mxu1 %v7619_v46 }
 0x3a7   : > { %4543 = vmatpush1.bf16.msra.mxu0 %v7615_v5  ;;  %6748 = vmatprep.subr.bf16.mxu1 %v7623_v47  ;;  %v4151_v5 = vadd.f32 %v9058_v12, %v1738_v36  ;;  %v7687_v12 = vld [vmem:[%s8523_s18 + $0xc1c] ss:$28 sps:$4 sm:$0xff]  }
 0x3a8   : > { %4544 = vmatprep.subr.bf16.mxu0 %v7622_v41  ;;  %v7713_v36 = vld [vmem:[%s8523_s18 + $0xd38] ss:$28 sps:$4 sm:$0xff]  }
 0x3aa   : > { %6749 = vmatpush3.bf16.msra.mxu1 %v7624_v44 }
 0x3ab   : > { %4545 = vmatpush1.bf16.msra.mxu0 %v7620_v49  ;;  %6750 = vmatprep.subr.bf16.mxu1 %v7628_v51 }
 0x3ac   : > { %4546 = vmatprep.subr.bf16.mxu0 %v7627_v50  ;;  %v7680_v50 = vld [vmem:[%s8523_s18 + $0xbe0] ss:$28 sps:$4 sm:$0xff]  }
 0x3ae   : > { %6751 = vmatpush3.bf16.msra.mxu1 %v7629_v2  ;;  %v7688_v2 = vld [vmem:[%s8523_s18 + $0xa60] ss:$28 sps:$4 sm:$0xff]  }
 0x3af   : > { %4547 = vmatpush1.bf16.msra.mxu0 %v7625_v52  ;;  %6752 = vmatprep.subr.bf16.mxu1 %v7633_v45 }
 0x3b0   : > { %4548 = vmatprep.subr.bf16.mxu0 %v7632_v59 }
 0x3b2   : > { %6753 = vmatpush3.bf16.msra.mxu1 %v7634_v11 }
 0x3b3   : > { %4549 = vmatpush1.bf16.msra.mxu0 %v7630_v53  ;;  %6754 = vmatprep.subr.bf16.mxu1 %v7638_v8  ;;  %v7689_v8 = vld [vmem:[%s8523_s18 + $0x8a0] ss:$28 sps:$4 sm:$0xff]  }
 0x3b4   : > { %4550 = vmatprep.subr.bf16.mxu0 %v7637_v55  ;;  %v7685_v55 = vld [vmem:[%s8523_s18 + $0xc18] ss:$28 sps:$4 sm:$0xff]  }
 0x3b6   : > { %6755 = vmatpush3.bf16.msra.mxu1 %v7639_v9  ;;  %v7692_v9 = vld [vmem:[%s8523_s18 + $0xc54] ss:$28 sps:$4 sm:$0xff]  }
 0x3b7   : > { %4551 = vmatpush1.bf16.msra.mxu0 %v7635_v56  ;;  %6756 = vmatprep.subr.bf16.mxu1 %v7643_v20 }
 0x3b8   : > { %4552 = vmatprep.subr.bf16.mxu0 %v7642_v58  ;;  %v7693_v58 = vld [vmem:[%s8523_s18 + $0xc58] ss:$28 sps:$4 sm:$0xff]  }
 0x3ba   : > { %6757 = vmatpush3.bf16.msra.mxu1 %v7644_v62 }
 0x3bb   : > { %4553 = vmatpush1.bf16.msra.mxu0 %v7640_v48  ;;  %6758 = vmatprep.subr.bf16.mxu1 %v7648_v54  ;;  %v7694_v54 = vld [vmem:[%s8523_s18 + $0xa98] ss:$28 sps:$4 sm:$0xff]  }
 0x3bc   : > { %4554 = vmatprep.subr.bf16.mxu0 %v7647_v17  ;;  %v7690_v17 = vld [vmem:[%s8523_s18 + $0xc50] ss:$28 sps:$4 sm:$0xff]  }
 0x3be   : > { %6759 = vmatpush3.bf16.msra.mxu1 %v7649_v14  ;;  %v7697_v14 = vld [vmem:[%s8523_s18 + $0xc8c] ss:$28 sps:$4 sm:$0xff]  }
 0x3bf   : > { %4555 = vmatpush1.bf16.msra.mxu0 %v7645_v60  ;;  %6766 = vmatprep.subr.bf16.mxu1 %v7653_v0 }
 0x3c0   : > { %4565 = vmatprep.subr.bf16.mxu0 %v7652_v61  ;;  %v7698_v61 = vld [vmem:[%s8523_s18 + $0xc90] ss:$28 sps:$4 sm:$0xff]  }
 0x3c1   : > { %4679 = vmatmul.mubr.bf16.vlgmr.msra.gmra.mrb[12].mxu1 %v8779_v63  ;;  %v7660_v63 = vld [vmem:[%s8523_s18 + $0xb00] ss:$28 sps:$4 sm:$0xff]  }
 0x3c2   : > { %4557 = vmatmul.mubr.bf16.vlgmr.msra.gmra.mrb[4].mxu0 %v8834_v34  ;;  %6767 = vmatpush3.bf16.msra.mxu1 %v7654_v4 }
 0x3c3   : > { %4566 = vmatpush1.bf16.msra.mxu0 %v7650_v6  ;;  %6768 = vmatprep.subr.bf16.mxu1 %v7658_v10  ;;  %v7699_v10 = vld [vmem:[%s8523_s18 + $0xad0] ss:$28 sps:$4 sm:$0xff]  }
 0x3c4   : > { %4567 = vmatprep.subr.bf16.mxu0 %v7657_v1  ;;  %4718 = vmatprep.mubr.bf16.mxu1 %v8840_v7  ;;  %v7669_v7 = vld [vmem:[%s8523_s18 + $0x7c0] ss:$28 sps:$4 sm:$0xff]   ;;  %v7695_v1 = vld [vmem:[%s8523_s18 + $0xc88] ss:$28 sps:$4 sm:$0xff]  }
 0x3c5   : > { %4597 = vmatprep.mubr.bf16.mxu0 %v8892_v23 }
 0x3c6   : > { %6769 = vmatpush3.bf16.msra.mxu1 %v7659_v57  ;;  %v7702_v57 = vld [vmem:[%s8523_s18 + $0xcc4] ss:$28 sps:$4 sm:$0xff]  }
 0x3c7   : > { %4568 = vmatpush1.bf16.msra.mxu0 %v7655_v26  ;;  %6770 = vmatprep.subr.bf16.mxu1 %v7663_v21 }
 0x3c8   : > { %4569 = vmatprep.subr.bf16.mxu0 %v7662_v16  ;;  %v7703_v16 = vld [vmem:[%s8523_s18 + $0xcc8] ss:$28 sps:$4 sm:$0xff]  }
 0x3ca   : > { %6771 = vmatpush3.bf16.msra.mxu1 %v7664_v24  ;;  %v7700_v24 = vld [vmem:[%s8523_s18 + $0xcc0] ss:$28 sps:$4 sm:$0xff]  }
 0x3cb   : > { %4570 = vmatpush1.bf16.msra.mxu0 %v7660_v63  ;;  %6772 = vmatprep.subr.bf16.mxu1 %v7668_v22 }
 0x3cc   : > { %4571 = vmatprep.subr.bf16.mxu0 %v7667_v25  ;;  %v7704_v25 = vld [vmem:[%s8523_s18 + $0xb08] ss:$28 sps:$4 sm:$0xff]  }
 0x3ce   : > { %6773 = vmatpush3.bf16.msra.mxu1 %v7669_v7  ;;  %v7708_v7 = vld [vmem:[%s8523_s18 + $0xd00] ss:$28 sps:$4 sm:$0xff]  }
 0x3cf   : > { %4572 = vmatpush1.bf16.msra.mxu0 %v7665_v15  ;;  %6774 = vmatprep.subr.bf16.mxu1 %v7673_v18  ;;  %v7707_v15 = vld [vmem:[%s8523_s18 + $0xcfc] ss:$28 sps:$4 sm:$0xff]  }
 0x3d0   : > { %4573 = vmatprep.subr.bf16.mxu0 %v7672_v28 }
 0x3d2   : > { %6775 = vmatpush3.bf16.msra.mxu1 %v7674_v32  ;;  %v7709_v32 = vld [vmem:[%s8523_s18 + $0xb40] ss:$28 sps:$4 sm:$0xff]  }
 0x3d3   : > { %4574 = vmatpush1.bf16.msra.mxu0 %v7670_v31  ;;  %6776 = vmatprep.subr.bf16.mxu1 %v7678_v35  ;;  %v7705_v31 = vld [vmem:[%s8523_s18 + $0xcf8] ss:$28 sps:$4 sm:$0xff]  }
 0x3d4   : > { %4575 = vmatprep.subr.bf16.mxu0 %v7677_v33  ;;  %v7712_v35 = vld [vmem:[%s8523_s18 + $0xd34] ss:$28 sps:$4 sm:$0xff]  }
 0x3d5   : > { %v4271_v46 = vpop.f32.mrb[0].mxu0 }
 0x3d6   : > { %v6905_v41 = vadd.f32 %v4271_v46, %v4149_v40  ;;  %v4273_v47 = vpop.f32.mrb[1].mxu0  ;;  %6777 = vmatpush3.bf16.msra.mxu1 %v7679_v39  ;;  %v7717_v46 = vld [vmem:[%s8523_s18 + $0xd6c] ss:$28 sps:$4 sm:$0xff]  }
 0x3d7   : > { %v6907_v49 = vadd.f32 %v4273_v47, %v4151_v5  ;;  %v4275_v44 = vpop.f32.mrb[2].mxu0  ;;  %4576 = vmatpush1.bf16.msra.mxu0 %v7675_v37  ;;  %6778 = vmatprep.subr.bf16.mxu1 %v7683_v43  ;;  %v7714_v43 = vld [vmem:[%s8523_s18 + $0xb78] ss:$28 sps:$4 sm:$0xff]  }
 0x3d8   : > { %v4767_v51 = vsel %vm4766_vm11, %v6905_v41, 0.0  ;;  %v4276_v52 = vpop.f32.mrb[3].mxu0  ;;  %4577 = vmatprep.subr.bf16.mxu0 %v7682_v42  ;;  %v7710_v42 = vld [vmem:[%s8523_s18 + $0xd30] ss:$28 sps:$4 sm:$0xff]  }
 0x3d9   : > { %v4768_v59 = vrot.slane %v4767_v51, 4  ;;  %v4774_v45 = vsel %vm4766_vm11, %v6907_v49, 0.0  ;;  %v7722_v52 = vld [vmem:[%s8523_s18 + $0xda4] ss:$28 sps:$4 sm:$0xff]  }
 0x3da   : > { %v4775_v53 = vrot.slane %v4774_v45, 4  ;;  %6779 = vmatpush3.bf16.msra.mxu1 %v7684_v3  ;;  %v7719_v3 = vld [vmem:[%s8523_s18 + $0xbb0] ss:$28 sps:$4 sm:$0xff]  }
 0x3db   : > { %v4769_v11 = vadd.f32 %v4768_v59, %v4767_v51  ;;  %4578 = vmatpush1.bf16.msra.mxu0 %v7680_v50  ;;  %6780 = vmatprep.subr.bf16.mxu1 %v7688_v2  ;;  %v7715_v50 = vld [vmem:[%s8523_s18 + $0xd68] ss:$28 sps:$4 sm:$0xff]  }
 0x3dc   : > { %v4776_v56 = vadd.f32 %v4775_v53, %v4774_v45  ;;  %4579 = vmatprep.subr.bf16.mxu0 %v7687_v12  ;;  %v7723_v12 = vld [vmem:[%s8523_s18 + $0xda8] ss:$28 sps:$4 sm:$0xff]   ;;  %v7720_v53 = vld [vmem:[%s8523_s18 + $0xda0] ss:$28 sps:$4 sm:$0xff]  }
 0x3dd   : > { %v4770_v20 = vrot.slane %v4769_v11, 2 }
 0x3de   : > { %v4777_v48 = vrot.slane %v4776_v56, 2  ;;  %6781 = vmatpush3.bf16.msra.mxu1 %v7689_v8  ;;  %v7727_v8 = vld [vmem:[%s8523_s18 + $0xddc] ss:$28 sps:$4 sm:$0xff]  }
 0x3df   : > { %v4771_v62 = vadd.f32 %v4770_v20, %v4769_v11  ;;  %4580 = vmatpush1.bf16.msra.mxu0 %v7685_v55  ;;  %6788 = vmatprep.subr.bf16.mxu1 %v7693_v58  ;;  %v7724_v11 = vld [vmem:[%s8523_s18 + $0xbe8] ss:$28 sps:$4 sm:$0xff]  }
 0x3e0   : > { %v4778_v60 = vadd.f32 %v4777_v48, %v4776_v56  ;;  %4581 = vmatprep.subr.bf16.mxu0 %v7692_v9  ;;  %v7728_v56 = vld [vmem:[%s8523_s18 + $0xde0] ss:$28 sps:$4 sm:$0xff]   ;;  %v7725_v48 = vld [vmem:[%s8523_s18 + $0xdd8] ss:$28 sps:$4 sm:$0xff]  }
 0x3e1   : > { %v4772_v0 = vrot.slane %v4771_v62, 1  ;;  %4719 = vmatmul.mubr.bf16.vlgmr.msra.gmra.mrb[16].mxu1 %v8834_v34 }
 0x3e2   : > { %v4779_v6 = vrot.slane %v4778_v60, 1  ;;  %6789 = vmatpush3.bf16.msra.mxu1 %v7694_v54  ;;  %4758 = vmatprep.mubr.bf16.mxu1 %v8892_v23  ;;  %v9269_v54 = vld [vmem:[%s8529_s20 + $0x2] ss:$4 sm:$0xff] }
 0x3e3   : > { %v4773_v4 = vadd.f32 %v4772_v0, %v4771_v62  ;;  %4582 = vmatpush1.bf16.msra.mxu0 %v7690_v17  ;;  %6790 = vmatprep.subr.bf16.mxu1 %v7698_v61  ;;  %v7729_v62 = vld [vmem:[%s8523_s18 + $0xc20] ss:$28 sps:$4 sm:$0xff]  }
 0x3e4   : > { %v4780_v26 = vadd.f32 %v4779_v6, %v4778_v60  ;;  %4583 = vmatprep.subr.bf16.mxu0 %v7697_v14  ;;  %v9264_v17 = vld [vmem:[%s8529_s20 + $0x1] ss:$4 sm:$0xff] }
 0x3e5   : > { %v4817_v21 = vmul.f32 0.25, %v4773_v4  ;;  %v4921_v60 = vrot.slane %v9264_v17, %v9187_v27  ;;  %v4925_v61 = vrot.slane %v9264_v17, %v9195_v30  ;;  %v4966_v4 = vrot.slane %v9269_v54, %v9187_v27 }
 0x3e6   : > { %v4818_v63 = vmul.f32 0.25, %v4780_v26  ;;  %6791 = vmatpush3.bf16.msra.mxu1 %v7699_v10 }
 0x3e7   : > { %v9231_v34 = vsub.f32 %v6905_v41, %v4817_v21  ;;  %4584 = vmatpush1.bf16.msra.mxu0 %v7695_v1  ;;  %6792 = vmatprep.subr.bf16.mxu1 %v7703_v16  ;;  %v7718_v41 = vld [vmem:[%s8523_s18 + $0xd70] ss:$28 sps:$4 sm:$0xff]  }
 0x3e8   : > { %v9235_v22 = vsub.f32 %v6907_v49, %v4818_v63  ;;  %4585 = vmatprep.subr.bf16.mxu0 %v7702_v57 }
 0x3e9   : > { %v4831_v23 = vmul.f32 %v9231_v34, %v9231_v34 }
 0x3ea   : > { %v4832_v28 = vmul.f32 %v9235_v22, %v9235_v22  ;;  %6793 = vmatpush3.bf16.msra.mxu1 %v7704_v25  ;;  %v9287_v25 = vsub.s32 2, %v8755_v38 }
 0x3eb   : > { %v4838_v18 = vsel %vm4766_vm11, %v4831_v23, 0.0  ;;  %4586 = vmatpush1.bf16.msra.mxu0 %v7700_v24  ;;  %6794 = vmatprep.subr.bf16.mxu1 %v7708_v7 }
 0x3ec   : > { %v4839_v13 = vrot.slane %v4838_v18, 4  ;;  %v4845_v33 = vsel %vm4766_vm11, %v4832_v28, 0.0  ;;  %4587 = vmatprep.subr.bf16.mxu0 %v7707_v15  ;;  %v1742_v15 = vrot.slane %v9192_v29, %v9287_v25 }
 0x3ed   : > { %v4846_v37 = vrot.slane %v4845_v33, 4 }
 0x3ee   : > { %v4840_v39 = vadd.f32 %v4839_v13, %v4838_v18  ;;  %6795 = vmatpush3.bf16.msra.mxu1 %v7709_v32 }
 0x3ef   : > { %v4847_v40 = vadd.f32 %v4846_v37, %v4845_v33  ;;  %4588 = vmatpush1.bf16.msra.mxu0 %v7705_v31  ;;  %6796 = vmatprep.subr.bf16.mxu1 %v7713_v36 }
 0x3f0   : > { %v4841_v5 = vrot.slane %v4840_v39, 2  ;;  %4589 = vmatprep.subr.bf16.mxu0 %v7712_v35 }
 0x3f1   : > { %v4848_v47 = vrot.slane %v4847_v40, 2 }
 0x3f2   : > { %v4842_v49 = vadd.f32 %v4841_v5, %v4840_v39  ;;  %6797 = vmatpush3.bf16.msra.mxu1 %v7714_v43 }
 0x3f3   : > { %v4849_v44 = vadd.f32 %v4848_v47, %v4847_v40  ;;  %4590 = vmatpush1.bf16.msra.mxu0 %v7710_v42  ;;  %6798 = vmatprep.subr.bf16.mxu1 %v7718_v41 }
 0x3f4   : > { %v4843_v51 = vrot.slane %v4842_v49, 1  ;;  %4591 = vmatprep.subr.bf16.mxu0 %v7717_v46 }
 0x3f5   : > { %v4850_v2 = vrot.slane %v4849_v44, 1 }
 0x3f6   : > { %v4844_v59 = vadd.f32 %v4843_v51, %v4842_v49  ;;  %6799 = vmatpush3.bf16.msra.mxu1 %v7719_v3 }
 0x3f7   : > { %v4851_v45 = vadd.f32 %v4850_v2, %v4849_v44  ;;  %4592 = vmatpush1.bf16.msra.mxu0 %v7715_v50  ;;  %6800 = vmatprep.subr.bf16.mxu1 %v7723_v12 }
 0x3f8   : > { %v4887_v55 = vmul.f32 0.25, %v4844_v59  ;;  %4593 = vmatprep.subr.bf16.mxu0 %v7722_v52 }
 0x3f9   : > { %v4888_v9 = vmul.f32 0.25, %v4851_v45 }
 0x3fa   : > { %v4894_v58 = vadd.f32 1e-05, %v4887_v55  ;;  %6801 = vmatpush3.bf16.msra.mxu1 %v7724_v11 }
 0x3fb   : > { %v4895_v20 = vadd.f32 1e-05, %v4888_v9  ;;  %4594 = vmatpush1.bf16.msra.mxu0 %v7720_v53  ;;  %6802 = vmatprep.subr.bf16.mxu1 %v7728_v56 }
 0x3fc   : > { %7730 = vrsqrt.f32 %v4894_v58  ;;  %4595 = vmatprep.subr.bf16.mxu0 %v7727_v8 }
 0x3fd   : > { %7732 = vrsqrt.f32 %v4895_v20 }
 0x3fe   : > { %6803 = vmatpush3.bf16.msra.mxu1 %v7729_v62 }
 0x3ff   : > { %4596 = vmatpush1.bf16.msra.mxu0 %v7725_v48 }
 0x401   : > { %4759 = vmatmul.mubr.bf16.vlgmr.msra.gmra.mrb[20].mxu1 %v8884_v19 }
 0x402   : > { %4598 = vmatmul.mubr.bf16.vlgmr.msra.gmra.mrb[4].mxu0 %v8884_v19  ;;  %v4970_v19 = vrot.slane %v9269_v54, %v9195_v30 }
 0x406   : > { %v7731_v14 = vpop.eup %7730 }
 0x407   : > { %v7733_v0 = vpop.eup %7732  ;;  %v4908_v6 = vmul.f32 %v7731_v14, %v9231_v34 }
 0x408   : > { %v4909_v1 = vmul.f32 %v7733_v0, %v9235_v22  ;;  %v9290_v22 = vsub.s32 3, %v8755_v38 }
 0x409   : > { %v4953_v10 = vmul.f32 %v4921_v60, %v4908_v6 }
 0x40a   : > { %v4954_v26 = vmul.f32 %v4925_v61, %v4909_v1  ;;  %v1746_v7 = vrot.slane %v9192_v29, %v9290_v22 }
 0x40b   : > { %v4998_v57 = vadd.f32 %v4966_v4, %v4953_v10 }
 0x40c   : > { %v4999_v16 = vadd.f32 %v4970_v19, %v4954_v26 }
 0x40d   : > { %vm5005_vm12 = vcmp.gt.f32.partialorder %v4998_v57, 0.0  ;;  %v5012_v21 = vmul.f32 0.01, %v4998_v57 }
 0x40e   : > { %vm5006_vm13 = vcmp.gt.f32.partialorder %v4999_v16, 0.0  ;;  %v5013_v63 = vmul.f32 0.01, %v4999_v16 }
 0x40f   : > { %v5019_v24 = vsel %vm5005_vm12, %v4998_v57, %v5012_v21 }
 0x410   : > { %5028 = vst [vmem:[%s9282_s1] sm:$0xf] %v5019_v24  ;;  %v5020_v34 = vsel %vm5006_vm13, %v4999_v16, %v5013_v63  ;;  %v4929_v16 = vrot.slane %v9264_v17, %v9287_v25  ;;  %v4933_v63 = vrot.slane %v9264_v17, %v9290_v22 }
 0x411   : > { %6648 = vst [vmem:[%s9282_s1 + $0x4] sm:$0xf] %v5020_v34 }
 0x454   : > { %v4435_v23 = vpop.f32.mrb[4].mxu1 }
 0x455   : > { %v6908_v28 = vadd.f32 %v4435_v23, %v1742_v15  ;;  %v4437_v18 = vpop.f32.mrb[5].mxu1  ;;  %v4974_v15 = vrot.slane %v9269_v54, %v9287_v25  ;;  %v4978_v23 = vrot.slane %v9269_v54, %v9290_v22 }
 0x456   : > { %v6909_v31 = vadd.f32 %v4437_v18, %v1746_v7  ;;  %v4439_v32 = vpop.f32.mrb[6].mxu1 }
 0x457   : > { %v4781_v13 = vsel %vm4766_vm11, %v6908_v28, 0.0  ;;  %v4440_v33 = vpop.f32.mrb[7].mxu1 }
 0x458   : > { %v4782_v35 = vrot.slane %v4781_v13, 4  ;;  %v4788_v36 = vsel %vm4766_vm11, %v6909_v31, 0.0 }
 0x459   : > { %v4789_v37 = vrot.slane %v4788_v36, 4 }
 0x45a   : > { %v4783_v39 = vadd.f32 %v4782_v35, %v4781_v13 }
 0x45b   : > { %v4790_v40 = vadd.f32 %v4789_v37, %v4788_v36  ;;  %v9309_v36 = vsub.s32 6, %v8755_v38 }
 0x45c   : > { %v4784_v42 = vrot.slane %v4783_v39, 2 }
 0x45d   : > { %v4791_v43 = vrot.slane %v4790_v40, 2  ;;  %v1758_v25 = vrot.slane %v9192_v29, %v9309_v36 }
 0x45e   : > { %v4785_v5 = vadd.f32 %v4784_v42, %v4783_v39 }
 0x45f   : > { %v4792_v46 = vadd.f32 %v4791_v43, %v4790_v40 }
 0x460   : > { %v4786_v41 = vrot.slane %v4785_v5, 1 }
 0x461   : > { %v4793_v47 = vrot.slane %v4792_v46, 1 }
 0x462   : > { %v4787_v49 = vadd.f32 %v4786_v41, %v4785_v5 }
 0x463   : > { %v4794_v44 = vadd.f32 %v4793_v47, %v4792_v46 }
 0x464   : > { %v4819_v50 = vmul.f32 0.25, %v4787_v49 }
 0x465   : > { %v4820_v3 = vmul.f32 0.25, %v4794_v44 }
 0x466   : > { %v4826_v51 = vsub.f32 %v6908_v28, %v4819_v50 }
 0x467   : > { %v4827_v52 = vsub.f32 %v6909_v31, %v4820_v3 }
 0x468   : > { %v4833_v12 = vmul.f32 %v4826_v51, %v4826_v51 }
 0x469   : > { %v4834_v2 = vmul.f32 %v4827_v52, %v4827_v52 }
 0x46a   : > { %v4852_v59 = vsel %vm4766_vm11, %v4833_v12, 0.0 }
 0x46b   : > { %v4853_v45 = vrot.slane %v4852_v59, 4  ;;  %v4859_v53 = vsel %vm4766_vm11, %v4834_v2, 0.0 }
 0x46c   : > { %v4860_v11 = vrot.slane %v4859_v53, 4 }
 0x46d   : > { %v4854_v55 = vadd.f32 %v4853_v45, %v4852_v59 }
 0x46e   : > { %v4861_v8 = vadd.f32 %v4860_v11, %v4859_v53 }
 0x46f   : > { %v4855_v56 = vrot.slane %v4854_v55, 2 }
 0x470   : > { %v4862_v9 = vrot.slane %v4861_v8, 2 }
 0x471   : > { %v4856_v58 = vadd.f32 %v4855_v56, %v4854_v55 }
 0x472   : > { %v4863_v20 = vadd.f32 %v4862_v9, %v4861_v8 }
 0x473   : > { %v4857_v48 = vrot.slane %v4856_v58, 1 }
 0x474   : > { %v4864_v62 = vrot.slane %v4863_v20, 1  ;;  %v6738_v60 = vpop.f32.mrb[8].mxu1 }
 0x475   : > { %v4858_v14 = vadd.f32 %v4857_v48, %v4856_v58  ;;  %v6739_v61 = vpop.f32.mrb[9].mxu1 }
 0x476   : > { %v4865_v0 = vadd.f32 %v4864_v62, %v4863_v20  ;;  %v6740_v6 = vadd.f32 %v6739_v61, %v6738_v60  ;;  %v6741_v4 = vpop.f32.mrb[10].mxu1 }
 0x477   : > { %v4889_v1 = vmul.f32 0.25, %v4858_v14  ;;  %v6742_v19 = vpop.f32.mrb[11].mxu1 }
 0x478   : > { %v4890_v10 = vmul.f32 0.25, %v4865_v0  ;;  %v4641_v40 = vadd.f32 %v6740_v6, %v1758_v25 }
 0x479   : > { %v4896_v26 = vadd.f32 1e-05, %v4889_v1 }
 0x47a   : > { %v4897_v57 = vadd.f32 1e-05, %v4890_v10 }
 0x47b   : > { %7734 = vrsqrt.f32 %v4896_v26 }
 0x47c   : > { %7736 = vrsqrt.f32 %v4897_v57 }
 0x485   : > { %v7735_v21 = vpop.eup %7734 }
 0x486   : > { %v7737_v24 = vpop.eup %7736  ;;  %v4910_v34 = vmul.f32 %v7735_v21, %v4826_v51  ;;  %v9316_v51 = vsub.s32 4, %v8755_v38 }
 0x487   : > { %v4911_v7 = vmul.f32 %v7737_v24, %v4827_v52  ;;  %v9319_v52 = vsub.s32 5, %v8755_v38 }
 0x488   : > { %v4955_v28 = vmul.f32 %v4929_v16, %v4910_v34  ;;  %v1750_v12 = vrot.slane %v9192_v29, %v9316_v51 }
 0x489   : > { %v4956_v18 = vmul.f32 %v4933_v63, %v4911_v7  ;;  %v1754_v2 = vrot.slane %v9192_v29, %v9319_v52 }
 0x48a   : > { %v5000_v31 = vadd.f32 %v4974_v15, %v4955_v28 }
 0x48b   : > { %v5001_v32 = vadd.f32 %v4978_v23, %v4956_v18 }
 0x48c   : > { %vm5007_vm14 = vcmp.gt.f32.partialorder %v5000_v31, 0.0  ;;  %v5014_v13 = vmul.f32 0.01, %v5000_v31 }
 0x48d   : > { %vm5008_vm15 = vcmp.gt.f32.partialorder %v5001_v32, 0.0  ;;  %v5015_v33 = vmul.f32 0.01, %v5001_v32 }
 0x48e   : > { %v5021_v35 = vsel %vm5007_vm14, %v5000_v31, %v5014_v13 }
 0x48f   : > { %6650 = vst [vmem:[%s9282_s1 + $0x8] sm:$0xf] %v5021_v35  ;;  %v5022_v37 = vsel %vm5008_vm15, %v5001_v32, %v5015_v33 }
 0x490   : > { %6652 = vst [vmem:[%s9282_s1 + $0xc] sm:$0xf] %v5022_v37 }
 0x494   : > { %v6760_v39 = vpop.f32.mrb[12].mxu1 }
 0x495   : > { %v6761_v22 = vpop.f32.mrb[13].mxu1 }
 0x496   : > { %v6762_v42 = vadd.f32 %v6761_v22, %v6760_v39  ;;  %v6763_v43 = vpop.f32.mrb[14].mxu1 }
 0x497   : > { %v6764_v5 = vpop.f32.mrb[15].mxu1 }
 0x498   : > { %v4681_v46 = vadd.f32 %v6762_v42, %v4641_v40 }
 0x4b4   : > { %v6782_v41 = vpop.f32.mrb[16].mxu1 }
 0x4b5   : > { %v6783_v47 = vpop.f32.mrb[17].mxu1 }
 0x4b6   : > { %v6784_v49 = vadd.f32 %v6783_v47, %v6782_v41  ;;  %v6785_v44 = vpop.f32.mrb[18].mxu1 }
 0x4b7   : > { %v6786_v50 = vpop.f32.mrb[19].mxu1 }
 0x4b8   : > { %v4721_v3 = vadd.f32 %v6784_v49, %v4681_v46 }
 0x4d4   : > { %v6804_v45 = vpop.f32.mrb[20].mxu1 }
 0x4d5   : > { %v4599_v59 = vpop.f32.mrb[4].mxu0  ;;  %v6805_v55 = vpop.f32.mrb[21].mxu1 }
 0x4d6   : > { %v6910_v53 = vadd.f32 %v4599_v59, %v1750_v12  ;;  %v4601_v11 = vpop.f32.mrb[5].mxu0  ;;  %v6806_v56 = vadd.f32 %v6805_v55, %v6804_v45  ;;  %v6807_v58 = vpop.f32.mrb[22].mxu1 }
 0x4d7   : > { %v6911_v8 = vadd.f32 %v4601_v11, %v1754_v2  ;;  %v4603_v9 = vpop.f32.mrb[6].mxu0  ;;  %v6808_v38 = vpop.f32.mrb[23].mxu1 }
 0x4d8   : > { %v4795_v20 = vsel %vm4766_vm11, %v6910_v53, 0.0  ;;  %v4604_v48 = vpop.f32.mrb[7].mxu0  ;;  %v4761_v14 = vadd.f32 %v6806_v56, %v4721_v3 }
 0x4d9   : > { %v4796_v62 = vrot.slane %v4795_v20, 4  ;;  %v4802_v60 = vsel %vm4766_vm11, %v6911_v8, 0.0 }
 0x4da   : > { %v4803_v61 = vrot.slane %v4802_v60, 4  ;;  %v4809_v29 = vsel %vm4766_vm11, %v4761_v14, 0.0 }
 0x4db   : > { %v4797_v0 = vadd.f32 %v4796_v62, %v4795_v20  ;;  %v4810_v4 = vrot.slane %v4809_v29, 4  ;;  %v4937_v62 = vrot.slane %v9264_v17, %v9316_v51 }
 0x4dc   : > { %v4804_v6 = vadd.f32 %v4803_v61, %v4802_v60 }
 0x4dd   : > { %v4798_v1 = vrot.slane %v4797_v0, 2  ;;  %v4811_v10 = vadd.f32 %v4810_v4, %v4809_v29  ;;  %v4982_v29 = vrot.slane %v9269_v54, %v9316_v51  ;;  %v4986_v4 = vrot.slane %v9269_v54, %v9319_v52 }
 0x4de   : > { %v4805_v19 = vrot.slane %v4804_v6, 2 }
 0x4df   : > { %v4799_v26 = vadd.f32 %v4798_v1, %v4797_v0  ;;  %v4812_v16 = vrot.slane %v4811_v10, 2  ;;  %v4945_v1 = vrot.slane %v9264_v17, %v9309_v36 }
 0x4e0   : > { %v4806_v57 = vadd.f32 %v4805_v19, %v4804_v6 }
 0x4e1   : > { %v4800_v21 = vrot.slane %v4799_v26, 1  ;;  %v4813_v24 = vadd.f32 %v4812_v16, %v4811_v10  ;;  %v4990_v16 = vrot.slane %v9269_v54, %v9309_v36  ;;  %v7744_v54 = vld [vmem:[#allocation12 + $0x4] ss:$8 sps:$4 sm:$0xff] (!%p6659_p1)   ;;  %v7746_v36 = vld [vmem:[#allocation12] ss:$8 sps:$4 sm:$0xff] (!%p6659_p1)  }
 0x4e2   : > { %v4807_v63 = vrot.slane %v4806_v57, 1  ;;  %5204 = vmatprep.subr.bf16.mxu0 (!%p6659_p1), %v7744_v54  ;;  %v7778_v54 = vld [vmem:[%s9610_s7 + $0x68] sm:$0xff] (!%p6659_p1)  }
 0x4e3   : > { %v4801_v34 = vadd.f32 %v4800_v21, %v4799_v26  ;;  %v4814_v7 = vrot.slane %v4813_v24, 1  ;;  %5205 = vmatpush1.bf16.msra.mxu0 (!%p6659_p1), %v7746_v36  ;;  %v7779_v36 = vld [vmem:[%s9610_s7 + $0x28] sm:$0xff] (!%p6659_p1)  }
 0x4e4   : > { %v4808_v15 = vadd.f32 %v4807_v63, %v4806_v57 }
 0x4e5   : > { %v4821_v23 = vmul.f32 0.25, %v4801_v34  ;;  %v4815_v18 = vadd.f32 %v4814_v7, %v4813_v24 }
 0x4e6   : > { %v4822_v28 = vmul.f32 0.25, %v4808_v15 }
 0x4e7   : > { %v4828_v31 = vsub.f32 %v6910_v53, %v4821_v23  ;;  %v4823_v13 = vmul.f32 0.25, %v4815_v18  ;;  %v7747_v18 = vld [vmem:[#allocation12 + $0x14] ss:$8 sps:$4 sm:$0xff] (!%p6659_p1)  }
 0x4e8   : > { %v4829_v32 = vsub.f32 %v6911_v8, %v4822_v28  ;;  %v8182_v28 = vmov (!%p6659_p1), 0   ;;  %5206 = vmatprep.subr.bf16.mxu0 (!%p6659_p1), %v7747_v18 }
 0x4e9   : > { %v4835_v33 = vmul.f32 %v4828_v31, %v4828_v31  ;;  %v4830_v37 = vsub.f32 %v4761_v14, %v4823_v13  ;;  %v4941_v14 = vrot.slane %v9264_v17, %v9319_v52  ;;  %5236 = vmatprep.mubr.bf16.mxu0 (!%p6659_p1), %v8182_v28  ;;  %v7752_v13 = vld [vmem:[#allocation12 + $0x20] ss:$8 sps:$4 sm:$0xff] (!%p6659_p1)  }
 0x4ea   : > { %v4836_v35 = vmul.f32 %v4829_v32, %v4829_v32 }
 0x4eb   : > { %v4866_v25 = vsel %vm4766_vm11, %v4835_v33, 0.0  ;;  %v4837_v40 = vmul.f32 %v4830_v37, %v4830_v37  ;;  %v7753_v33 = vld [vmem:[#allocation12 + $0x34] ss:$8 sps:$4 sm:$0xff] (!%p6659_p1)  }
 0x4ec   : > { %v4867_v39 = vrot.slane %v4866_v25, 4  ;;  %v4873_v22 = vsel %vm4766_vm11, %v4836_v35, 0.0  ;;  %v7755_v35 = vld [vmem:[#allocation12 + $0x30] ss:$8 sps:$4 sm:$0xff] (!%p6659_p1)  }
 0x4ed   : > { %v4874_v42 = vrot.slane %v4873_v22, 4  ;;  %v4880_v5 = vsel %vm4766_vm11, %v4837_v40, 0.0  ;;  %v7762_v40 = vld [vmem:[#allocation12 + $0x64] ss:$8 sps:$4 sm:$0xff] (!%p6659_p1)  }
 0x4ee   : > { %v4868_v43 = vadd.f32 %v4867_v39, %v4866_v25  ;;  %v4881_v41 = vrot.slane %v4880_v5, 4  ;;  %v7758_v25 = vld [vmem:[#allocation12 + $0x40] ss:$8 sps:$4 sm:$0xff] (!%p6659_p1)   ;;  %v7759_v39 = vld [vmem:[#allocation12 + $0x54] ss:$8 sps:$4 sm:$0xff] (!%p6659_p1)  }
 0x4ef   : > { %v4875_v46 = vadd.f32 %v4874_v42, %v4873_v22  ;;  %v7761_v22 = vld [vmem:[#allocation12 + $0x50] ss:$8 sps:$4 sm:$0xff] (!%p6659_p1)  }
 0x4f0   : > { %v4869_v47 = vrot.slane %v4868_v43, 2  ;;  %v4882_v44 = vadd.f32 %v4881_v41, %v4880_v5  ;;  %v7768_v42 = vld [vmem:[%s9610_s7 + $0x40] sm:$0xff] (!%p6659_p1)   ;;  %v7764_v5 = vld [vmem:[#allocation12 + $0x60] ss:$8 sps:$4 sm:$0xff] (!%p6659_p1)   ;;  %v7771_v41 = vld [vmem:[%s9610_s7 + $0x8] sm:$0xff] (!%p6659_p1)  }
 0x4f1   : > { %v4876_v49 = vrot.slane %v4875_v46, 2  ;;  %6810 = vmatprep.subr.bf16.mxu1 (!%p6659_p1), %v7768_v42 }
 0x4f2   : > { %v4870_v50 = vadd.f32 %v4869_v47, %v4868_v43  ;;  %v4883_v12 = vrot.slane %v4882_v44, 2  ;;  %v7769_v43 = vld [vmem:[%s9610_s7] sm:$0xff] (!%p6659_p1)   ;;  %v7772_v47 = vld [vmem:[%s9610_s7 + $0x50] sm:$0xff] (!%p6659_p1)  }
 0x4f3   : > { %v4877_v3 = vadd.f32 %v4876_v49, %v4875_v46  ;;  %v7770_v46 = vld [vmem:[%s9610_s7 + $0x48] sm:$0xff] (!%p6659_p1)   ;;  %6811 = vmatpush3.bf16.msra.mxu1 (!%p6659_p1), %v7769_v43 }
 0x4f4   : > { %v4871_v2 = vrot.slane %v4870_v50, 1  ;;  %v4884_v45 = vadd.f32 %v4883_v12, %v4882_v44  ;;  %6812 = vmatprep.subr.bf16.mxu1 (!%p6659_p1), %v7770_v46  ;;  %v7765_v49 = vld [vmem:[#allocation12 + $0x74] ss:$8 sps:$4 sm:$0xff] (!%p6659_p1)   ;;  %v7767_v44 = vld [vmem:[#allocation12 + $0x70] ss:$8 sps:$4 sm:$0xff] (!%p6659_p1)  }
 0x4f5   : > { %v4878_v59 = vrot.slane %v4877_v3, 1  ;;  %v7773_v12 = vld [vmem:[%s9610_s7 + $0x10] sm:$0xff] (!%p6659_p1)  }
 0x4f6   : > { %v4872_v53 = vadd.f32 %v4871_v2, %v4870_v50  ;;  %v4885_v55 = vrot.slane %v4884_v45, 1  ;;  %v7774_v2 = vld [vmem:[%s9610_s7 + $0x58] sm:$0xff] (!%p6659_p1)  }
 0x4f7   : > { %v4879_v11 = vadd.f32 %v4878_v59, %v4877_v3  ;;  %6813 = vmatpush3.bf16.msra.mxu1 (!%p6659_p1), %v7771_v41  ;;  %v7775_v59 = vld [vmem:[%s9610_s7 + $0x18] sm:$0xff] (!%p6659_p1)  }
 0x4f8   : > { %v4891_v8 = vmul.f32 0.25, %v4872_v53  ;;  %v4886_v9 = vadd.f32 %v4885_v55, %v4884_v45  ;;  %6814 = vmatprep.subr.bf16.mxu1 (!%p6659_p1), %v7772_v47  ;;  %v7776_v45 = vld [vmem:[%s9610_s7 + $0x60] sm:$0xff] (!%p6659_p1)  }
 0x4f9   : > { %v4892_v56 = vmul.f32 0.25, %v4879_v11  ;;  %v7777_v11 = vld [vmem:[%s9610_s7 + $0x20] sm:$0xff] (!%p6659_p1)  }
 0x4fa   : > { %v4898_v58 = vadd.f32 1e-05, %v4891_v8  ;;  %v4893_v48 = vmul.f32 0.25, %v4886_v9 }
 0x4fb   : > { %v4899_v20 = vadd.f32 1e-05, %v4892_v56  ;;  %6815 = vmatpush3.bf16.msra.mxu1 (!%p6659_p1), %v7773_v12 }
 0x4fc   : > { %7738 = vrsqrt.f32 %v4898_v58  ;;  %v4900_v38 = vadd.f32 1e-05, %v4893_v48  ;;  %6816 = vmatprep.subr.bf16.mxu1 (!%p6659_p1), %v7774_v2 }
 0x4fd   : > { %7740 = vrsqrt.f32 %v4899_v20 }
 0x4fe   : > { %7742 = vrsqrt.f32 %v4900_v38 }
 0x4ff   : > { %6817 = vmatpush3.bf16.msra.mxu1 (!%p6659_p1), %v7775_v59 }
 0x500   : > { %6818 = vmatprep.subr.bf16.mxu1 (!%p6659_p1), %v7776_v45 }
 0x503   : > { %6819 = vmatpush3.bf16.msra.mxu1 (!%p6659_p1), %v7777_v11 }
 0x504   : > { %6820 = vmatprep.subr.bf16.mxu1 (!%p6659_p1), %v7778_v54 }
 0x506   : > { %v7739_v60 = vpop.eup %7738 }
 0x507   : > { %v7741_v61 = vpop.eup %7740  ;;  %v4912_v0 = vmul.f32 %v7739_v60, %v4828_v31  ;;  %v7749_v31 = vld [vmem:[#allocation12 + $0x10] ss:$8 sps:$4 sm:$0xff] (!%p6659_p1)   ;;  %6821 = vmatpush3.bf16.msra.mxu1 (!%p6659_p1), %v7779_v36 }
 0x508   : > { %v4913_v6 = vmul.f32 %v7741_v61, %v4829_v32  ;;  %v7743_v19 = vpop.eup %7742  ;;  %v7750_v32 = vld [vmem:[#allocation12 + $0x24] ss:$8 sps:$4 sm:$0xff] (!%p6659_p1)   ;;  %5207 = vmatpush1.bf16.msra.mxu0 (!%p6659_p1), %v7749_v31  ;;  %v7780_v31 = vld [vmem:[%s9610_s7 + $0x70] sm:$0xff] (!%p6659_p1)  }
 0x509   : > { %v4957_v10 = vmul.f32 %v4937_v62, %v4912_v0  ;;  %v4914_v57 = vmul.f32 %v7743_v19, %v4830_v37  ;;  %5208 = vmatprep.subr.bf16.mxu0 (!%p6659_p1), %v7750_v32  ;;  %v7756_v37 = vld [vmem:[#allocation12 + $0x44] ss:$8 sps:$4 sm:$0xff] (!%p6659_p1)   ;;  %v7781_v32 = vld [vmem:[%s9610_s7 + $0x30] sm:$0xff] (!%p6659_p1)   ;;  %6822 = vmatprep.subr.bf16.mxu1 (!%p6659_p1), %v7780_v31 }
 0x50a   : > { %v4958_v26 = vmul.f32 %v4941_v14, %v4913_v6 }
 0x50b   : > { %v5002_v21 = vadd.f32 %v4982_v29, %v4957_v10  ;;  %v4959_v51 = vmul.f32 %v4945_v1, %v4914_v57  ;;  %6823 = vmatpush3.bf16.msra.mxu1 (!%p6659_p1), %v7781_v32 }
 0x50c   : > { %v5003_v63 = vadd.f32 %v4986_v4, %v4958_v26  ;;  %5057 = sbr.rel (%p6659_p1) target bundleno = 1878 (0x756), region = 96  ;;  %5209 = vmatpush1.bf16.msra.mxu0 (!%p6659_p1), %v7752_v13 }
 0x50d   : > { %vm5009_vm0 = vcmp.gt.f32.partialorder %v5002_v21, 0.0  ;;  %v5016_v24 = vmul.f32 0.01, %v5002_v21  ;;  %v5004_v34 = vadd.f32 %v4990_v16, %v4959_v51  ;;  %5210 = vmatprep.subr.bf16.mxu0 (!%p6659_p1), %v7753_v33  ;;  %v7782_v33 = vld [vmem:[%s9610_s7 + $0x78] sm:$0xff] (!%p6659_p1)  }
 0x50e   : > { %vm5010_vm1 = vcmp.gt.f32.partialorder %v5003_v63, 0.0  ;;  %v5017_v52 = vmul.f32 0.01, %v5003_v63  ;;  %6824 = vmatprep.subr.bf16.mxu1 (!%p6659_p1), %v7782_v33 }
 0x50f   : > { %v5023_v15 = vsel %vm5009_vm0, %v5002_v21, %v5016_v24  ;;  %vm5011_vm2 = vcmp.gt.f32.partialorder %v5004_v34, 0.0  ;;  %v5018_v7 = vmul.f32 0.01, %v5004_v34 }
 0x510   : > { %6654 = vst [vmem:[%s9282_s1 + $0x10] sm:$0xf] %v5023_v15  ;;  %v5024_v17 = vsel %vm5010_vm1, %v5003_v63, %v5017_v52  ;;  %5211 = vmatpush1.bf16.msra.mxu0 (!%p6659_p1), %v7755_v35  ;;  %v7783_v35 = vld [vmem:[%s9610_s7 + $0x38] sm:$0xff] (!%p6659_p1)  }
 0x511   : > { %6656 = vst [vmem:[%s9282_s1 + $0x14] sm:$0xf] %v5024_v17  ;;  %v5025_v23 = vsel %vm5011_vm2, %v5004_v34, %v5018_v7  ;;  %5212 = vmatprep.subr.bf16.mxu0 (!%p6659_p1), %v7756_v37  ;;  %6825 = vmatpush3.bf16.msra.mxu1 (!%p6659_p1), %v7783_v35 }
 0x512   : > { %6658 = vst [vmem:[%s9282_s1 + $0x18] sm:$0xf] %v5025_v23 }
 0x514   : > { %5213 = vmatpush1.bf16.msra.mxu0 %v7758_v25  ;;  %v5112_v25 = vld [vmem:[#allocation14] sm:$0x3] }
 0x515   : > { %5214 = vmatprep.subr.bf16.mxu0 %v7759_v39  ;;  %v9409_v39 = vrot.slane %v5112_v25, %v9187_v27 }
 0x518   : > { %5215 = vmatpush1.bf16.msra.mxu0 %v7761_v22  ;;  %v9412_v22 = vrot.slane %v5112_v25, %v9195_v30 }
 0x519   : > { %5216 = vmatprep.subr.bf16.mxu0 %v7762_v40  ;;  %v5058_v50 = vld [vmem:[#allocation3] sm:$0xff]  ;;  %v5059_v3 = vld [vmem:[#allocation3 + $0x8] sm:$0xff]  ;;  %v5060_v55 = vld [vmem:[#allocation3 + $0x10] sm:$0xff] }
 0x51a   : > { %v5083_v53 = vpack.c.bf16 %v5059_v3, %v5058_v50  ;;  %v5061_v8 = vld [vmem:[#allocation3 + $0x18] sm:$0xff]  ;;  %v5062_v9 = vld [vmem:[#allocation3 + $0x20] sm:$0xff]  ;;  %v5063_v58 = vld [vmem:[#allocation3 + $0x28] sm:$0xff] }
 0x51b   : > { %v5084_v56 = vpack.c.bf16 %v5061_v8, %v5060_v55  ;;  %v5085_v20 = vpack.c.bf16 %v5063_v58, %v5062_v9  ;;  %v5064_v48 = vld [vmem:[#allocation3 + $0x30] sm:$0xff]  ;;  %v5065_v38 = vld [vmem:[#allocation3 + $0x38] sm:$0xff]  ;;  %v5066_v60 = vld [vmem:[#allocation3 + $0x40] sm:$0xff] }
 0x51c   : > { %5217 = vmatpush1.bf16.msra.mxu0 %v7764_v5  ;;  %v5086_v62 = vpack.c.bf16 %v5065_v38, %v5064_v48  ;;  %v5067_v14 = vld [vmem:[#allocation3 + $0x48] sm:$0xff]  ;;  %v5068_v0 = vld [vmem:[#allocation3 + $0x50] sm:$0xff]  ;;  %v5069_v29 = vld [vmem:[#allocation3 + $0x58] sm:$0xff] }
 0x51d   : > { %5218 = vmatprep.subr.bf16.mxu0 %v7765_v49  ;;  %v5087_v61 = vpack.c.bf16 %v5067_v14, %v5066_v60  ;;  %v5088_v6 = vpack.c.bf16 %v5069_v29, %v5068_v0  ;;  %v5070_v4 = vld [vmem:[#allocation3 + $0x60] sm:$0xff]  ;;  %v5071_v1 = vld [vmem:[#allocation3 + $0x68] sm:$0xff]  ;;  %v5072_v10 = vld [vmem:[#allocation3 + $0x70] sm:$0xff] }
 0x51e   : > { %v5089_v19 = vpack.c.bf16 %v5071_v1, %v5070_v4  ;;  %v5073_v26 = vld [vmem:[#allocation3 + $0x78] sm:$0xff]  ;;  %v5074_v16 = vld [vmem:[#allocation3 + $0x80] sm:$0xff]  ;;  %v5075_v21 = vld [vmem:[#allocation3 + $0x88] sm:$0xff] }
 0x51f   : > { %v5090_v57 = vpack.c.bf16 %v5073_v26, %v5072_v10  ;;  %v5091_v63 = vpack.c.bf16 %v5075_v21, %v5074_v16  ;;  %v5076_v51 = vld [vmem:[#allocation3 + $0x90] sm:$0xff]  ;;  %v5077_v24 = vld [vmem:[#allocation3 + $0x98] sm:$0xff]  ;;  %v5078_v34 = vld [vmem:[#allocation3 + $0xa0] sm:$0xff] }
 0x520   : > { %5219 = vmatpush1.bf16.msra.mxu0 %v7767_v44  ;;  %v5092_v52 = vpack.c.bf16 %v5077_v24, %v5076_v51  ;;  %v5079_v15 = vld [vmem:[#allocation3 + $0xa8] sm:$0xff]  ;;  %v5080_v7 = vld [vmem:[#allocation3 + $0xb0] sm:$0xff]  ;;  %v5081_v23 = vld [vmem:[#allocation3 + $0xb8] sm:$0xff] }
 0x521   : > { %v5093_v17 = vpack.c.bf16 %v5079_v15, %v5078_v34  ;;  %v5094_v18 = vpack.c.bf16 %v5081_v23, %v5080_v7  ;;  %v5082_v13 = vld [vmem:[#allocation3 + $0xc0] sm:$0xf] }
 0x522   : > { %v5095_v37 = vpack.c.bf16 %v5082_v13, %v5082_v13 }
 0x523   : > { %5237 = vmatmul.mubr.bf16.vlgmr.msra.gmra.mrb[0].mxu0 %v5083_v53 }
 0x524   : > { %5246 = vmatprep.mubr.bf16.mxu0 %v8182_v28 }
 0x52b   : > { %5247 = vmatmul.mubr.bf16.gmra.mrb[4].mxu0 %v5084_v56 }
 0x52c   : > { %5256 = vmatprep.mubr.bf16.mxu0 %v8182_v28 }
 0x533   : > { %5257 = vmatmul.mubr.bf16.gmra.mrb[8].mxu0 %v5085_v20 }
 0x534   : > { %5266 = vmatprep.mubr.bf16.mxu0 %v8182_v28 }
 0x53b   : > { %5267 = vmatmul.mubr.bf16.gmra.mrb[12].mxu0 %v5086_v62 }
 0x53c   : > { %5276 = vmatprep.mubr.bf16.mxu0 %v8182_v28 }
 0x543   : > { %5277 = vmatmul.mubr.bf16.gmra.mrb[16].mxu0 %v5087_v61 }
 0x544   : > { %5286 = vmatprep.mubr.bf16.mxu0 %v8182_v28 }
 0x54b   : > { %5287 = vmatmul.mubr.bf16.gmra.mrb[20].mxu0 %v5088_v6 }
 0x54c   : > { %5296 = vmatprep.mubr.bf16.mxu0 %v8182_v28 }
 0x553   : > { %5297 = vmatmul.mubr.bf16.gmra.mrb[24].mxu0 %v5089_v19 }
 0x554   : > { %5306 = vmatprep.mubr.bf16.mxu0 %v8182_v28 }
 0x55b   : > { %5307 = vmatmul.mubr.bf16.gmra.mrb[28].mxu0 %v5090_v57 }
 0x55c   : > { %5316 = vmatprep.mubr.bf16.mxu0 %v8182_v28 }
 0x563   : > { %5317 = vmatmul.mubr.bf16.gmra.mrb[32].mxu0 %v5091_v63 }
 0x564   : > { %5326 = vmatprep.mubr.bf16.mxu0 %v8182_v28 }
 0x56b   : > { %5327 = vmatmul.mubr.bf16.gmra.mrb[36].mxu0 %v5092_v52 }
 0x56c   : > { %5336 = vmatprep.mubr.bf16.mxu0 %v8182_v28 }
 0x573   : > { %5337 = vmatmul.mubr.bf16.gmra.mrb[40].mxu0 %v5093_v17 }
 0x574   : > { %5346 = vmatprep.mubr.bf16.mxu0 %v8182_v28 }
 0x57b   : > { %5347 = vmatmul.mubr.bf16.gmra.mrb[44].mxu0 %v5094_v18 }
 0x57c   : > { %5356 = vmatprep.mubr.bf16.mxu0 %v8182_v28 }
 0x583   : > { %5357 = vmatmul.mubr.bf16.gmra.mrb[48].mxu0 %v5095_v37 }
 0x5f6   : > { %v5238_v28 = vpop.f32.mrb[0].mxu0 }
 0x5f7   : > { %v5239_v40 = vadd.f32 %v5238_v28, %v9409_v39  ;;  %v5240_v42 = vpop.f32.mrb[1].mxu0 }
 0x5f8   : > { %v5241_v43 = vadd.f32 %v5240_v42, %v9412_v22  ;;  %v5242_v5 = vpop.f32.mrb[2].mxu0 }
 0x5f9   : > { %v5415_v46 = vmul.f32 0.01, %v5239_v40  ;;  %v5243_v41 = vadd.f32 %v5242_v5, %v9409_v39  ;;  %v5244_v47 = vpop.f32.mrb[3].mxu0  ;;  %vm5365_vm3 = vcmp.gt.f32.partialorder %v5239_v40, 0.0 }
 0x5fa   : > { %v5416_v49 = vmul.f32 0.01, %v5241_v43  ;;  %v5245_v44 = vadd.f32 %v5244_v47, %v9412_v22  ;;  %vm5366_vm5 = vcmp.gt.f32.partialorder %v5241_v43, 0.0 }
 0x5fb   : > { %vm5367_vm4 = vcmp.gt.f32.partialorder %v5243_v41, 0.0  ;;  %v5417_v27 = vmul.f32 0.01, %v5243_v41  ;;  %v5465_v50 = vsel %vm5365_vm3, %v5239_v40, %v5415_v46 }
 0x5fc   : > { %v5418_v30 = vmul.f32 0.01, %v5245_v44  ;;  %vm5368_vm6 = vcmp.gt.f32.partialorder %v5245_v44, 0.0  ;;  %v5466_v2 = vsel %vm5366_vm5, %v5241_v43, %v5416_v49 }
 0x5fd   : > { %v5467_v3 = vsel %vm5367_vm4, %v5243_v41, %v5417_v27 }
 0x5fe   : > { %v5248_v12 = vpop.f32.mrb[4].mxu0  ;;  %v5468_v59 = vsel %vm5368_vm6, %v5245_v44, %v5418_v30  ;;  %v5515_v45 = vpack.c.bf16 %v5467_v3, %v5465_v50 }
 0x5ff   : > { %v5249_v53 = vadd.f32 %v5248_v12, %v9409_v39  ;;  %v5250_v11 = vpop.f32.mrb[5].mxu0  ;;  %v5516_v55 = vpack.c.bf16 %v5468_v59, %v5466_v2 }
 0x600   : > { %v5251_v8 = vadd.f32 %v5250_v11, %v9412_v22  ;;  %v5252_v56 = vpop.f32.mrb[6].mxu0 }
 0x601   : > { %v5419_v9 = vmul.f32 0.01, %v5249_v53  ;;  %v5253_v58 = vadd.f32 %v5252_v56, %v9409_v39  ;;  %v5254_v20 = vpop.f32.mrb[7].mxu0  ;;  %5708 = vmatprep.mubr.bf16.mxu1 %v5516_v55  ;;  %vm5369_vm7 = vcmp.gt.f32.partialorder %v5249_v53, 0.0 }
 0x602   : > { %v5420_v48 = vmul.f32 0.01, %v5251_v8  ;;  %v5255_v38 = vadd.f32 %v5254_v20, %v9412_v22  ;;  %5709 = vmatmul.mubr.bf16.vlgmr.msra.gmra.mrb[0].mxu1 %v5515_v45  ;;  %vm5370_vm8 = vcmp.gt.f32.partialorder %v5251_v8, 0.0 }
 0x603   : > { %vm5371_vm9 = vcmp.gt.f32.partialorder %v5253_v58, 0.0  ;;  %v5421_v62 = vmul.f32 0.01, %v5253_v58  ;;  %v5469_v14 = vsel %vm5369_vm7, %v5249_v53, %v5419_v9 }
 0x604   : > { %vm5372_vm10 = vcmp.gt.f32.partialorder %v5255_v38, 0.0  ;;  %v5422_v60 = vmul.f32 0.01, %v5255_v38  ;;  %v5470_v29 = vsel %vm5370_vm8, %v5251_v8, %v5420_v48 }
 0x605   : > { %v5471_v61 = vsel %vm5371_vm9, %v5253_v58, %v5421_v62 }
 0x606   : > { %v5258_v0 = vpop.f32.mrb[8].mxu0  ;;  %v5472_v6 = vsel %vm5372_vm10, %v5255_v38, %v5422_v60  ;;  %v5517_v4 = vpack.c.bf16 %v5471_v61, %v5469_v14 }
 0x607   : > { %v5259_v1 = vadd.f32 %v5258_v0, %v9409_v39  ;;  %v5260_v19 = vpop.f32.mrb[9].mxu0  ;;  %v5518_v10 = vpack.c.bf16 %v5472_v6, %v5470_v29 }
 0x608   : > { %v5261_v26 = vadd.f32 %v5260_v19, %v9412_v22  ;;  %v5262_v57 = vpop.f32.mrb[10].mxu0 }
 0x609   : > { %v5423_v16 = vmul.f32 0.01, %v5259_v1  ;;  %v5263_v21 = vadd.f32 %v5262_v57, %v9409_v39  ;;  %v5264_v63 = vpop.f32.mrb[11].mxu0  ;;  %5716 = vmatprep.mubr.bf16.mxu1 %v5518_v10  ;;  %vm5373_vm11 = vcmp.gt.f32.partialorder %v5259_v1, 0.0 }
 0x60a   : > { %v5424_v51 = vmul.f32 0.01, %v5261_v26  ;;  %v5265_v24 = vadd.f32 %v5264_v63, %v9412_v22  ;;  %5717 = vmatmul.mubr.bf16.gmra.mrb[4].mxu1 %v5517_v4  ;;  %vm5374_vm12 = vcmp.gt.f32.partialorder %v5261_v26, 0.0 }
 0x60b   : > { %vm5375_vm13 = vcmp.gt.f32.partialorder %v5263_v21, 0.0  ;;  %v5425_v52 = vmul.f32 0.01, %v5263_v21  ;;  %v5473_v15 = vsel %vm5373_vm11, %v5259_v1, %v5423_v16 }
 0x60c   : > { %vm5376_vm14 = vcmp.gt.f32.partialorder %v5265_v24, 0.0  ;;  %v5426_v34 = vmul.f32 0.01, %v5265_v24  ;;  %v5474_v23 = vsel %vm5374_vm12, %v5261_v26, %v5424_v51 }
 0x60d   : > { %v5475_v17 = vsel %vm5375_vm13, %v5263_v21, %v5425_v52 }
 0x60e   : > { %v5268_v7 = vpop.f32.mrb[12].mxu0  ;;  %v5476_v54 = vsel %vm5376_vm14, %v5265_v24, %v5426_v34  ;;  %v5519_v36 = vpack.c.bf16 %v5475_v17, %v5473_v15 }
 0x60f   : > { %v5269_v18 = vadd.f32 %v5268_v7, %v9409_v39  ;;  %v5270_v31 = vpop.f32.mrb[13].mxu0  ;;  %v5520_v32 = vpack.c.bf16 %v5476_v54, %v5474_v23 }
 0x610   : > { %v5271_v13 = vadd.f32 %v5270_v31, %v9412_v22  ;;  %v5272_v33 = vpop.f32.mrb[14].mxu0 }
 0x611   : > { %v5427_v35 = vmul.f32 0.01, %v5269_v18  ;;  %v5273_v37 = vadd.f32 %v5272_v33, %v9409_v39  ;;  %v5274_v25 = vpop.f32.mrb[15].mxu0  ;;  %5724 = vmatprep.mubr.bf16.mxu1 %v5520_v32  ;;  %vm5377_vm15 = vcmp.gt.f32.partialorder %v5269_v18, 0.0 }
 0x612   : > { %v5428_v28 = vmul.f32 0.01, %v5271_v13  ;;  %v5275_v40 = vadd.f32 %v5274_v25, %v9412_v22  ;;  %5725 = vmatmul.mubr.bf16.gmra.mrb[8].mxu1 %v5519_v36  ;;  %vm5378_vm0 = vcmp.gt.f32.partialorder %v5271_v13, 0.0 }
 0x613   : > { %vm5379_vm1 = vcmp.gt.f32.partialorder %v5273_v37, 0.0  ;;  %v5429_v42 = vmul.f32 0.01, %v5273_v37  ;;  %v5477_v5 = vsel %vm5377_vm15, %v5269_v18, %v5427_v35 }
 0x614   : > { %vm5380_vm2 = vcmp.gt.f32.partialorder %v5275_v40, 0.0  ;;  %v5430_v43 = vmul.f32 0.01, %v5275_v40  ;;  %v5478_v47 = vsel %vm5378_vm0, %v5271_v13, %v5428_v28 }
 0x615   : > { %v5479_v46 = vsel %vm5379_vm1, %v5273_v37, %v5429_v42 }
 0x616   : > { %v5278_v41 = vpop.f32.mrb[16].mxu0  ;;  %v5480_v49 = vsel %vm5380_vm2, %v5275_v40, %v5430_v43  ;;  %v5521_v44 = vpack.c.bf16 %v5479_v46, %v5477_v5 }
 0x617   : > { %v5279_v27 = vadd.f32 %v5278_v41, %v9409_v39  ;;  %v5280_v30 = vpop.f32.mrb[17].mxu0  ;;  %v5522_v50 = vpack.c.bf16 %v5480_v49, %v5478_v47 }
 0x618   : > { %v5281_v3 = vadd.f32 %v5280_v30, %v9412_v22  ;;  %v5282_v12 = vpop.f32.mrb[18].mxu0 }
 0x619   : > { %v5431_v2 = vmul.f32 0.01, %v5279_v27  ;;  %v5283_v59 = vadd.f32 %v5282_v12, %v9409_v39  ;;  %v5284_v45 = vpop.f32.mrb[19].mxu0  ;;  %5732 = vmatprep.mubr.bf16.mxu1 %v5522_v50  ;;  %vm5381_vm3 = vcmp.gt.f32.partialorder %v5279_v27, 0.0 }
 0x61a   : > { %v5432_v53 = vmul.f32 0.01, %v5281_v3  ;;  %v5285_v11 = vadd.f32 %v5284_v45, %v9412_v22  ;;  %5733 = vmatmul.mubr.bf16.gmra.mrb[12].mxu1 %v5521_v44  ;;  %vm5382_vm4 = vcmp.gt.f32.partialorder %v5281_v3, 0.0 }
 0x61b   : > { %vm5383_vm5 = vcmp.gt.f32.partialorder %v5283_v59, 0.0  ;;  %v5433_v55 = vmul.f32 0.01, %v5283_v59  ;;  %v5481_v56 = vsel %vm5381_vm3, %v5279_v27, %v5431_v2 }
 0x61c   : > { %vm5384_vm6 = vcmp.gt.f32.partialorder %v5285_v11, 0.0  ;;  %v5434_v8 = vmul.f32 0.01, %v5285_v11  ;;  %v5482_v20 = vsel %vm5382_vm4, %v5281_v3, %v5432_v53 }
 0x61d   : > { %v5483_v9 = vsel %vm5383_vm5, %v5283_v59, %v5433_v55 }
 0x61e   : > { %v5288_v58 = vpop.f32.mrb[20].mxu0  ;;  %v5484_v48 = vsel %vm5384_vm6, %v5285_v11, %v5434_v8  ;;  %v5523_v38 = vpack.c.bf16 %v5483_v9, %v5481_v56 }
 0x61f   : > { %v5289_v62 = vadd.f32 %v5288_v58, %v9409_v39  ;;  %v5290_v60 = vpop.f32.mrb[21].mxu0  ;;  %v5524_v14 = vpack.c.bf16 %v5484_v48, %v5482_v20 }
 0x620   : > { %v5291_v61 = vadd.f32 %v5290_v60, %v9412_v22  ;;  %v5292_v0 = vpop.f32.mrb[22].mxu0 }
 0x621   : > { %v5435_v29 = vmul.f32 0.01, %v5289_v62  ;;  %v5293_v6 = vadd.f32 %v5292_v0, %v9409_v39  ;;  %v5294_v4 = vpop.f32.mrb[23].mxu0  ;;  %5740 = vmatprep.mubr.bf16.mxu1 %v5524_v14  ;;  %vm5385_vm7 = vcmp.gt.f32.partialorder %v5289_v62, 0.0 }
 0x622   : > { %v5436_v1 = vmul.f32 0.01, %v5291_v61  ;;  %v5295_v19 = vadd.f32 %v5294_v4, %v9412_v22  ;;  %5741 = vmatmul.mubr.bf16.gmra.mrb[16].mxu1 %v5523_v38  ;;  %vm5386_vm8 = vcmp.gt.f32.partialorder %v5291_v61, 0.0 }
 0x623   : > { %vm5387_vm9 = vcmp.gt.f32.partialorder %v5293_v6, 0.0  ;;  %v5437_v10 = vmul.f32 0.01, %v5293_v6  ;;  %v5485_v57 = vsel %vm5385_vm7, %v5289_v62, %v5435_v29 }
 0x624   : > { %vm5388_vm10 = vcmp.gt.f32.partialorder %v5295_v19, 0.0  ;;  %v5438_v26 = vmul.f32 0.01, %v5295_v19  ;;  %v5486_v63 = vsel %vm5386_vm8, %v5291_v61, %v5436_v1 }
 0x625   : > { %v5487_v16 = vsel %vm5387_vm9, %v5293_v6, %v5437_v10 }
 0x626   : > { %v5298_v21 = vpop.f32.mrb[24].mxu0  ;;  %v5488_v51 = vsel %vm5388_vm10, %v5295_v19, %v5438_v26  ;;  %v5525_v24 = vpack.c.bf16 %v5487_v16, %v5485_v57 }
 0x627   : > { %v5299_v52 = vadd.f32 %v5298_v21, %v9409_v39  ;;  %v5300_v34 = vpop.f32.mrb[25].mxu0  ;;  %v5526_v15 = vpack.c.bf16 %v5488_v51, %v5486_v63 }
 0x628   : > { %v5301_v17 = vadd.f32 %v5300_v34, %v9412_v22  ;;  %v5302_v7 = vpop.f32.mrb[26].mxu0 }
 0x629   : > { %v5439_v23 = vmul.f32 0.01, %v5299_v52  ;;  %v5303_v54 = vadd.f32 %v5302_v7, %v9409_v39  ;;  %v5304_v36 = vpop.f32.mrb[27].mxu0  ;;  %5748 = vmatprep.mubr.bf16.mxu1 %v5526_v15  ;;  %vm5389_vm11 = vcmp.gt.f32.partialorder %v5299_v52, 0.0 }
 0x62a   : > { %v5440_v18 = vmul.f32 0.01, %v5301_v17  ;;  %v5305_v31 = vadd.f32 %v5304_v36, %v9412_v22  ;;  %5749 = vmatmul.mubr.bf16.gmra.mrb[20].mxu1 %v5525_v24  ;;  %vm5390_vm12 = vcmp.gt.f32.partialorder %v5301_v17, 0.0 }
 0x62b   : > { %vm5391_vm13 = vcmp.gt.f32.partialorder %v5303_v54, 0.0  ;;  %v5441_v32 = vmul.f32 0.01, %v5303_v54  ;;  %v5489_v33 = vsel %vm5389_vm11, %v5299_v52, %v5439_v23 }
 0x62c   : > { %vm5392_vm14 = vcmp.gt.f32.partialorder %v5305_v31, 0.0  ;;  %v5442_v13 = vmul.f32 0.01, %v5305_v31  ;;  %v5490_v25 = vsel %vm5390_vm12, %v5301_v17, %v5440_v18 }
 0x62d   : > { %v5491_v35 = vsel %vm5391_vm13, %v5303_v54, %v5441_v32 }
 0x62e   : > { %v5308_v37 = vpop.f32.mrb[28].mxu0  ;;  %v5492_v28 = vsel %vm5392_vm14, %v5305_v31, %v5442_v13  ;;  %v5527_v40 = vpack.c.bf16 %v5491_v35, %v5489_v33 }
 0x62f   : > { %v5309_v42 = vadd.f32 %v5308_v37, %v9409_v39  ;;  %v5310_v43 = vpop.f32.mrb[29].mxu0  ;;  %v5528_v5 = vpack.c.bf16 %v5492_v28, %v5490_v25 }
 0x630   : > { %v5311_v46 = vadd.f32 %v5310_v43, %v9412_v22  ;;  %v5312_v41 = vpop.f32.mrb[30].mxu0 }
 0x631   : > { %v5443_v47 = vmul.f32 0.01, %v5309_v42  ;;  %v5313_v49 = vadd.f32 %v5312_v41, %v9409_v39  ;;  %v5314_v44 = vpop.f32.mrb[31].mxu0  ;;  %5756 = vmatprep.mubr.bf16.mxu1 %v5528_v5  ;;  %vm5393_vm15 = vcmp.gt.f32.partialorder %v5309_v42, 0.0 }
 0x632   : > { %v5444_v27 = vmul.f32 0.01, %v5311_v46  ;;  %v5315_v30 = vadd.f32 %v5314_v44, %v9412_v22  ;;  %5757 = vmatmul.mubr.bf16.gmra.mrb[24].mxu1 %v5527_v40  ;;  %vm5394_vm0 = vcmp.gt.f32.partialorder %v5311_v46, 0.0 }
 0x633   : > { %vm5395_vm1 = vcmp.gt.f32.partialorder %v5313_v49, 0.0  ;;  %v5445_v50 = vmul.f32 0.01, %v5313_v49  ;;  %v5493_v12 = vsel %vm5393_vm15, %v5309_v42, %v5443_v47 }
 0x634   : > { %vm5396_vm2 = vcmp.gt.f32.partialorder %v5315_v30, 0.0  ;;  %v5446_v3 = vmul.f32 0.01, %v5315_v30  ;;  %v5494_v45 = vsel %vm5394_vm0, %v5311_v46, %v5444_v27 }
 0x635   : > { %v5495_v2 = vsel %vm5395_vm1, %v5313_v49, %v5445_v50 }
 0x636   : > { %v5318_v59 = vpop.f32.mrb[32].mxu0  ;;  %v5496_v53 = vsel %vm5396_vm2, %v5315_v30, %v5446_v3  ;;  %v5529_v11 = vpack.c.bf16 %v5495_v2, %v5493_v12 }
 0x637   : > { %v5319_v55 = vadd.f32 %v5318_v59, %v9409_v39  ;;  %v5320_v8 = vpop.f32.mrb[33].mxu0  ;;  %v5530_v56 = vpack.c.bf16 %v5496_v53, %v5494_v45 }
 0x638   : > { %v5321_v9 = vadd.f32 %v5320_v8, %v9412_v22  ;;  %v5322_v58 = vpop.f32.mrb[34].mxu0 }
 0x639   : > { %v5447_v20 = vmul.f32 0.01, %v5319_v55  ;;  %v5323_v48 = vadd.f32 %v5322_v58, %v9409_v39  ;;  %v5324_v38 = vpop.f32.mrb[35].mxu0  ;;  %5764 = vmatprep.mubr.bf16.mxu1 %v5530_v56  ;;  %vm5397_vm3 = vcmp.gt.f32.partialorder %v5319_v55, 0.0 }
 0x63a   : > { %v5448_v62 = vmul.f32 0.01, %v5321_v9  ;;  %v5325_v60 = vadd.f32 %v5324_v38, %v9412_v22  ;;  %5765 = vmatmul.mubr.bf16.gmra.mrb[28].mxu1 %v5529_v11  ;;  %vm5398_vm4 = vcmp.gt.f32.partialorder %v5321_v9, 0.0 }
 0x63b   : > { %vm5399_vm5 = vcmp.gt.f32.partialorder %v5323_v48, 0.0  ;;  %v5449_v14 = vmul.f32 0.01, %v5323_v48  ;;  %v5497_v0 = vsel %vm5397_vm3, %v5319_v55, %v5447_v20 }
 0x63c   : > { %vm5400_vm6 = vcmp.gt.f32.partialorder %v5325_v60, 0.0  ;;  %v5450_v61 = vmul.f32 0.01, %v5325_v60  ;;  %v5498_v4 = vsel %vm5398_vm4, %v5321_v9, %v5448_v62 }
 0x63d   : > { %v5499_v29 = vsel %vm5399_vm5, %v5323_v48, %v5449_v14  ;;  %vm5962_vm5 = vcmask 130048  }
 0x63e   : > { %v5328_v6 = vpop.f32.mrb[36].mxu0  ;;  %v5500_v1 = vsel %vm5400_vm6, %v5325_v60, %v5450_v61  ;;  %v5531_v19 = vpack.c.bf16 %v5499_v29, %v5497_v0  ;;  %vm5987_vm6 = vcmask 125952  }
 0x63f   : > { %v5329_v10 = vadd.f32 %v5328_v6, %v9409_v39  ;;  %v5330_v26 = vpop.f32.mrb[37].mxu0  ;;  %v5532_v57 = vpack.c.bf16 %v5500_v1, %v5498_v4 }
 0x640   : > { %v5331_v16 = vadd.f32 %v5330_v26, %v9412_v22  ;;  %v5332_v21 = vpop.f32.mrb[38].mxu0 }
 0x641   : > { %v5451_v63 = vmul.f32 0.01, %v5329_v10  ;;  %v5333_v51 = vadd.f32 %v5332_v21, %v9409_v39  ;;  %v5334_v24 = vpop.f32.mrb[39].mxu0  ;;  %5772 = vmatprep.mubr.bf16.mxu1 %v5532_v57  ;;  %vm5401_vm7 = vcmp.gt.f32.partialorder %v5329_v10, 0.0 }
 0x642   : > { %v5452_v52 = vmul.f32 0.01, %v5331_v16  ;;  %v5335_v34 = vadd.f32 %v5334_v24, %v9412_v22  ;;  %5773 = vmatmul.mubr.bf16.gmra.mrb[32].mxu1 %v5531_v19  ;;  %vm5402_vm8 = vcmp.gt.f32.partialorder %v5331_v16, 0.0 }
 0x643   : > { %vm5403_vm9 = vcmp.gt.f32.partialorder %v5333_v51, 0.0  ;;  %v5453_v15 = vmul.f32 0.01, %v5333_v51  ;;  %v5501_v7 = vsel %vm5401_vm7, %v5329_v10, %v5451_v63 }
 0x644   : > { %vm5404_vm10 = vcmp.gt.f32.partialorder %v5335_v34, 0.0  ;;  %v5454_v17 = vmul.f32 0.01, %v5335_v34  ;;  %v5502_v36 = vsel %vm5402_vm8, %v5331_v16, %v5452_v52 }
 0x645   : > { %v5503_v23 = vsel %vm5403_vm9, %v5333_v51, %v5453_v15 }
 0x646   : > { %v5338_v54 = vpop.f32.mrb[40].mxu0  ;;  %v5504_v18 = vsel %vm5404_vm10, %v5335_v34, %v5454_v17  ;;  %v5533_v31 = vpack.c.bf16 %v5503_v23, %v5501_v7 }
 0x647   : > { %v5339_v32 = vadd.f32 %v5338_v54, %v9409_v39  ;;  %v5340_v13 = vpop.f32.mrb[41].mxu0  ;;  %v5534_v33 = vpack.c.bf16 %v5504_v18, %v5502_v36 }
 0x648   : > { %v5341_v35 = vadd.f32 %v5340_v13, %v9412_v22  ;;  %v5342_v37 = vpop.f32.mrb[42].mxu0 }
 0x649   : > { %v5455_v25 = vmul.f32 0.01, %v5339_v32  ;;  %v5343_v28 = vadd.f32 %v5342_v37, %v9409_v39  ;;  %v5344_v40 = vpop.f32.mrb[43].mxu0  ;;  %5780 = vmatprep.mubr.bf16.mxu1 %v5534_v33  ;;  %vm5405_vm11 = vcmp.gt.f32.partialorder %v5339_v32, 0.0 }
 0x64a   : > { %v5456_v42 = vmul.f32 0.01, %v5341_v35  ;;  %v5345_v43 = vadd.f32 %v5344_v40, %v9412_v22  ;;  %5781 = vmatmul.mubr.bf16.gmra.mrb[36].mxu1 %v5533_v31  ;;  %vm5406_vm12 = vcmp.gt.f32.partialorder %v5341_v35, 0.0 }
 0x64b   : > { %vm5407_vm13 = vcmp.gt.f32.partialorder %v5343_v28, 0.0  ;;  %v5457_v5 = vmul.f32 0.01, %v5343_v28  ;;  %v5505_v41 = vsel %vm5405_vm11, %v5339_v32, %v5455_v25 }
 0x64c   : > { %vm5408_vm14 = vcmp.gt.f32.partialorder %v5345_v43, 0.0  ;;  %v5458_v46 = vmul.f32 0.01, %v5345_v43  ;;  %v5506_v44 = vsel %vm5406_vm12, %v5341_v35, %v5456_v42 }
 0x64d   : > { %v5507_v47 = vsel %vm5407_vm13, %v5343_v28, %v5457_v5 }
 0x64e   : > { %v5348_v49 = vpop.f32.mrb[44].mxu0  ;;  %v5508_v27 = vsel %vm5408_vm14, %v5345_v43, %v5458_v46  ;;  %v5535_v30 = vpack.c.bf16 %v5507_v47, %v5505_v41 }
 0x64f   : > { %v5349_v50 = vadd.f32 %v5348_v49, %v9409_v39  ;;  %v5350_v3 = vpop.f32.mrb[45].mxu0  ;;  %v5536_v12 = vpack.c.bf16 %v5508_v27, %v5506_v44 }
 0x650   : > { %v5351_v2 = vadd.f32 %v5350_v3, %v9412_v22  ;;  %v5352_v59 = vpop.f32.mrb[46].mxu0 }
 0x651   : > { %v5459_v45 = vmul.f32 0.01, %v5349_v50  ;;  %v5353_v53 = vadd.f32 %v5352_v59, %v9409_v39  ;;  %v5354_v11 = vpop.f32.mrb[47].mxu0  ;;  %5788 = vmatprep.mubr.bf16.mxu1 %v5536_v12  ;;  %vm5409_vm15 = vcmp.gt.f32.partialorder %v5349_v50, 0.0 }
 0x652   : > { %v5460_v55 = vmul.f32 0.01, %v5351_v2  ;;  %v5355_v8 = vadd.f32 %v5354_v11, %v9412_v22  ;;  %5789 = vmatmul.mubr.bf16.gmra.mrb[40].mxu1 %v5535_v30  ;;  %vm5410_vm0 = vcmp.gt.f32.partialorder %v5351_v2, 0.0 }
 0x653   : > { %vm5411_vm1 = vcmp.gt.f32.partialorder %v5353_v53, 0.0  ;;  %v5461_v56 = vmul.f32 0.01, %v5353_v53  ;;  %v5509_v58 = vsel %vm5409_vm15, %v5349_v50, %v5459_v45 }
 0x654   : > { %vm5412_vm2 = vcmp.gt.f32.partialorder %v5355_v8, 0.0  ;;  %v5462_v9 = vmul.f32 0.01, %v5355_v8  ;;  %v5510_v38 = vsel %vm5410_vm0, %v5351_v2, %v5460_v55 }
 0x655   : > { %v5511_v20 = vsel %vm5411_vm1, %v5353_v53, %v5461_v56 }
 0x656   : > { %v5358_v48 = vpop.f32.mrb[48].mxu0  ;;  %v5512_v62 = vsel %vm5412_vm2, %v5355_v8, %v5462_v9  ;;  %v5537_v60 = vpack.c.bf16 %v5511_v20, %v5509_v58 }
 0x657   : > { %v5359_v14 = vadd.f32 %v5358_v48, %v9409_v39  ;;  %v5360_v61 = vpop.f32.mrb[49].mxu0  ;;  %v5538_v0 = vpack.c.bf16 %v5512_v62, %v5510_v38  ;;  %v9464_v39 = vld [vmem:[#allocation15] ss:$0 sm:$0xff] }
 0x658   : > { %v5361_v29 = vadd.f32 %v5360_v61, %v9412_v22  ;;  %v5362_v6 = vpop.f32.mrb[50].mxu0 }
 0x659   : > { %v5463_v4 = vmul.f32 0.01, %v5359_v14  ;;  %v5363_v1 = vpop.f32.mrb[51].mxu0  ;;  %5796 = vmatprep.mubr.bf16.mxu1 %v5538_v0  ;;  %vm5413_vm3 = vcmp.gt.f32.partialorder %v5359_v14, 0.0 }
 0x65a   : > { %vm5414_vm4 = vcmp.gt.f32.partialorder %v5361_v29, 0.0  ;;  %v5464_v19 = vmul.f32 0.01, %v5361_v29  ;;  %5797 = vmatmul.mubr.bf16.gmra.mrb[44].mxu1 %v5537_v60 }
 0x65b   : > { %v5513_v57 = vsel %vm5413_vm3, %v5359_v14, %v5463_v4 }
 0x65c   : > { %v5514_v10 = vsel %vm5414_vm4, %v5361_v29, %v5464_v19  ;;  %v5539_v16 = vpack.c.bf16 %v5513_v57, %v5513_v57 }
 0x65d   : > { %v5540_v26 = vpack.c.bf16 %v5514_v10, %v5514_v10 }
 0x65f   : > { %5804 = vmatprep.mubr.bf16.mxu1 %v5540_v26 }
 0x662   : > { %5805 = vmatmul.mubr.bf16.gmra.mrb[48].mxu1 %v5539_v16 }
 0x6d5   : > { %v6826_v21 = vpop.f32.mrb[0].mxu1 }
 0x6d6   : > { %v6827_v63 = vpop.f32.mrb[1].mxu1 }
 0x6d7   : > { %v6828_v51 = vadd.f32 %v6827_v63, %v6826_v21  ;;  %v6829_v22 = vpop.f32.mrb[2].mxu1 }
 0x6d8   : > { %v6830_v24 = vpop.f32.mrb[3].mxu1 }
 0x6d9   : > { %v5711_v52 = vadd.f32 %v6828_v51, %v9464_v39  ;;  %v6831_v34 = vadd.f32 %v6830_v24, %v6829_v22 }
 0x6db   : > { %v6693_v15 = vmul.f32 -1.442695, %v5711_v52  ;;  %v5714_v17 = vadd.f32 %v6831_v34, %v9464_v39 }
 0x6dd   : > { %7784 = vpow2.f32 %v6693_v15  ;;  %v6694_v7 = vmul.f32 -1.442695, %v5714_v17  ;;  %v6832_v23 = vpop.f32.mrb[4].mxu1 }
 0x6de   : > { %v6833_v54 = vpop.f32.mrb[5].mxu1 }
 0x6df   : > { %7786 = vpow2.f32 %v6694_v7  ;;  %v6834_v36 = vadd.f32 %v6833_v54, %v6832_v23  ;;  %v6835_v18 = vpop.f32.mrb[6].mxu1 }
 0x6e0   : > { %v6836_v31 = vpop.f32.mrb[7].mxu1 }
 0x6e1   : > { %v5719_v32 = vadd.f32 %v6834_v36, %v9464_v39  ;;  %v6837_v13 = vadd.f32 %v6836_v31, %v6835_v18 }
 0x6e3   : > { %v6695_v33 = vmul.f32 -1.442695, %v5719_v32  ;;  %v5722_v35 = vadd.f32 %v6837_v13, %v9464_v39 }
 0x6e5   : > { %7788 = vpow2.f32 %v6695_v33  ;;  %v6696_v37 = vmul.f32 -1.442695, %v5722_v35  ;;  %v6838_v25 = vpop.f32.mrb[8].mxu1 }
 0x6e6   : > { %v6839_v28 = vpop.f32.mrb[9].mxu1 }
 0x6e7   : > { %v7785_v40 = vpop.eup %7784  ;;  %7790 = vpow2.f32 %v6696_v37  ;;  %v6840_v42 = vadd.f32 %v6839_v28, %v6838_v25  ;;  %v6841_v43 = vpop.f32.mrb[10].mxu1 }
 0x6e8   : > { %v5887_v5 = vadd.f32 1.0, %v7785_v40  ;;  %v6842_v46 = vpop.f32.mrb[11].mxu1 }
 0x6e9   : > { %v7787_v41 = vpop.eup %7786  ;;  %v5727_v47 = vadd.f32 %v6840_v42, %v9464_v39  ;;  %v6843_v49 = vadd.f32 %v6842_v46, %v6841_v43 }
 0x6ea   : > { %7792 = vrcp.f32 %v5887_v5  ;;  %v5888_v44 = vadd.f32 1.0, %v7787_v41 }
 0x6eb   : > { %v6697_v27 = vmul.f32 -1.442695, %v5727_v47  ;;  %v5730_v30 = vadd.f32 %v6843_v49, %v9464_v39 }
 0x6ec   : > { %7794 = vrcp.f32 %v5888_v44 }
 0x6ed   : > { %7796 = vpow2.f32 %v6697_v27  ;;  %v6698_v50 = vmul.f32 -1.442695, %v5730_v30  ;;  %v6844_v3 = vpop.f32.mrb[12].mxu1 }
 0x6ee   : > { %v6845_v12 = vpop.f32.mrb[13].mxu1 }
 0x6ef   : > { %v7789_v2 = vpop.eup %7788  ;;  %7798 = vpow2.f32 %v6698_v50  ;;  %v6846_v59 = vadd.f32 %v6845_v12, %v6844_v3  ;;  %v6847_v45 = vpop.f32.mrb[14].mxu1 }
 0x6f0   : > { %v5889_v53 = vadd.f32 1.0, %v7789_v2  ;;  %v6848_v11 = vpop.f32.mrb[15].mxu1 }
 0x6f1   : > { %v7791_v55 = vpop.eup %7790  ;;  %v5735_v8 = vadd.f32 %v6846_v59, %v9464_v39  ;;  %v6849_v56 = vadd.f32 %v6848_v11, %v6847_v45 }
 0x6f2   : > { %7800 = vrcp.f32 %v5889_v53  ;;  %v5890_v9 = vadd.f32 1.0, %v7791_v55 }
 0x6f3   : > { %v6699_v58 = vmul.f32 -1.442695, %v5735_v8  ;;  %v5738_v20 = vadd.f32 %v6849_v56, %v9464_v39 }
 0x6f4   : > { %v7793_v48 = vpop.eup %7792  ;;  %7802 = vrcp.f32 %v5890_v9 }
 0x6f5   : > { %5963 = vst.msk [vmem:[%s9657_s30] sm:$0xff] %vm5962_vm5, %v7793_v48  ;;  %7804 = vpow2.f32 %v6699_v58  ;;  %v6700_v38 = vmul.f32 -1.442695, %v5738_v20  ;;  %v6850_v62 = vpop.f32.mrb[16].mxu1 }
 0x6f6   : > { %v7795_v60 = vpop.eup %7794  ;;  %v6851_v14 = vpop.f32.mrb[17].mxu1 }
 0x6f7   : > { %v7797_v61 = vpop.eup %7796  ;;  %5964 = vst.msk [vmem:[%s9658_s28 + $0x8] sm:$0xff] %vm5962_vm5, %v7795_v60  ;;  %7806 = vpow2.f32 %v6700_v38  ;;  %v6852_v0 = vadd.f32 %v6851_v14, %v6850_v62  ;;  %v6853_v29 = vpop.f32.mrb[18].mxu1 }
 0x6f8   : > { %v5891_v6 = vadd.f32 1.0, %v7797_v61  ;;  %v6854_v4 = vpop.f32.mrb[19].mxu1 }
 0x6f9   : > { %v7799_v1 = vpop.eup %7798  ;;  %v5743_v19 = vadd.f32 %v6852_v0, %v9464_v39  ;;  %v6855_v10 = vadd.f32 %v6854_v4, %v6853_v29 }
 0x6fa   : > { %7808 = vrcp.f32 %v5891_v6  ;;  %v5892_v26 = vadd.f32 1.0, %v7799_v1 }
 0x6fb   : > { %v6701_v57 = vmul.f32 -1.442695, %v5743_v19  ;;  %v5746_v16 = vadd.f32 %v6855_v10, %v9464_v39 }
 0x6fc   : > { %v7801_v21 = vpop.eup %7800  ;;  %7810 = vrcp.f32 %v5892_v26 }
 0x6fd   : > { %5965 = vst.msk [vmem:[%s9658_s28 + $0x10] sm:$0xff] %vm5962_vm5, %v7801_v21  ;;  %7812 = vpow2.f32 %v6701_v57  ;;  %v6702_v63 = vmul.f32 -1.442695, %v5746_v16  ;;  %v6856_v51 = vpop.f32.mrb[20].mxu1 }
 0x6fe   : > { %v7803_v22 = vpop.eup %7802  ;;  %v6857_v24 = vpop.f32.mrb[21].mxu1 }
 0x6ff   : > { %v7805_v52 = vpop.eup %7804  ;;  %5966 = vst.msk [vmem:[%s9658_s28 + $0x18] sm:$0xff] %vm5962_vm5, %v7803_v22  ;;  %7814 = vpow2.f32 %v6702_v63  ;;  %v6858_v34 = vadd.f32 %v6857_v24, %v6856_v51  ;;  %v6859_v15 = vpop.f32.mrb[22].mxu1 }
 0x700   : > { %v5893_v17 = vadd.f32 1.0, %v7805_v52  ;;  %v6860_v7 = vpop.f32.mrb[23].mxu1 }
 0x701   : > { %v7807_v23 = vpop.eup %7806  ;;  %v5751_v54 = vadd.f32 %v6858_v34, %v9464_v39  ;;  %v6861_v36 = vadd.f32 %v6860_v7, %v6859_v15 }
 0x702   : > { %7816 = vrcp.f32 %v5893_v17  ;;  %v5894_v18 = vadd.f32 1.0, %v7807_v23 }
 0x703   : > { %v6703_v31 = vmul.f32 -1.442695, %v5751_v54  ;;  %v5754_v32 = vadd.f32 %v6861_v36, %v9464_v39 }
 0x704   : > { %v7809_v13 = vpop.eup %7808  ;;  %7818 = vrcp.f32 %v5894_v18 }
 0x705   : > { %5967 = vst.msk [vmem:[%s9658_s28 + $0x20] sm:$0xff] %vm5962_vm5, %v7809_v13  ;;  %7820 = vpow2.f32 %v6703_v31  ;;  %v6704_v33 = vmul.f32 -1.442695, %v5754_v32  ;;  %v6862_v35 = vpop.f32.mrb[24].mxu1 }
 0x706   : > { %v7811_v37 = vpop.eup %7810  ;;  %v6863_v25 = vpop.f32.mrb[25].mxu1 }
 0x707   : > { %v7813_v28 = vpop.eup %7812  ;;  %5968 = vst.msk [vmem:[%s9658_s28 + $0x28] sm:$0xff] %vm5962_vm5, %v7811_v37  ;;  %7822 = vpow2.f32 %v6704_v33  ;;  %v6864_v40 = vadd.f32 %v6863_v25, %v6862_v35  ;;  %v6865_v42 = vpop.f32.mrb[26].mxu1 }
 0x708   : > { %v5895_v43 = vadd.f32 1.0, %v7813_v28  ;;  %v6866_v5 = vpop.f32.mrb[27].mxu1 }
 0x709   : > { %v7815_v46 = vpop.eup %7814  ;;  %v5759_v41 = vadd.f32 %v6864_v40, %v9464_v39  ;;  %v6867_v47 = vadd.f32 %v6866_v5, %v6865_v42 }
 0x70a   : > { %7824 = vrcp.f32 %v5895_v43  ;;  %v5896_v49 = vadd.f32 1.0, %v7815_v46 }
 0x70b   : > { %v6705_v44 = vmul.f32 -1.442695, %v5759_v41  ;;  %v5762_v27 = vadd.f32 %v6867_v47, %v9464_v39 }
 0x70c   : > { %v7817_v30 = vpop.eup %7816  ;;  %7826 = vrcp.f32 %v5896_v49 }
 0x70d   : > { %5969 = vst.msk [vmem:[%s9658_s28 + $0x30] sm:$0xff] %vm5962_vm5, %v7817_v30  ;;  %7828 = vpow2.f32 %v6705_v44  ;;  %v6706_v50 = vmul.f32 -1.442695, %v5762_v27  ;;  %v6868_v3 = vpop.f32.mrb[28].mxu1 }
 0x70e   : > { %v7819_v12 = vpop.eup %7818  ;;  %v6869_v2 = vpop.f32.mrb[29].mxu1 }
 0x70f   : > { %v7821_v59 = vpop.eup %7820  ;;  %5970 = vst.msk [vmem:[%s9658_s28 + $0x38] sm:$0xff] %vm5962_vm5, %v7819_v12  ;;  %7830 = vpow2.f32 %v6706_v50  ;;  %v6870_v45 = vadd.f32 %v6869_v2, %v6868_v3  ;;  %v6871_v53 = vpop.f32.mrb[30].mxu1 }
 0x710   : > { %v5897_v11 = vadd.f32 1.0, %v7821_v59  ;;  %v6872_v55 = vpop.f32.mrb[31].mxu1 }
 0x711   : > { %v7823_v8 = vpop.eup %7822  ;;  %v5767_v56 = vadd.f32 %v6870_v45, %v9464_v39  ;;  %v6873_v9 = vadd.f32 %v6872_v55, %v6871_v53 }
 0x712   : > { %7832 = vrcp.f32 %v5897_v11  ;;  %v5898_v58 = vadd.f32 1.0, %v7823_v8 }
 0x713   : > { %v6707_v20 = vmul.f32 -1.442695, %v5767_v56  ;;  %v5770_v48 = vadd.f32 %v6873_v9, %v9464_v39 }
 0x714   : > { %v7825_v38 = vpop.eup %7824  ;;  %7834 = vrcp.f32 %v5898_v58 }
 0x715   : > { %5971 = vst.msk [vmem:[%s9658_s28 + $0x40] sm:$0xff] %vm5962_vm5, %v7825_v38  ;;  %7836 = vpow2.f32 %v6707_v20  ;;  %v6708_v62 = vmul.f32 -1.442695, %v5770_v48  ;;  %v6874_v60 = vpop.f32.mrb[32].mxu1 }
 0x716   : > { %v7827_v14 = vpop.eup %7826  ;;  %v6875_v61 = vpop.f32.mrb[33].mxu1 }
 0x717   : > { %v7829_v0 = vpop.eup %7828  ;;  %5972 = vst.msk [vmem:[%s9658_s28 + $0x48] sm:$0xff] %vm5962_vm5, %v7827_v14  ;;  %7838 = vpow2.f32 %v6708_v62  ;;  %v6876_v29 = vadd.f32 %v6875_v61, %v6874_v60  ;;  %v6877_v6 = vpop.f32.mrb[34].mxu1 }
 0x718   : > { %v5899_v4 = vadd.f32 1.0, %v7829_v0  ;;  %v6878_v1 = vpop.f32.mrb[35].mxu1 }
 0x719   : > { %v7831_v19 = vpop.eup %7830  ;;  %v5775_v10 = vadd.f32 %v6876_v29, %v9464_v39  ;;  %v6879_v26 = vadd.f32 %v6878_v1, %v6877_v6 }
 0x71a   : > { %7840 = vrcp.f32 %v5899_v4  ;;  %v5900_v57 = vadd.f32 1.0, %v7831_v19 }
 0x71b   : > { %v6709_v16 = vmul.f32 -1.442695, %v5775_v10  ;;  %v5778_v21 = vadd.f32 %v6879_v26, %v9464_v39 }
 0x71c   : > { %v7833_v63 = vpop.eup %7832  ;;  %7842 = vrcp.f32 %v5900_v57 }
 0x71d   : > { %5973 = vst.msk [vmem:[%s9658_s28 + $0x50] sm:$0xff] %vm5962_vm5, %v7833_v63  ;;  %7844 = vpow2.f32 %v6709_v16  ;;  %v6710_v51 = vmul.f32 -1.442695, %v5778_v21  ;;  %v6880_v22 = vpop.f32.mrb[36].mxu1 }
 0x71e   : > { %v7835_v24 = vpop.eup %7834  ;;  %v6881_v52 = vpop.f32.mrb[37].mxu1 }
 0x71f   : > { %v7837_v34 = vpop.eup %7836  ;;  %5974 = vst.msk [vmem:[%s9658_s28 + $0x58] sm:$0xff] %vm5962_vm5, %v7835_v24  ;;  %7846 = vpow2.f32 %v6710_v51  ;;  %v6882_v15 = vadd.f32 %v6881_v52, %v6880_v22  ;;  %v6883_v17 = vpop.f32.mrb[38].mxu1 }
 0x720   : > { %v5901_v7 = vadd.f32 1.0, %v7837_v34  ;;  %v6884_v23 = vpop.f32.mrb[39].mxu1 }
 0x721   : > { %v7839_v54 = vpop.eup %7838  ;;  %v5783_v36 = vadd.f32 %v6882_v15, %v9464_v39  ;;  %v6885_v18 = vadd.f32 %v6884_v23, %v6883_v17 }
 0x722   : > { %7848 = vrcp.f32 %v5901_v7  ;;  %v5902_v31 = vadd.f32 1.0, %v7839_v54 }
 0x723   : > { %v6711_v32 = vmul.f32 -1.442695, %v5783_v36  ;;  %v5786_v13 = vadd.f32 %v6885_v18, %v9464_v39 }
 0x724   : > { %v7841_v33 = vpop.eup %7840  ;;  %7850 = vrcp.f32 %v5902_v31 }
 0x725   : > { %5975 = vst.msk [vmem:[%s9658_s28 + $0x60] sm:$0xff] %vm5962_vm5, %v7841_v33  ;;  %7852 = vpow2.f32 %v6711_v32  ;;  %v6712_v35 = vmul.f32 -1.442695, %v5786_v13  ;;  %v6886_v37 = vpop.f32.mrb[40].mxu1 }
 0x726   : > { %v7843_v25 = vpop.eup %7842  ;;  %v6887_v28 = vpop.f32.mrb[41].mxu1 }
 0x727   : > { %v7845_v40 = vpop.eup %7844  ;;  %5976 = vst.msk [vmem:[%s9658_s28 + $0x68] sm:$0xff] %vm5962_vm5, %v7843_v25  ;;  %7854 = vpow2.f32 %v6712_v35  ;;  %v6888_v42 = vadd.f32 %v6887_v28, %v6886_v37  ;;  %v6889_v43 = vpop.f32.mrb[42].mxu1 }
 0x728   : > { %v5903_v5 = vadd.f32 1.0, %v7845_v40  ;;  %v6890_v46 = vpop.f32.mrb[43].mxu1 }
 0x729   : > { %v7847_v41 = vpop.eup %7846  ;;  %v5791_v47 = vadd.f32 %v6888_v42, %v9464_v39  ;;  %v6891_v49 = vadd.f32 %v6890_v46, %v6889_v43 }
 0x72a   : > { %7856 = vrcp.f32 %v5903_v5  ;;  %v5904_v44 = vadd.f32 1.0, %v7847_v41 }
 0x72b   : > { %v6713_v27 = vmul.f32 -1.442695, %v5791_v47  ;;  %v5794_v30 = vadd.f32 %v6891_v49, %v9464_v39 }
 0x72c   : > { %v7849_v50 = vpop.eup %7848  ;;  %7858 = vrcp.f32 %v5904_v44 }
 0x72d   : > { %5977 = vst.msk [vmem:[%s9658_s28 + $0x70] sm:$0xff] %vm5962_vm5, %v7849_v50  ;;  %7860 = vpow2.f32 %v6713_v27  ;;  %v6714_v3 = vmul.f32 -1.442695, %v5794_v30  ;;  %v6892_v12 = vpop.f32.mrb[44].mxu1 }
 0x72e   : > { %v7851_v2 = vpop.eup %7850  ;;  %v6893_v59 = vpop.f32.mrb[45].mxu1 }
 0x72f   : > { %v7853_v45 = vpop.eup %7852  ;;  %5978 = vst.msk [vmem:[%s9658_s28 + $0x78] sm:$0xff] %vm5962_vm5, %v7851_v2  ;;  %7862 = vpow2.f32 %v6714_v3  ;;  %v6894_v53 = vadd.f32 %v6893_v59, %v6892_v12  ;;  %v6895_v11 = vpop.f32.mrb[46].mxu1 }
 0x730   : > { %v5905_v55 = vadd.f32 1.0, %v7853_v45  ;;  %v6896_v8 = vpop.f32.mrb[47].mxu1 }
 0x731   : > { %v7855_v56 = vpop.eup %7854  ;;  %v5799_v9 = vadd.f32 %v6894_v53, %v9464_v39  ;;  %v6897_v58 = vadd.f32 %v6896_v8, %v6895_v11 }
 0x732   : > { %7864 = vrcp.f32 %v5905_v55  ;;  %v5906_v20 = vadd.f32 1.0, %v7855_v56 }
 0x733   : > { %v6715_v48 = vmul.f32 -1.442695, %v5799_v9  ;;  %v5802_v38 = vadd.f32 %v6897_v58, %v9464_v39 }
 0x734   : > { %v7857_v62 = vpop.eup %7856  ;;  %7866 = vrcp.f32 %v5906_v20 }
 0x735   : > { %5979 = vst.msk [vmem:[%s9658_s28 + $0x80] sm:$0xff] %vm5962_vm5, %v7857_v62  ;;  %7868 = vpow2.f32 %v6715_v48  ;;  %v6716_v60 = vmul.f32 -1.442695, %v5802_v38  ;;  %v6898_v14 = vpop.f32.mrb[48].mxu1 }
 0x736   : > { %v7859_v61 = vpop.eup %7858  ;;  %v6899_v0 = vpop.f32.mrb[49].mxu1 }
 0x737   : > { %v7861_v29 = vpop.eup %7860  ;;  %5980 = vst.msk [vmem:[%s9658_s28 + $0x88] sm:$0xff] %vm5962_vm5, %v7859_v61  ;;  %7870 = vpow2.f32 %v6716_v60  ;;  %v6900_v6 = vadd.f32 %v6899_v0, %v6898_v14  ;;  %v6901_v4 = vpop.f32.mrb[50].mxu1 }
 0x738   : > { %v5907_v1 = vadd.f32 1.0, %v7861_v29  ;;  %v6902_v19 = vpop.f32.mrb[51].mxu1 }
 0x739   : > { %v7863_v10 = vpop.eup %7862  ;;  %v5807_v26 = vadd.f32 %v6900_v6, %v9464_v39 }
 0x73a   : > { %7872 = vrcp.f32 %v5907_v1  ;;  %v5908_v57 = vadd.f32 1.0, %v7863_v10 }
 0x73b   : > { %v6717_v16 = vmul.f32 -1.442695, %v5807_v26 }
 0x73c   : > { %v7865_v21 = vpop.eup %7864  ;;  %7874 = vrcp.f32 %v5908_v57 }
 0x73d   : > { %5981 = vst.msk [vmem:[%s9658_s28 + $0x90] sm:$0xff] %vm5962_vm5, %v7865_v21  ;;  %7876 = vpow2.f32 %v6717_v16 }
 0x73e   : > { %v7867_v63 = vpop.eup %7866 }
 0x73f   : > { %v7869_v51 = vpop.eup %7868  ;;  %5982 = vst.msk [vmem:[%s9658_s28 + $0x98] sm:$0xff] %vm5962_vm5, %v7867_v63 }
 0x740   : > { %v5909_v22 = vadd.f32 1.0, %v7869_v51 }
 0x741   : > { %v7871_v39 = vpop.eup %7870 }
 0x742   : > { %7878 = vrcp.f32 %v5909_v22  ;;  %v5910_v24 = vadd.f32 1.0, %v7871_v39 }
 0x744   : > { %v7873_v52 = vpop.eup %7872  ;;  %7880 = vrcp.f32 %v5910_v24 }
 0x745   : > { %5983 = vst.msk [vmem:[%s9658_s28 + $0xa0] sm:$0xff] %vm5962_vm5, %v7873_v52 }
 0x746   : > { %v7875_v34 = vpop.eup %7874 }
 0x747   : > { %v7877_v15 = vpop.eup %7876  ;;  %5984 = vst.msk [vmem:[%s9658_s28 + $0xa8] sm:$0xff] %vm5962_vm5, %v7875_v34 }
 0x748   : > { %v5911_v17 = vadd.f32 1.0, %v7877_v15 }
 0x74a   : > { %7882 = vrcp.f32 %v5911_v17 }
 0x74c   : > { %v7879_v7 = vpop.eup %7878 }
 0x74d   : > { %5985 = vst.msk [vmem:[%s9658_s28 + $0xb0] sm:$0xff] %vm5962_vm5, %v7879_v7 }
 0x74e   : > { %v7881_v23 = vpop.eup %7880 }
 0x74f   : > { %5986 = vst.msk [vmem:[%s9658_s28 + $0xb8] sm:$0xff] %vm5962_vm5, %v7881_v23 }
 0x754   : > { %v7883_v54 = vpop.eup %7882 }
 0x755   : > { %5988 = vst.msk [vmem:[%s9658_s28 + $0xc0] sm:$0xf] %vm5987_vm6, %v7883_v54 }
 0x756 PF: > { %s9659_s12 = sld [smem:[#allocation22_spill]]  ;;  %s9660_s16 = sld [smem:[#allocation23_spill]] }
 0x757   : > { %s9661_s30 = smov %s8154_s10  ;;  %s9662_s10 = smov %s8158_s11 }
 0x75c   : > { %p23_p9 = scmp.ge.s32.totalorder %s9659_s12, 9   ;;  %s9663_s11 = smov %s9660_s16 }
 0x75e   :  { %25 = sbr.rel (!%p23_p9) target bundleno = 12 (0xc), region = 147 }
 0x765   :  { %6000 = vsyncpa [#allocation5], 1 }
 0x766   :  { %6002 = vsyncpa [#allocation5 + $0x1], 1 }
 0x767   :  { %6003 = vsyncpa [#allocation7], 1 }
 0x768   :  { %6004 = vsyncpa [#allocation10], 1 }
 0x769   :  { %6006 = vsyncpa [#allocation10 + $0x1], 1 }
 0x76a   :  { %6007 = vsyncpa [#allocation13], 1 }
 0x76b   :  { %6008 = vsyncpa [#allocation16], 1 }

</bundles_post_ra>
